<compile_context>
chip_gen: v6e
topology: v6e:2x2x1
jax: 0.10.0
libtpu: 0.0.40
codegen_flags: <defaults>
</compile_context>

<pallas_src>
import functools

import jax
import jax.numpy as jnp
from jax import lax
from jax.experimental import pallas as pl
from jax.experimental.pallas import tpu as pltpu

LANE = 128


def _round_up(n, m):
    return ((n + m - 1) // m) * m


# ----------------------------- in-kernel helpers ----------------------------- #

def _mish(x):
    # mish(x) = x * tanh(softplus(x)); tanh(log t) = (t^2-1)/(t^2+1), t = 1+exp(x)
    # -> 1 exp + 1 reciprocal instead of exp + log1p + tanh (EUP pressure).
    t = 1.0 + jnp.exp(jnp.minimum(x, 20.0))
    t2 = t * t
    y = x * (t2 - 1.0) * pl.reciprocal(t2 + 1.0, approx=False)
    return jnp.where(x > 20.0, x, y)


# --------------------------------- kernel ------------------------------------ #

def _film_kernel(b_tile, t_len, c_out_pad, has_res_conv, *refs):
    if has_res_conv:
        (x_ref, cond_ref, w1_ref, wc_ref, w2_ref, wr_ref,
         vo_ref, vc_ref, mcg_o_ref, mgc_o_ref, mcg_c_ref, mgc_c_ref,
         seg_ref, rowc_ref, o_ref) = refs
    else:
        (x_ref, cond_ref, w1_ref, wc_ref, w2_ref,
         vo_ref, vc_ref, mcg_o_ref, mgc_o_ref, mcg_c_ref, mgc_c_ref,
         seg_ref, rowc_ref, o_ref) = refs
        wr_ref = None

    rows = b_tile * t_len
    cdt = w1_ref.dtype  # MXU operand dtype (f32 or bf16); accumulation is f32.

    # Precomputed per-row constants (wrapper-built, constant index map):
    #   seg  : [b_tile, rows]   row -> sample one-hot (for per-sample GN sums)
    #   rowc : [rows, b_tile+2] = [segT | left-tap-valid | right-tap-valid]
    seg = seg_ref[...]
    segT = rowc_ref[:, 0:b_tile]
    m_lo = rowc_ref[:, b_tile:b_tile + 1]        # 0 at the first timestep of a trajectory
    m_hi = rowc_ref[:, b_tile + 1:b_tile + 2]    # 0 at the last timestep

    def conv_k3(h2, w_ref, bias_row):
        # h2: [rows, Cin_pad] f32. Single fused matmul over the 3 taps:
        #   [prev | cur | next] @ [W0^T ; W1^T ; W2^T]  (128-aligned concat).
        prev = pltpu.roll(h2, 1, axis=0) * m_lo
        nxt = pltpu.roll(h2, rows - 1, axis=0) * m_hi
        hcat = jnp.concatenate([prev, h2, nxt], axis=-1).astype(cdt)
        return jnp.dot(hcat, w_ref[...], preferred_element_type=jnp.float32) + bias_row

    def group_norm(h2, mcg_ref, mgc_ref, gamma_row, beta_row, eps=1e-5):
        # Per-sample GroupNorm on a [rows, C] slab (rows = b_tile * t_len).
        # mcg already contains 1/(channels_per_group * T); padded channels map
        # to no group and come out as exact zeros.
        s1 = jnp.dot(seg, h2, preferred_element_type=jnp.float32)         # [b_tile, C]
        s2 = jnp.dot(seg, h2 * h2, preferred_element_type=jnp.float32)    # [b_tile, C]
        g_mean = jnp.dot(s1, mcg_ref[...], preferred_element_type=jnp.float32)  # [b_tile, G]
        g_msq = jnp.dot(s2, mcg_ref[...], preferred_element_type=jnp.float32)   # [b_tile, G]
        g_var = jnp.maximum(g_msq - g_mean * g_mean, 0.0)                 # clamp: no NaN from rsqrt
        g_inv = lax.rsqrt(g_var + eps)                                    # [b_tile, G]
        mean_c = jnp.dot(g_mean, mgc_ref[...], preferred_element_type=jnp.float32)  # [b_tile, C]
        inv_c = jnp.dot(g_inv, mgc_ref[...], preferred_element_type=jnp.float32)    # [b_tile, C]
        scale_c = inv_c * gamma_row
        shift_c = beta_row - mean_c * scale_c
        scale_r = jnp.dot(segT, scale_c, preferred_element_type=jnp.float32)  # [rows, C]
        shift_r = jnp.dot(segT, shift_c, preferred_element_type=jnp.float32)  # [rows, C]
        return h2 * scale_r + shift_r

    x2 = x_ref[...].reshape(rows, x_ref.shape[-1]).astype(jnp.float32)
    cd2 = cond_ref[...].reshape(rows, cond_ref.shape[-1]).astype(jnp.float32)

    # blocks[0]: Conv1d(k=3, pad=1) -> GroupNorm -> Mish
    h = conv_k3(x2, w1_ref, vo_ref[0:1, :])
    h = group_norm(h, mcg_o_ref, mgc_o_ref, vo_ref[1:2, :], vo_ref[2:3, :])
    h = _mish(h)

    # cond_encoder: Mish -> Conv1d(k=3) -> GroupNorm -> Mish (2*C_out channels,
    # stored permuted: scale channels in cols [0, c_out_pad), bias in the rest).
    e = _mish(cd2)
    e = conv_k3(e, wc_ref, vc_ref[0:1, :])
    e = group_norm(e, mcg_c_ref, mgc_c_ref, vc_ref[1:2, :], vc_ref[2:3, :])
    e = _mish(e)

    # FiLM (cond_predict_scale=True): scale * h + bias, both 128-aligned slices.
    h = e[:, :c_out_pad] * h + e[:, c_out_pad:]

    # blocks[1]: Conv1d(k=3, pad=1) -> GroupNorm -> Mish
    h = conv_k3(h, w2_ref, vo_ref[3:4, :])
    h = group_norm(h, mcg_o_ref, mgc_o_ref, vo_ref[4:5, :], vo_ref[5:6, :])
    h = _mish(h)

    # residual: 1x1 conv when in!=out, plain add when identity (no eye matmul).
    if has_res_conv:
        res = jnp.dot(x2.astype(cdt), wr_ref[...],
                      preferred_element_type=jnp.float32) + vo_ref[6:7, :]
    else:
        res = x2

    o_ref[...] = (h + res).reshape(b_tile, t_len, c_out_pad).astype(o_ref.dtype)


# --------------------------------- wrapper ----------------------------------- #

def cond_trajectory_film_1d(x_nct, cond_nct, params, n_groups=8, b_tile=None,
                            compute_dtype=jnp.float32):
    """x_nct: [B, C_in, T], cond_nct: [B, cond_dim, T] -> [B, C_out, T]."""
    batch, c_in, t_len = x_nct.shape
    cond_dim = cond_nct.shape[1]
    c_out = int(params["b1"].shape[0])
    has_res_conv = "wr" in params
    if not has_res_conv and c_in != c_out:
        raise ValueError("Identity residual requires in_channels == out_channels")
    assert c_out % n_groups == 0 and (2 * c_out) % n_groups == 0
    assert t_len % 8 == 0, "horizon must be a multiple of the 8-row sublane tile"

    f32 = jnp.float32
    c_in_pad = _round_up(c_in, LANE)
    cond_pad = _round_up(cond_dim, LANE)
    c_out_pad = _round_up(c_out, LANE)
    c2_pad = 2 * c_out_pad

    # Batch tile: aim for >=256 matmul rows per grid step (MXU-friendly).
    # TODO(synk): when scaling B_TILE / channels, budget VMEM for v7x (64 MiB)
    # and set pltpu.CompilerParams(vmem_limit_bytes=...) accordingly.
    if b_tile is None:
        b_tile = max(1, min(batch, pl.cdiv(256, t_len)))
    num_tiles = pl.cdiv(batch, b_tile)
    b_pad = num_tiles * b_tile
    rows = b_tile * t_len

    # ---- activations: NCT -> NTC, zero-pad channels to lane multiples, pad batch
    x = jnp.transpose(x_nct, (0, 2, 1)).astype(f32)
    cond = jnp.transpose(cond_nct, (0, 2, 1)).astype(f32)
    x = jnp.pad(x, ((0, b_pad - batch), (0, 0), (0, c_in_pad - c_in))).astype(compute_dtype)
    cond = jnp.pad(cond, ((0, b_pad - batch), (0, 0), (0, cond_pad - cond_dim))).astype(compute_dtype)

    # ---- channel-layout helpers ------------------------------------------------
    def to_out_layout(a):  # last axis c_out -> c_out_pad (zero pad)
        pad = [(0, 0)] * (a.ndim - 1) + [(0, c_out_pad - c_out)]
        return jnp.pad(a.astype(f32), pad)

    def to_cond_layout(a):  # last axis 2*c_out -> 2*c_out_pad: scale->[0,c_out), bias->[c_out_pad,..)
        scale, bias = a[..., :c_out], a[..., c_out:]
        pad = [(0, 0)] * (a.ndim - 1) + [(0, c_out_pad - c_out)]
        return jnp.concatenate([jnp.pad(scale.astype(f32), pad),
                                jnp.pad(bias.astype(f32), pad)], axis=-1)

    def conv_cat(w, in_pad, layout_fn):
        # torch Conv1d weight [out, in, 3] -> tap-major [3*in_pad, width]
        taps = []
        for k in range(3):
            wk = layout_fn(jnp.transpose(w[:, :, k], (1, 0)))           # [in, width]
            wk = jnp.pad(wk, ((0, in_pad - wk.shape[0]), (0, 0)))
            taps.append(wk)
        return jnp.concatenate(taps, axis=0).astype(compute_dtype)

    w1_cat = conv_cat(params["w1"], c_in_pad, to_out_layout)            # [3*c_in_pad,  c_out_pad]
    wc_cat = conv_cat(params["wc"], cond_pad, to_cond_layout)           # [3*cond_pad,  c2_pad]
    w2_cat = conv_cat(params["w2"], c_out_pad, to_out_layout)           # [3*c_out_pad, c_out_pad]

    if has_res_conv:
        wr = to_out_layout(jnp.transpose(params["wr"][:, :, 0], (1, 0)))
        wr = jnp.pad(wr, ((0, c_in_pad - c_in), (0, 0))).astype(compute_dtype)  # [c_in_pad, c_out_pad]
        br = to_out_layout(params["br"])
    else:
        wr = None
        br = jnp.zeros((c_out_pad,), f32)

    # ---- packed per-channel vectors (bias / gamma / beta) ----------------------
    zo = jnp.zeros((c_out_pad,), f32)
    vec_out = jnp.stack([to_out_layout(params["b1"]), to_out_layout(params["g1"]),
                         to_out_layout(params["be1"]), to_out_layout(params["b2"]),
                         to_out_layout(params["g2"]), to_out_layout(params["be2"]),
                         br, zo])                                        # [8, c_out_pad]
    zc = jnp.zeros((c2_pad,), f32)
    vec_cond = jnp.stack([to_cond_layout(params["bc"]), to_cond_layout(params["gc"]),
                          to_cond_layout(params["bec"]), zc, zc, zc, zc, zc])  # [8, c2_pad]

    # ---- GroupNorm one-hot group matrices (1/n folded into m_cg) ---------------
    def gn_masks(grp, cpg):
        onehot = (grp[:, None] == jnp.arange(n_groups)[None, :]).astype(f32)  # [width, G]
        return onehot / float(cpg * t_len), jnp.transpose(onehot, (1, 0))

    cpg_o = c_out // n_groups
    ch_o = jnp.arange(c_out_pad)
    grp_o = jnp.where(ch_o < c_out, ch_o // cpg_o, -1)
    m_cg_out, m_gc_out = gn_masks(grp_o, cpg_o)                         # [c_out_pad,G],[G,c_out_pad]

    cpg_c = (2 * c_out) // n_groups
    ch_c = jnp.arange(c2_pad)
    orig_c = jnp.where(ch_c < c_out, ch_c,
                       jnp.where((ch_c >= c_out_pad) & (ch_c < c_out_pad + c_out),
                                 ch_c - c_out_pad + c_out, -1))
    grp_c = jnp.where(orig_c >= 0, orig_c // cpg_c, -1)
    m_cg_cond, m_gc_cond = gn_masks(grp_c, cpg_c)                       # [c2_pad,G],[G,c2_pad]

    # ---- per-row constants: sample one-hots + conv edge masks ------------------
    r_idx = jnp.arange(rows)
    segT = (r_idx[:, None] // t_len == jnp.arange(b_tile)[None, :]).astype(f32)  # [rows, b_tile]
    m_lo = (r_idx % t_len > 0).astype(f32)[:, None]
    m_hi = (r_idx % t_len < t_len - 1).astype(f32)[:, None]
    rowc = jnp.concatenate([segT, m_lo, m_hi], axis=1)                  # [rows, b_tile+2]
    seg = jnp.transpose(segT, (1, 0))                                   # [b_tile, rows]

    # ---- pallas call ------------------------------------------------------------
    kernel = functools.partial(_film_kernel, b_tile, t_len, c_out_pad, has_res_conv)

    operands = [x, cond, w1_cat, wc_cat, w2_cat]
    if has_res_conv:
        operands.append(wr)
    operands += [vec_out, vec_cond, m_cg_out, m_gc_out, m_cg_cond, m_gc_cond, seg, rowc]

    def const_spec(arr):
        return pl.BlockSpec(arr.shape, lambda b: (0,) * arr.ndim)

    in_specs = ([pl.BlockSpec((b_tile, t_len, c_in_pad), lambda b: (b, 0, 0)),
                 pl.BlockSpec((b_tile, t_len, cond_pad), lambda b: (b, 0, 0))]
                + [const_spec(a) for a in operands[2:]])

    out = pl.pallas_call(
        kernel,
        out_shape=jax.ShapeDtypeStruct((b_pad, t_len, c_out_pad), f32),
        grid=(num_tiles,),
        in_specs=in_specs,
        out_specs=pl.BlockSpec((b_tile, t_len, c_out_pad), lambda b: (b, 0, 0)),
        compiler_params=pltpu.CompilerParams(
            dimension_semantics=("parallel",)),   # batch tiles are independent (2 TCs on v7x)
    )(*operands)

    out = out[:batch, :, :c_out]
    return jnp.transpose(out, (0, 2, 1))   # back to [B, C_out, T]


# ------------------------- pure-JAX reference (NCT) -------------------------- #

def reference(x, cond, params, n_groups=8):
    def conv1d(h, w, b, pad):
        y = lax.conv_general_dilated(h, w, window_strides=(1,), padding=[(pad, pad)],
                                     dimension_numbers=("NCH", "OIH", "NCH"))
        return y + b[None, :, None]

    def gn(h, gamma, beta, eps=1e-5):
        b_, c_, t_ = h.shape
        hr = h.reshape(b_, n_groups, (c_ // n_groups) * t_)
        m = hr.mean(-1, keepdims=True)
        v = hr.var(-1, keepdims=True)
        hn = ((hr - m) / jnp.sqrt(v + eps)).reshape(b_, c_, t_)
        return hn * gamma[None, :, None] + beta[None, :, None]

    def mish(h):
        return h * jnp.tanh(jax.nn.softplus(h))

    c_out = params["b1"].shape[0]
    out = mish(gn(conv1d(x, params["w1"], params["b1"], 1), params["g1"], params["be1"]))
    e = mish(cond)
    e = mish(gn(conv1d(e, params["wc"], params["bc"], 1), params["gc"], params["bec"]))
    scale, bias = e[:, :c_out, :], e[:, c_out:, :]
    out = scale * out + bias
    out = mish(gn(conv1d(out, params["w2"], params["b2"], 1), params["g2"], params["be2"]))
    res = conv1d(x, params["wr"], params["br"], 0) if "wr" in params else x
    return out + res


# ----------------------------------- main ------------------------------------ #

if __name__ == "__main__":
    B, C_IN, C_OUT, COND_DIM, T, N_GROUPS = 2, 4, 16, 8, 16, 8

    key = jax.random.PRNGKey(0)
    ks = jax.random.split(key, 16)
    params = {
        "w1": 0.2 * jax.random.normal(ks[0], (C_OUT, C_IN, 3), jnp.float32),
        "b1": 0.1 * jax.random.normal(ks[1], (C_OUT,), jnp.float32),
        "g1": 1.0 + 0.1 * jax.random.normal(ks[2], (C_OUT,), jnp.float32),
        "be1": 0.1 * jax.random.normal(ks[3], (C_OUT,), jnp.float32),
        "wc": 0.2 * jax.random.normal(ks[4], (2 * C_OUT, COND_DIM, 3), jnp.float32),
        "bc": 0.1 * jax.random.normal(ks[5], (2 * C_OUT,), jnp.float32),
        "gc": 1.0 + 0.1 * jax.random.normal(ks[6], (2 * C_OUT,), jnp.float32),
        "bec": 0.1 * jax.random.normal(ks[7], (2 * C_OUT,), jnp.float32),
        "w2": 0.2 * jax.random.normal(ks[8], (C_OUT, C_OUT, 3), jnp.float32),
        "b2": 0.1 * jax.random.normal(ks[9], (C_OUT,), jnp.float32),
        "g2": 1.0 + 0.1 * jax.random.normal(ks[10], (C_OUT,), jnp.float32),
        "be2": 0.1 * jax.random.normal(ks[11], (C_OUT,), jnp.float32),
        "wr": 0.2 * jax.random.normal(ks[12], (C_OUT, C_IN, 1), jnp.float32),
        "br": 0.1 * jax.random.normal(ks[13], (C_OUT,), jnp.float32),
    }

    # x: [B, in_channels, horizon]; cond: [B, cond_dim, horizon] (trajectory condition)
    x = jax.random.normal(ks[14], (B, C_IN, T), jnp.float32)
    cond = jax.random.normal(ks[15], (B, COND_DIM, T), jnp.float32)

    ref = reference(x, cond, params, n_groups=N_GROUPS)

    # exact-semantics path (f32 MXU operands)
    out_f32 = jax.block_until_ready(cond_trajectory_film_1d(x, cond, params, n_groups=N_GROUPS))
    err_f32 = float(jnp.max(jnp.abs(out_f32 - ref)))

    # performance path (bf16 MXU operands, f32 accumulation & f32 GN/Mish);
    # looser tolerance accounts for bf16 operand rounding.
    out_bf16 = jax.block_until_ready(
        cond_trajectory_film_1d(x, cond, params, n_groups=N_GROUPS,
                                compute_dtype=jnp.bfloat16))
    err_bf16 = float(jnp.max(jnp.abs(out_bf16 - ref)))

    ok = (out_f32.shape == (B, C_OUT, T)) and (err_f32 < 5e-3) and (err_bf16 < 5e-2)
    if ok:
        print("KERNEL_OK")
    else:
        print(f"MISMATCH f32_err={err_f32} bf16_err={err_bf16}")
</pallas_src>

<mosaic_0001>
module attributes {stable_mosaic.version = 11 : i64} {
  func.func @_film_kernel(%arg0: i32, %arg1: memref<2x16x128xf32, #tpu.memory_space<vmem>>, %arg2: memref<2x16x128xf32, #tpu.memory_space<vmem>>, %arg3: memref<384x128xf32, #tpu.memory_space<vmem>>, %arg4: memref<384x256xf32, #tpu.memory_space<vmem>>, %arg5: memref<384x128xf32, #tpu.memory_space<vmem>>, %arg6: memref<128x128xf32, #tpu.memory_space<vmem>>, %arg7: memref<8x128xf32, #tpu.memory_space<vmem>>, %arg8: memref<8x256xf32, #tpu.memory_space<vmem>>, %arg9: memref<128x8xf32, #tpu.memory_space<vmem>>, %arg10: memref<8x128xf32, #tpu.memory_space<vmem>>, %arg11: memref<256x8xf32, #tpu.memory_space<vmem>>, %arg12: memref<8x256xf32, #tpu.memory_space<vmem>>, %arg13: memref<2x32xf32, #tpu.memory_space<vmem>>, %arg14: memref<32x4xf32, #tpu.memory_space<vmem>>, %arg15: memref<2x16x128xf32, #tpu.memory_space<vmem>>) attributes {dimension_semantics = [#tpu.dimension_semantics<parallel>], iteration_bounds = array<i64: 1>, scalar_prefetch = 0 : i64, scratch_operands = 0 : i64, tpu.core_type = #tpu.core_type<tc>, window_params = [{transform_indices = @transform_0, window_bounds = array<i64: 2, 16, 128>}, {transform_indices = @transform_1, window_bounds = array<i64: 2, 16, 128>}, {pipeline_mode = #tpu.pipeline_mode<synchronous>, transform_indices = @transform_2, window_bounds = array<i64: 384, 128>}, {pipeline_mode = #tpu.pipeline_mode<synchronous>, transform_indices = @transform_3, window_bounds = array<i64: 384, 256>}, {pipeline_mode = #tpu.pipeline_mode<synchronous>, transform_indices = @transform_4, window_bounds = array<i64: 384, 128>}, {pipeline_mode = #tpu.pipeline_mode<synchronous>, transform_indices = @transform_5, window_bounds = array<i64: 128, 128>}, {pipeline_mode = #tpu.pipeline_mode<synchronous>, transform_indices = @transform_6, window_bounds = array<i64: 8, 128>}, {pipeline_mode = #tpu.pipeline_mode<synchronous>, transform_indices = @transform_7, window_bounds = array<i64: 8, 256>}, {pipeline_mode = #tpu.pipeline_mode<synchronous>, transform_indices = @transform_8, window_bounds = array<i64: 128, 8>}, {pipeline_mode = #tpu.pipeline_mode<synchronous>, transform_indices = @transform_9, window_bounds = array<i64: 8, 128>}, {pipeline_mode = #tpu.pipeline_mode<synchronous>, transform_indices = @transform_10, window_bounds = array<i64: 256, 8>}, {pipeline_mode = #tpu.pipeline_mode<synchronous>, transform_indices = @transform_11, window_bounds = array<i64: 8, 256>}, {pipeline_mode = #tpu.pipeline_mode<synchronous>, transform_indices = @transform_12, window_bounds = array<i64: 2, 32>}, {pipeline_mode = #tpu.pipeline_mode<synchronous>, transform_indices = @transform_13, window_bounds = array<i64: 32, 4>}, {transform_indices = @transform_14, window_bounds = array<i64: 2, 16, 128>}]} {
    %c0 = arith.constant 0 : index
    %c0_0 = arith.constant 0 : index
    %0 = vector.load %arg13[%c0, %c0_0] : memref<2x32xf32, #tpu.memory_space<vmem>>, vector<2x32xf32>
    %c0_1 = arith.constant 0 : index
    %c0_2 = arith.constant 0 : index
    %1 = vector.load %arg14[%c0_1, %c0_2] : memref<32x4xf32, #tpu.memory_space<vmem>>, vector<32x2xf32>
    %c0_3 = arith.constant 0 : index
    %c2 = arith.constant 2 : index
    %2 = vector.load %arg14[%c0_3, %c2] : memref<32x4xf32, #tpu.memory_space<vmem>>, vector<32x1xf32>
    %c0_4 = arith.constant 0 : index
    %c3 = arith.constant 3 : index
    %3 = vector.load %arg14[%c0_4, %c3] : memref<32x4xf32, #tpu.memory_space<vmem>>, vector<32x1xf32>
    %c0_5 = arith.constant 0 : index
    %c0_6 = arith.constant 0 : index
    %c0_7 = arith.constant 0 : index
    %4 = vector.load %arg1[%c0_5, %c0_6, %c0_7] : memref<2x16x128xf32, #tpu.memory_space<vmem>>, vector<2x16x128xf32>
    %5 = vector.shape_cast %4 : vector<2x16x128xf32> to vector<32x128xf32>
    %c0_8 = arith.constant 0 : index
    %c0_9 = arith.constant 0 : index
    %c0_10 = arith.constant 0 : index
    %6 = vector.load %arg2[%c0_8, %c0_9, %c0_10] : memref<2x16x128xf32, #tpu.memory_space<vmem>>, vector<2x16x128xf32>
    %7 = vector.shape_cast %6 : vector<2x16x128xf32> to vector<32x128xf32>
    %c0_11 = arith.constant 0 : index
    %c0_12 = arith.constant 0 : index
    %8 = vector.load %arg7[%c0_11, %c0_12] : memref<8x128xf32, #tpu.memory_space<vmem>>, vector<1x128xf32>
    %c1_i32 = arith.constant 1 : i32
    %9 = tpu.dynamic_rotate %5 by %c1_i32 dim 0 : vector<32x128xf32>, i32 -> vector<32x128xf32>
    %10 = vector.broadcast %2 : vector<32x1xf32> to vector<32x128xf32>
    %11 = arith.mulf %9, %10 : vector<32x128xf32>
    %c31_i32 = arith.constant 31 : i32
    %12 = tpu.dynamic_rotate %5 by %c31_i32 dim 0 : vector<32x128xf32>, i32 -> vector<32x128xf32>
    %13 = vector.broadcast %3 : vector<32x1xf32> to vector<32x128xf32>
    %14 = arith.mulf %12, %13 : vector<32x128xf32>
    %15 = tpu.concatenate %11, %5, %14 in 1 : vector<32x128xf32>, vector<32x128xf32>, vector<32x128xf32> -> vector<32x384xf32>
    %c0_13 = arith.constant 0 : index
    %c0_14 = arith.constant 0 : index
    %16 = vector.load %arg3[%c0_13, %c0_14] : memref<384x128xf32, #tpu.memory_space<vmem>>, vector<384x128xf32>
    %cst = arith.constant dense<0.000000e+00> : vector<32x128xf32>
    %17 = tpu.matmul %15, %16, %cst {dimension_numbers = #tpu.dot_dimension_numbers<[1], [0], [0], [1], [0, 0, 1, 1], [], []>} : vector<32x384xf32>, vector<384x128xf32>, vector<32x128xf32> -> vector<32x128xf32>
    %18 = vector.broadcast %8 : vector<1x128xf32> to vector<32x128xf32>
    %19 = arith.addf %17, %18 : vector<32x128xf32>
    %c1 = arith.constant 1 : index
    %c0_15 = arith.constant 0 : index
    %20 = vector.load %arg7[%c1, %c0_15] : memref<8x128xf32, #tpu.memory_space<vmem>>, vector<1x128xf32>
    %c2_16 = arith.constant 2 : index
    %c0_17 = arith.constant 0 : index
    %21 = vector.load %arg7[%c2_16, %c0_17] : memref<8x128xf32, #tpu.memory_space<vmem>>, vector<1x128xf32>
    %cst_18 = arith.constant dense<0.000000e+00> : vector<2x128xf32>
    %22 = tpu.matmul %0, %19, %cst_18 {dimension_numbers = #tpu.dot_dimension_numbers<[1], [0], [0], [1], [0, 0, 1, 1], [], []>} : vector<2x32xf32>, vector<32x128xf32>, vector<2x128xf32> -> vector<2x128xf32>
    %23 = arith.mulf %19, %19 : vector<32x128xf32>
    %cst_19 = arith.constant dense<0.000000e+00> : vector<2x128xf32>
    %24 = tpu.matmul %0, %23, %cst_19 {dimension_numbers = #tpu.dot_dimension_numbers<[1], [0], [0], [1], [0, 0, 1, 1], [], []>} : vector<2x32xf32>, vector<32x128xf32>, vector<2x128xf32> -> vector<2x128xf32>
    %c0_20 = arith.constant 0 : index
    %c0_21 = arith.constant 0 : index
    %25 = vector.load %arg9[%c0_20, %c0_21] : memref<128x8xf32, #tpu.memory_space<vmem>>, vector<128x8xf32>
    %cst_22 = arith.constant dense<0.000000e+00> : vector<2x8xf32>
    %26 = tpu.matmul %22, %25, %cst_22 {dimension_numbers = #tpu.dot_dimension_numbers<[1], [0], [0], [1], [0, 0, 1, 1], [], []>} : vector<2x128xf32>, vector<128x8xf32>, vector<2x8xf32> -> vector<2x8xf32>
    %c0_23 = arith.constant 0 : index
    %c0_24 = arith.constant 0 : index
    %27 = vector.load %arg9[%c0_23, %c0_24] : memref<128x8xf32, #tpu.memory_space<vmem>>, vector<128x8xf32>
    %cst_25 = arith.constant dense<0.000000e+00> : vector<2x8xf32>
    %28 = tpu.matmul %24, %27, %cst_25 {dimension_numbers = #tpu.dot_dimension_numbers<[1], [0], [0], [1], [0, 0, 1, 1], [], []>} : vector<2x128xf32>, vector<128x8xf32>, vector<2x8xf32> -> vector<2x8xf32>
    %29 = arith.mulf %26, %26 : vector<2x8xf32>
    %30 = arith.subf %28, %29 : vector<2x8xf32>
    %cst_26 = arith.constant 0.000000e+00 : f32
    %31 = vector.broadcast %cst_26 : f32 to vector<2x8xf32>
    %32 = arith.maximumf %30, %31 : vector<2x8xf32>
    %cst_27 = arith.constant 9.99999974E-6 : f32
    %33 = vector.broadcast %cst_27 : f32 to vector<2x8xf32>
    %34 = arith.addf %32, %33 : vector<2x8xf32>
    %35 = math.rsqrt %34 : vector<2x8xf32>
    %c0_28 = arith.constant 0 : index
    %c0_29 = arith.constant 0 : index
    %36 = vector.load %arg10[%c0_28, %c0_29] : memref<8x128xf32, #tpu.memory_space<vmem>>, vector<8x128xf32>
    %cst_30 = arith.constant dense<0.000000e+00> : vector<2x128xf32>
    %37 = tpu.matmul %26, %36, %cst_30 {dimension_numbers = #tpu.dot_dimension_numbers<[1], [0], [0], [1], [0, 0, 1, 1], [], []>} : vector<2x8xf32>, vector<8x128xf32>, vector<2x128xf32> -> vector<2x128xf32>
    %c0_31 = arith.constant 0 : index
    %c0_32 = arith.constant 0 : index
    %38 = vector.load %arg10[%c0_31, %c0_32] : memref<8x128xf32, #tpu.memory_space<vmem>>, vector<8x128xf32>
    %cst_33 = arith.constant dense<0.000000e+00> : vector<2x128xf32>
    %39 = tpu.matmul %35, %38, %cst_33 {dimension_numbers = #tpu.dot_dimension_numbers<[1], [0], [0], [1], [0, 0, 1, 1], [], []>} : vector<2x8xf32>, vector<8x128xf32>, vector<2x128xf32> -> vector<2x128xf32>
    %40 = vector.broadcast %20 : vector<1x128xf32> to vector<2x128xf32>
    %41 = arith.mulf %39, %40 : vector<2x128xf32>
    %42 = arith.mulf %37, %41 : vector<2x128xf32>
    %43 = vector.broadcast %21 : vector<1x128xf32> to vector<2x128xf32>
    %44 = arith.subf %43, %42 : vector<2x128xf32>
    %cst_34 = arith.constant dense<0.000000e+00> : vector<32x128xf32>
    %45 = tpu.matmul %1, %41, %cst_34 {dimension_numbers = #tpu.dot_dimension_numbers<[1], [0], [0], [1], [0, 0, 1, 1], [], []>} : vector<32x2xf32>, vector<2x128xf32>, vector<32x128xf32> -> vector<32x128xf32>
    %cst_35 = arith.constant dense<0.000000e+00> : vector<32x128xf32>
    %46 = tpu.matmul %1, %44, %cst_35 {dimension_numbers = #tpu.dot_dimension_numbers<[1], [0], [0], [1], [0, 0, 1, 1], [], []>} : vector<32x2xf32>, vector<2x128xf32>, vector<32x128xf32> -> vector<32x128xf32>
    %47 = arith.mulf %19, %45 : vector<32x128xf32>
    %48 = arith.addf %47, %46 : vector<32x128xf32>
    %cst_36 = arith.constant 2.000000e+01 : f32
    %49 = vector.broadcast %cst_36 : f32 to vector<32x128xf32>
    %50 = arith.minimumf %48, %49 : vector<32x128xf32>
    %51 = math.exp %50 : vector<32x128xf32>
    %cst_37 = arith.constant 1.000000e+00 : f32
    %52 = vector.broadcast %cst_37 : f32 to vector<32x128xf32>
    %53 = arith.addf %52, %51 : vector<32x128xf32>
    %54 = arith.mulf %53, %53 : vector<32x128xf32>
    %cst_38 = arith.constant 1.000000e+00 : f32
    %55 = vector.broadcast %cst_38 : f32 to vector<32x128xf32>
    %56 = arith.subf %54, %55 : vector<32x128xf32>
    %57 = arith.mulf %48, %56 : vector<32x128xf32>
    %cst_39 = arith.constant 1.000000e+00 : f32
    %58 = vector.broadcast %cst_39 : f32 to vector<32x128xf32>
    %59 = arith.addf %54, %58 : vector<32x128xf32>
    %60 = tpu.reciprocal %59 : vector<32x128xf32> -> vector<32x128xf32>
    %61 = arith.mulf %57, %60 : vector<32x128xf32>
    %cst_40 = arith.constant 2.000000e+01 : f32
    %62 = vector.broadcast %cst_40 : f32 to vector<32x128xf32>
    %63 = arith.cmpf ogt, %48, %62 : vector<32x128xf32>
    %64 = arith.select %63, %48, %61 : vector<32x128xi1>, vector<32x128xf32>
    %cst_41 = arith.constant 2.000000e+01 : f32
    %65 = vector.broadcast %cst_41 : f32 to vector<32x128xf32>
    %66 = arith.minimumf %7, %65 : vector<32x128xf32>
    %67 = math.exp %66 : vector<32x128xf32>
    %cst_42 = arith.constant 1.000000e+00 : f32
    %68 = vector.broadcast %cst_42 : f32 to vector<32x128xf32>
    %69 = arith.addf %68, %67 : vector<32x128xf32>
    %70 = arith.mulf %69, %69 : vector<32x128xf32>
    %cst_43 = arith.constant 1.000000e+00 : f32
    %71 = vector.broadcast %cst_43 : f32 to vector<32x128xf32>
    %72 = arith.subf %70, %71 : vector<32x128xf32>
    %73 = arith.mulf %7, %72 : vector<32x128xf32>
    %cst_44 = arith.constant 1.000000e+00 : f32
    %74 = vector.broadcast %cst_44 : f32 to vector<32x128xf32>
    %75 = arith.addf %70, %74 : vector<32x128xf32>
    %76 = tpu.reciprocal %75 : vector<32x128xf32> -> vector<32x128xf32>
    %77 = arith.mulf %73, %76 : vector<32x128xf32>
    %cst_45 = arith.constant 2.000000e+01 : f32
    %78 = vector.broadcast %cst_45 : f32 to vector<32x128xf32>
    %79 = arith.cmpf ogt, %7, %78 : vector<32x128xf32>
    %80 = arith.select %79, %7, %77 : vector<32x128xi1>, vector<32x128xf32>
    %c0_46 = arith.constant 0 : index
    %c0_47 = arith.constant 0 : index
    %81 = vector.load %arg8[%c0_46, %c0_47] : memref<8x256xf32, #tpu.memory_space<vmem>>, vector<1x256xf32>
    %c1_i32_48 = arith.constant 1 : i32
    %82 = tpu.dynamic_rotate %80 by %c1_i32_48 dim 0 : vector<32x128xf32>, i32 -> vector<32x128xf32>
    %83 = vector.broadcast %2 : vector<32x1xf32> to vector<32x128xf32>
    %84 = arith.mulf %82, %83 : vector<32x128xf32>
    %c31_i32_49 = arith.constant 31 : i32
    %85 = tpu.dynamic_rotate %80 by %c31_i32_49 dim 0 : vector<32x128xf32>, i32 -> vector<32x128xf32>
    %86 = vector.broadcast %3 : vector<32x1xf32> to vector<32x128xf32>
    %87 = arith.mulf %85, %86 : vector<32x128xf32>
    %88 = tpu.concatenate %84, %80, %87 in 1 : vector<32x128xf32>, vector<32x128xf32>, vector<32x128xf32> -> vector<32x384xf32>
    %c0_50 = arith.constant 0 : index
    %c0_51 = arith.constant 0 : index
    %89 = vector.load %arg4[%c0_50, %c0_51] : memref<384x256xf32, #tpu.memory_space<vmem>>, vector<384x256xf32>
    %cst_52 = arith.constant dense<0.000000e+00> : vector<32x256xf32>
    %90 = tpu.matmul %88, %89, %cst_52 {dimension_numbers = #tpu.dot_dimension_numbers<[1], [0], [0], [1], [0, 0, 1, 1], [], []>} : vector<32x384xf32>, vector<384x256xf32>, vector<32x256xf32> -> vector<32x256xf32>
    %91 = vector.broadcast %81 : vector<1x256xf32> to vector<32x256xf32>
    %92 = arith.addf %90, %91 : vector<32x256xf32>
    %c1_53 = arith.constant 1 : index
    %c0_54 = arith.constant 0 : index
    %93 = vector.load %arg8[%c1_53, %c0_54] : memref<8x256xf32, #tpu.memory_space<vmem>>, vector<1x256xf32>
    %c2_55 = arith.constant 2 : index
    %c0_56 = arith.constant 0 : index
    %94 = vector.load %arg8[%c2_55, %c0_56] : memref<8x256xf32, #tpu.memory_space<vmem>>, vector<1x256xf32>
    %cst_57 = arith.constant dense<0.000000e+00> : vector<2x256xf32>
    %95 = tpu.matmul %0, %92, %cst_57 {dimension_numbers = #tpu.dot_dimension_numbers<[1], [0], [0], [1], [0, 0, 1, 1], [], []>} : vector<2x32xf32>, vector<32x256xf32>, vector<2x256xf32> -> vector<2x256xf32>
    %96 = arith.mulf %92, %92 : vector<32x256xf32>
    %cst_58 = arith.constant dense<0.000000e+00> : vector<2x256xf32>
    %97 = tpu.matmul %0, %96, %cst_58 {dimension_numbers = #tpu.dot_dimension_numbers<[1], [0], [0], [1], [0, 0, 1, 1], [], []>} : vector<2x32xf32>, vector<32x256xf32>, vector<2x256xf32> -> vector<2x256xf32>
    %c0_59 = arith.constant 0 : index
    %c0_60 = arith.constant 0 : index
    %98 = vector.load %arg11[%c0_59, %c0_60] : memref<256x8xf32, #tpu.memory_space<vmem>>, vector<256x8xf32>
    %cst_61 = arith.constant dense<0.000000e+00> : vector<2x8xf32>
    %99 = tpu.matmul %95, %98, %cst_61 {dimension_numbers = #tpu.dot_dimension_numbers<[1], [0], [0], [1], [0, 0, 1, 1], [], []>} : vector<2x256xf32>, vector<256x8xf32>, vector<2x8xf32> -> vector<2x8xf32>
    %c0_62 = arith.constant 0 : index
    %c0_63 = arith.constant 0 : index
    %100 = vector.load %arg11[%c0_62, %c0_63] : memref<256x8xf32, #tpu.memory_space<vmem>>, vector<256x8xf32>
    %cst_64 = arith.constant dense<0.000000e+00> : vector<2x8xf32>
    %101 = tpu.matmul %97, %100, %cst_64 {dimension_numbers = #tpu.dot_dimension_numbers<[1], [0], [0], [1], [0, 0, 1, 1], [], []>} : vector<2x256xf32>, vector<256x8xf32>, vector<2x8xf32> -> vector<2x8xf32>
    %102 = arith.mulf %99, %99 : vector<2x8xf32>
    %103 = arith.subf %101, %102 : vector<2x8xf32>
    %cst_65 = arith.constant 0.000000e+00 : f32
    %104 = vector.broadcast %cst_65 : f32 to vector<2x8xf32>
    %105 = arith.maximumf %103, %104 : vector<2x8xf32>
    %cst_66 = arith.constant 9.99999974E-6 : f32
    %106 = vector.broadcast %cst_66 : f32 to vector<2x8xf32>
    %107 = arith.addf %105, %106 : vector<2x8xf32>
    %108 = math.rsqrt %107 : vector<2x8xf32>
    %c0_67 = arith.constant 0 : index
    %c0_68 = arith.constant 0 : index
    %109 = vector.load %arg12[%c0_67, %c0_68] : memref<8x256xf32, #tpu.memory_space<vmem>>, vector<8x256xf32>
    %cst_69 = arith.constant dense<0.000000e+00> : vector<2x256xf32>
    %110 = tpu.matmul %99, %109, %cst_69 {dimension_numbers = #tpu.dot_dimension_numbers<[1], [0], [0], [1], [0, 0, 1, 1], [], []>} : vector<2x8xf32>, vector<8x256xf32>, vector<2x256xf32> -> vector<2x256xf32>
    %c0_70 = arith.constant 0 : index
    %c0_71 = arith.constant 0 : index
    %111 = vector.load %arg12[%c0_70, %c0_71] : memref<8x256xf32, #tpu.memory_space<vmem>>, vector<8x256xf32>
    %cst_72 = arith.constant dense<0.000000e+00> : vector<2x256xf32>
    %112 = tpu.matmul %108, %111, %cst_72 {dimension_numbers = #tpu.dot_dimension_numbers<[1], [0], [0], [1], [0, 0, 1, 1], [], []>} : vector<2x8xf32>, vector<8x256xf32>, vector<2x256xf32> -> vector<2x256xf32>
    %113 = vector.broadcast %93 : vector<1x256xf32> to vector<2x256xf32>
    %114 = arith.mulf %112, %113 : vector<2x256xf32>
    %115 = arith.mulf %110, %114 : vector<2x256xf32>
    %116 = vector.broadcast %94 : vector<1x256xf32> to vector<2x256xf32>
    %117 = arith.subf %116, %115 : vector<2x256xf32>
    %cst_73 = arith.constant dense<0.000000e+00> : vector<32x256xf32>
    %118 = tpu.matmul %1, %114, %cst_73 {dimension_numbers = #tpu.dot_dimension_numbers<[1], [0], [0], [1], [0, 0, 1, 1], [], []>} : vector<32x2xf32>, vector<2x256xf32>, vector<32x256xf32> -> vector<32x256xf32>
    %cst_74 = arith.constant dense<0.000000e+00> : vector<32x256xf32>
    %119 = tpu.matmul %1, %117, %cst_74 {dimension_numbers = #tpu.dot_dimension_numbers<[1], [0], [0], [1], [0, 0, 1, 1], [], []>} : vector<32x2xf32>, vector<2x256xf32>, vector<32x256xf32> -> vector<32x256xf32>
    %120 = arith.mulf %92, %118 : vector<32x256xf32>
    %121 = arith.addf %120, %119 : vector<32x256xf32>
    %cst_75 = arith.constant 2.000000e+01 : f32
    %122 = vector.broadcast %cst_75 : f32 to vector<32x256xf32>
    %123 = arith.minimumf %121, %122 : vector<32x256xf32>
    %124 = math.exp %123 : vector<32x256xf32>
    %cst_76 = arith.constant 1.000000e+00 : f32
    %125 = vector.broadcast %cst_76 : f32 to vector<32x256xf32>
    %126 = arith.addf %125, %124 : vector<32x256xf32>
    %127 = arith.mulf %126, %126 : vector<32x256xf32>
    %cst_77 = arith.constant 1.000000e+00 : f32
    %128 = vector.broadcast %cst_77 : f32 to vector<32x256xf32>
    %129 = arith.subf %127, %128 : vector<32x256xf32>
    %130 = arith.mulf %121, %129 : vector<32x256xf32>
    %cst_78 = arith.constant 1.000000e+00 : f32
    %131 = vector.broadcast %cst_78 : f32 to vector<32x256xf32>
    %132 = arith.addf %127, %131 : vector<32x256xf32>
    %133 = tpu.reciprocal %132 : vector<32x256xf32> -> vector<32x256xf32>
    %134 = arith.mulf %130, %133 : vector<32x256xf32>
    %cst_79 = arith.constant 2.000000e+01 : f32
    %135 = vector.broadcast %cst_79 : f32 to vector<32x256xf32>
    %136 = arith.cmpf ogt, %121, %135 : vector<32x256xf32>
    %137 = arith.select %136, %121, %134 : vector<32x256xi1>, vector<32x256xf32>
    %138 = vector.extract_strided_slice %137 {offsets = [0, 0], sizes = [32, 128], strides = [1, 1]} : vector<32x256xf32> to vector<32x128xf32>
    %139 = arith.mulf %138, %64 : vector<32x128xf32>
    %140 = vector.extract_strided_slice %137 {offsets = [0, 128], sizes = [32, 128], strides = [1, 1]} : vector<32x256xf32> to vector<32x128xf32>
    %141 = arith.addf %139, %140 : vector<32x128xf32>
    %c3_80 = arith.constant 3 : index
    %c0_81 = arith.constant 0 : index
    %142 = vector.load %arg7[%c3_80, %c0_81] : memref<8x128xf32, #tpu.memory_space<vmem>>, vector<1x128xf32>
    %c1_i32_82 = arith.constant 1 : i32
    %143 = tpu.dynamic_rotate %141 by %c1_i32_82 dim 0 : vector<32x128xf32>, i32 -> vector<32x128xf32>
    %144 = vector.broadcast %2 : vector<32x1xf32> to vector<32x128xf32>
    %145 = arith.mulf %143, %144 : vector<32x128xf32>
    %c31_i32_83 = arith.constant 31 : i32
    %146 = tpu.dynamic_rotate %141 by %c31_i32_83 dim 0 : vector<32x128xf32>, i32 -> vector<32x128xf32>
    %147 = vector.broadcast %3 : vector<32x1xf32> to vector<32x128xf32>
    %148 = arith.mulf %146, %147 : vector<32x128xf32>
    %149 = tpu.concatenate %145, %141, %148 in 1 : vector<32x128xf32>, vector<32x128xf32>, vector<32x128xf32> -> vector<32x384xf32>
    %c0_84 = arith.constant 0 : index
    %c0_85 = arith.constant 0 : index
    %150 = vector.load %arg5[%c0_84, %c0_85] : memref<384x128xf32, #tpu.memory_space<vmem>>, vector<384x128xf32>
    %cst_86 = arith.constant dense<0.000000e+00> : vector<32x128xf32>
    %151 = tpu.matmul %149, %150, %cst_86 {dimension_numbers = #tpu.dot_dimension_numbers<[1], [0], [0], [1], [0, 0, 1, 1], [], []>} : vector<32x384xf32>, vector<384x128xf32>, vector<32x128xf32> -> vector<32x128xf32>
    %152 = vector.broadcast %142 : vector<1x128xf32> to vector<32x128xf32>
    %153 = arith.addf %151, %152 : vector<32x128xf32>
    %c4 = arith.constant 4 : index
    %c0_87 = arith.constant 0 : index
    %154 = vector.load %arg7[%c4, %c0_87] : memref<8x128xf32, #tpu.memory_space<vmem>>, vector<1x128xf32>
    %c5 = arith.constant 5 : index
    %c0_88 = arith.constant 0 : index
    %155 = vector.load %arg7[%c5, %c0_88] : memref<8x128xf32, #tpu.memory_space<vmem>>, vector<1x128xf32>
    %cst_89 = arith.constant dense<0.000000e+00> : vector<2x128xf32>
    %156 = tpu.matmul %0, %153, %cst_89 {dimension_numbers = #tpu.dot_dimension_numbers<[1], [0], [0], [1], [0, 0, 1, 1], [], []>} : vector<2x32xf32>, vector<32x128xf32>, vector<2x128xf32> -> vector<2x128xf32>
    %157 = arith.mulf %153, %153 : vector<32x128xf32>
    %cst_90 = arith.constant dense<0.000000e+00> : vector<2x128xf32>
    %158 = tpu.matmul %0, %157, %cst_90 {dimension_numbers = #tpu.dot_dimension_numbers<[1], [0], [0], [1], [0, 0, 1, 1], [], []>} : vector<2x32xf32>, vector<32x128xf32>, vector<2x128xf32> -> vector<2x128xf32>
    %c0_91 = arith.constant 0 : index
    %c0_92 = arith.constant 0 : index
    %159 = vector.load %arg9[%c0_91, %c0_92] : memref<128x8xf32, #tpu.memory_space<vmem>>, vector<128x8xf32>
    %cst_93 = arith.constant dense<0.000000e+00> : vector<2x8xf32>
    %160 = tpu.matmul %156, %159, %cst_93 {dimension_numbers = #tpu.dot_dimension_numbers<[1], [0], [0], [1], [0, 0, 1, 1], [], []>} : vector<2x128xf32>, vector<128x8xf32>, vector<2x8xf32> -> vector<2x8xf32>
    %c0_94 = arith.constant 0 : index
    %c0_95 = arith.constant 0 : index
    %161 = vector.load %arg9[%c0_94, %c0_95] : memref<128x8xf32, #tpu.memory_space<vmem>>, vector<128x8xf32>
    %cst_96 = arith.constant dense<0.000000e+00> : vector<2x8xf32>
    %162 = tpu.matmul %158, %161, %cst_96 {dimension_numbers = #tpu.dot_dimension_numbers<[1], [0], [0], [1], [0, 0, 1, 1], [], []>} : vector<2x128xf32>, vector<128x8xf32>, vector<2x8xf32> -> vector<2x8xf32>
    %163 = arith.mulf %160, %160 : vector<2x8xf32>
    %164 = arith.subf %162, %163 : vector<2x8xf32>
    %cst_97 = arith.constant 0.000000e+00 : f32
    %165 = vector.broadcast %cst_97 : f32 to vector<2x8xf32>
    %166 = arith.maximumf %164, %165 : vector<2x8xf32>
    %cst_98 = arith.constant 9.99999974E-6 : f32
    %167 = vector.broadcast %cst_98 : f32 to vector<2x8xf32>
    %168 = arith.addf %166, %167 : vector<2x8xf32>
    %169 = math.rsqrt %168 : vector<2x8xf32>
    %c0_99 = arith.constant 0 : index
    %c0_100 = arith.constant 0 : index
    %170 = vector.load %arg10[%c0_99, %c0_100] : memref<8x128xf32, #tpu.memory_space<vmem>>, vector<8x128xf32>
    %cst_101 = arith.constant dense<0.000000e+00> : vector<2x128xf32>
    %171 = tpu.matmul %160, %170, %cst_101 {dimension_numbers = #tpu.dot_dimension_numbers<[1], [0], [0], [1], [0, 0, 1, 1], [], []>} : vector<2x8xf32>, vector<8x128xf32>, vector<2x128xf32> -> vector<2x128xf32>
    %c0_102 = arith.constant 0 : index
    %c0_103 = arith.constant 0 : index
    %172 = vector.load %arg10[%c0_102, %c0_103] : memref<8x128xf32, #tpu.memory_space<vmem>>, vector<8x128xf32>
    %cst_104 = arith.constant dense<0.000000e+00> : vector<2x128xf32>
    %173 = tpu.matmul %169, %172, %cst_104 {dimension_numbers = #tpu.dot_dimension_numbers<[1], [0], [0], [1], [0, 0, 1, 1], [], []>} : vector<2x8xf32>, vector<8x128xf32>, vector<2x128xf32> -> vector<2x128xf32>
    %174 = vector.broadcast %154 : vector<1x128xf32> to vector<2x128xf32>
    %175 = arith.mulf %173, %174 : vector<2x128xf32>
    %176 = arith.mulf %171, %175 : vector<2x128xf32>
    %177 = vector.broadcast %155 : vector<1x128xf32> to vector<2x128xf32>
    %178 = arith.subf %177, %176 : vector<2x128xf32>
    %cst_105 = arith.constant dense<0.000000e+00> : vector<32x128xf32>
    %179 = tpu.matmul %1, %175, %cst_105 {dimension_numbers = #tpu.dot_dimension_numbers<[1], [0], [0], [1], [0, 0, 1, 1], [], []>} : vector<32x2xf32>, vector<2x128xf32>, vector<32x128xf32> -> vector<32x128xf32>
    %cst_106 = arith.constant dense<0.000000e+00> : vector<32x128xf32>
    %180 = tpu.matmul %1, %178, %cst_106 {dimension_numbers = #tpu.dot_dimension_numbers<[1], [0], [0], [1], [0, 0, 1, 1], [], []>} : vector<32x2xf32>, vector<2x128xf32>, vector<32x128xf32> -> vector<32x128xf32>
    %181 = arith.mulf %153, %179 : vector<32x128xf32>
    %182 = arith.addf %181, %180 : vector<32x128xf32>
    %cst_107 = arith.constant 2.000000e+01 : f32
    %183 = vector.broadcast %cst_107 : f32 to vector<32x128xf32>
    %184 = arith.minimumf %182, %183 : vector<32x128xf32>
    %185 = math.exp %184 : vector<32x128xf32>
    %cst_108 = arith.constant 1.000000e+00 : f32
    %186 = vector.broadcast %cst_108 : f32 to vector<32x128xf32>
    %187 = arith.addf %186, %185 : vector<32x128xf32>
    %188 = arith.mulf %187, %187 : vector<32x128xf32>
    %cst_109 = arith.constant 1.000000e+00 : f32
    %189 = vector.broadcast %cst_109 : f32 to vector<32x128xf32>
    %190 = arith.subf %188, %189 : vector<32x128xf32>
    %191 = arith.mulf %182, %190 : vector<32x128xf32>
    %cst_110 = arith.constant 1.000000e+00 : f32
    %192 = vector.broadcast %cst_110 : f32 to vector<32x128xf32>
    %193 = arith.addf %188, %192 : vector<32x128xf32>
    %194 = tpu.reciprocal %193 : vector<32x128xf32> -> vector<32x128xf32>
    %195 = arith.mulf %191, %194 : vector<32x128xf32>
    %cst_111 = arith.constant 2.000000e+01 : f32
    %196 = vector.broadcast %cst_111 : f32 to vector<32x128xf32>
    %197 = arith.cmpf ogt, %182, %196 : vector<32x128xf32>
    %198 = arith.select %197, %182, %195 : vector<32x128xi1>, vector<32x128xf32>
    %c0_112 = arith.constant 0 : index
    %c0_113 = arith.constant 0 : index
    %199 = vector.load %arg6[%c0_112, %c0_113] : memref<128x128xf32, #tpu.memory_space<vmem>>, vector<128x128xf32>
    %cst_114 = arith.constant dense<0.000000e+00> : vector<32x128xf32>
    %200 = tpu.matmul %5, %199, %cst_114 {dimension_numbers = #tpu.dot_dimension_numbers<[1], [0], [0], [1], [0, 0, 1, 1], [], []>} : vector<32x128xf32>, vector<128x128xf32>, vector<32x128xf32> -> vector<32x128xf32>
    %c6 = arith.constant 6 : index
    %c0_115 = arith.constant 0 : index
    %201 = vector.load %arg7[%c6, %c0_115] : memref<8x128xf32, #tpu.memory_space<vmem>>, vector<1x128xf32>
    %202 = vector.broadcast %201 : vector<1x128xf32> to vector<32x128xf32>
    %203 = arith.addf %200, %202 : vector<32x128xf32>
    %204 = arith.addf %198, %203 : vector<32x128xf32>
    %205 = vector.shape_cast %204 : vector<32x128xf32> to vector<2x16x128xf32>
    %c0_116 = arith.constant 0 : index
    %c0_117 = arith.constant 0 : index
    %c0_118 = arith.constant 0 : index
    %206 = vector.load %arg15[%c0_116, %c0_117, %c0_118] : memref<2x16x128xf32, #tpu.memory_space<vmem>>, vector<2x16x128xf32>
    tpu.vector_store %arg15[%c0_116, %c0_117, %c0_118], %205 {strides = array<i32>} : memref<2x16x128xf32, #tpu.memory_space<vmem>>, vector<2x16x128xf32>,
    return
  }
  func.func @transform_0(%arg0: i32) -> (i32, i32, i32) {
    %c0_i32 = arith.constant 0 : i32
    %c0_i32_0 = arith.constant 0 : i32
    %c0_i32_1 = arith.constant 0 : i32
    return %arg0, %c0_i32, %c0_i32_0 : i32, i32, i32
  }
  func.func @transform_1(%arg0: i32) -> (i32, i32, i32) {
    %c0_i32 = arith.constant 0 : i32
    %c0_i32_0 = arith.constant 0 : i32
    %c0_i32_1 = arith.constant 0 : i32
    return %arg0, %c0_i32, %c0_i32_0 : i32, i32, i32
  }
  func.func @transform_2(%arg0: i32) -> (i32, i32) {
    %c0_i32 = arith.constant 0 : i32
    %c0_i32_0 = arith.constant 0 : i32
    %c0_i32_1 = arith.constant 0 : i32
    return %c0_i32, %c0_i32_0 : i32, i32
  }
  func.func @transform_3(%arg0: i32) -> (i32, i32) {
    %c0_i32 = arith.constant 0 : i32
    %c0_i32_0 = arith.constant 0 : i32
    %c0_i32_1 = arith.constant 0 : i32
    return %c0_i32, %c0_i32_0 : i32, i32
  }
  func.func @transform_4(%arg0: i32) -> (i32, i32) {
    %c0_i32 = arith.constant 0 : i32
    %c0_i32_0 = arith.constant 0 : i32
    %c0_i32_1 = arith.constant 0 : i32
    return %c0_i32, %c0_i32_0 : i32, i32
  }
  func.func @transform_5(%arg0: i32) -> (i32, i32) {
    %c0_i32 = arith.constant 0 : i32
    %c0_i32_0 = arith.constant 0 : i32
    %c0_i32_1 = arith.constant 0 : i32
    return %c0_i32, %c0_i32_0 : i32, i32
  }
  func.func @transform_6(%arg0: i32) -> (i32, i32) {
    %c0_i32 = arith.constant 0 : i32
    %c0_i32_0 = arith.constant 0 : i32
    %c0_i32_1 = arith.constant 0 : i32
    return %c0_i32, %c0_i32_0 : i32, i32
  }
  func.func @transform_7(%arg0: i32) -> (i32, i32) {
    %c0_i32 = arith.constant 0 : i32
    %c0_i32_0 = arith.constant 0 : i32
    %c0_i32_1 = arith.constant 0 : i32
    return %c0_i32, %c0_i32_0 : i32, i32
  }
  func.func @transform_8(%arg0: i32) -> (i32, i32) {
    %c0_i32 = arith.constant 0 : i32
    %c0_i32_0 = arith.constant 0 : i32
    %c0_i32_1 = arith.constant 0 : i32
    return %c0_i32, %c0_i32_0 : i32, i32
  }
  func.func @transform_9(%arg0: i32) -> (i32, i32) {
    %c0_i32 = arith.constant 0 : i32
    %c0_i32_0 = arith.constant 0 : i32
    %c0_i32_1 = arith.constant 0 : i32
    return %c0_i32, %c0_i32_0 : i32, i32
  }
  func.func @transform_10(%arg0: i32) -> (i32, i32) {
    %c0_i32 = arith.constant 0 : i32
    %c0_i32_0 = arith.constant 0 : i32
    %c0_i32_1 = arith.constant 0 : i32
    return %c0_i32, %c0_i32_0 : i32, i32
  }
  func.func @transform_11(%arg0: i32) -> (i32, i32) {
    %c0_i32 = arith.constant 0 : i32
    %c0_i32_0 = arith.constant 0 : i32
    %c0_i32_1 = arith.constant 0 : i32
    return %c0_i32, %c0_i32_0 : i32, i32
  }
  func.func @transform_12(%arg0: i32) -> (i32, i32) {
    %c0_i32 = arith.constant 0 : i32
    %c0_i32_0 = arith.constant 0 : i32
    %c0_i32_1 = arith.constant 0 : i32
    return %c0_i32, %c0_i32_0 : i32, i32
  }
  func.func @transform_13(%arg0: i32) -> (i32, i32) {
    %c0_i32 = arith.constant 0 : i32
    %c0_i32_0 = arith.constant 0 : i32
    %c0_i32_1 = arith.constant 0 : i32
    return %c0_i32, %c0_i32_0 : i32, i32
  }
  func.func @transform_14(%arg0: i32) -> (i32, i32, i32) {
    %c0_i32 = arith.constant 0 : i32
    %c0_i32_0 = arith.constant 0 : i32
    %c0_i32_1 = arith.constant 0 : i32
    return %arg0, %c0_i32, %c0_i32_0 : i32, i32, i32
  }
}

</mosaic_0001>

<bundles_post_ra>
// kernel: tpu_custom_call.1
= control target key start
LH: loop header
LB: loop body
LE: loop exit
PB: predicated region body
PF: predicated region fallthrough
CT: control target
= control target key end

     0   :  { %19 = vsyncpa [#allocation3], 0  ;;  %s5697_s0 = inlined_call_operand.vmem [shape: f32[2,16,128], index: 0, kind: input, shape index: {}]   ;;  %s5698_s1 = inlined_call_operand.hbm [shape: f32[2,16,128], index: 1, kind: input, shape index: {}]   ;;  %s5699_s2 = inlined_call_operand.vmem [shape: f32[384,128], index: 2, kind: input, shape index: {}]   ;;  %s5700_s3 = inlined_call_operand.hbm [shape: f32[384,256], index: 3, kind: input, shape index: {}]   ;;  %s5701_s4 = inlined_call_operand.hbm [shape: f32[384,128], index: 4, kind: input, shape index: {}]   ;;  %s5702_s5 = inlined_call_operand.hbm [shape: f32[128,128], index: 5, kind: input, shape index: {}]   ;;  %s5703_s6 = inlined_call_operand.hbm [shape: f32[8,128], index: 6, kind: input, shape index: {}]   ;;  %s5704_s7 = inlined_call_operand.vmem [shape: f32[8,256], index: 7, kind: input, shape index: {}]   ;;  %s5705_s8 = inlined_call_operand.vmem [shape: f32[128,8], index: 8, kind: input, shape index: {}]   ;;  %s5706_s9 = inlined_call_operand.hbm [shape: f32[8,128], index: 9, kind: input, shape index: {}]   ;;  %s5707_s10 = inlined_call_operand.vmem [shape: f32[256,8], index: 10, kind: input, shape index: {}]   ;;  %s5708_s11 = inlined_call_operand.vmem [shape: f32[8,256], index: 11, kind: input, shape index: {}]   ;;  %s5709_s12 = inlined_call_operand.vmem [shape: f32[2,32], index: 12, kind: input, shape index: {}]   ;;  %s5710_s13 = inlined_call_operand.vmem [shape: f32[32,4], index: 13, kind: input, shape index: {}]   ;;  %s5711_s14 = inlined_call_operand.hbm [shape: f32[2,16,128], index: 14, kind: output, shape index: {}]  }
   0x1   :  { %20 = vsyncpa [#allocation6], 0 }
   0x2   :  { %21 = vsyncpa [#allocation9], 0 }
   0x3   :  { %22 = vsyncpa [#allocation12], 0 }
   0x4   :  { %23 = vsyncpa [#allocation4], 0  ;;  %s4419_s29 = smov [#allocation5]  }
   0x5   :  { %s45_s30 = sshll.u32 %s4419_s29, 4  ;;  %s46_s30 = int_to_ptr.vmem [resolvable:$true] %s45_s30 }
   0x6   :  { %s4277_s15 = scalar_lea.vmem %s46_s30, 12288  ;;  %p4282_p1 = scmp.lt.s32.totalorder %s46_s30, %s46_s30 }
   0x7   :  { %p4278_p0 = scmp.ne.s32.totalorder %s46_s30, %s4277_s15  ;;  %p4283_p2 = scmp.lt.s32.totalorder %s4277_s15, %s4277_s15 }
   0x9   :  { %p4284_p3 = por %p4283_p2, %p4282_p1 }
   0xb   :  { %p4285_p4 = pnand %p4284_p3, %p4278_p0 }
   0xd   :  { %4288 = shalt.err (!%p4285_p4)
}
   0xe   :  { %s4420_s16 = smov 256   ;;  %s4421_s17 = smov 16  }
   0xf   :  { %51 = dma.hbm_to_vmem [thread:$0]  %s5700_s3, 12288, %s46_s30, [#allocation6], %s4420_s16, %s4420_s16, %s4421_s17  }
  0x10   :  { %s4422_s20 = smov [#allocation8]   ;;  %s4423_s22 = smov [#allocation2]  }
  0x11   :  { %s69_s21 = sshll.u32 %s4422_s20, 4  ;;  %s31_s23 = sshll.u32 %s4423_s22, 4  ;;  %s70_s21 = int_to_ptr.vmem [resolvable:$true] %s69_s21  ;;  %s32_s23 = int_to_ptr.vmem [resolvable:$true] %s31_s23 }
  0x12   :  { %s4297_s24 = scalar_lea.vmem %s70_s21, 2048  ;;  %p4302_p6 = scmp.lt.s32.totalorder %s70_s21, %s70_s21 }
  0x13   :  { %p4298_p5 = scmp.ne.s32.totalorder %s70_s21, %s4297_s24  ;;  %p4303_p7 = scmp.lt.s32.totalorder %s4297_s24, %s4297_s24 }
  0x15   :  { %p4304_p8 = por %p4303_p7, %p4302_p6 }
  0x17   :  { %p4305_p9 = pnand %p4304_p8, %p4298_p5 }
  0x19   :  { %4308 = shalt.err (!%p4305_p9)
}
  0x1a   :  { %s4424_s25 = smov 128   ;;  %s4425_s26 = smov 8  }
  0x1b   :  { %75 = dma.hbm_to_vmem [thread:$0]  %s5702_s5, 2048, %s70_s21, [#allocation9], %s4424_s25, %s4424_s25, %s4425_s26  }
  0x1c   :  { %s4317_s3 = scalar_lea.vmem %s32_s23, 512  ;;  %p4322_p11 = scmp.lt.s32.totalorder %s32_s23, %s32_s23 }
  0x1d   :  { %p4318_p10 = scmp.ne.s32.totalorder %s32_s23, %s4317_s3  ;;  %p4323_p12 = scmp.lt.s32.totalorder %s4317_s3, %s4317_s3 }
  0x1f   :  { %p4324_p13 = por %p4323_p12, %p4322_p11 }
  0x21   :  { %p4325_p0 = pnand %p4324_p13, %p4318_p10 }
  0x23   :  { %4328 = shalt.err (!%p4325_p0)
}
  0x24   :  { %37 = dma.hbm_to_vmem [thread:$0]  %s5698_s1, 512, %s32_s23, [#allocation3], %s4424_s25, %s4424_s25, %s4425_s26  }
  0x25   :  { %s4426_s15 = smov [#allocation7]   ;;  %s4427_s17 = smov [#allocation10]  }
  0x26   :  { %s57_s16 = sshll.u32 %s4426_s15, 4  ;;  %s82_s5 = sshll.u32 %s4427_s17, 4  ;;  %s58_s16 = int_to_ptr.vmem [resolvable:$true] %s57_s16  ;;  %s83_s5 = int_to_ptr.vmem [resolvable:$true] %s82_s5 }
  0x27   :  { %s4337_s18 = scalar_lea.vmem %s58_s16, 6144  ;;  %p4342_p2 = scmp.lt.s32.totalorder %s58_s16, %s58_s16 }
  0x28   :  { %p4338_p1 = scmp.ne.s32.totalorder %s58_s16, %s4337_s18  ;;  %p4343_p3 = scmp.lt.s32.totalorder %s4337_s18, %s4337_s18 }
  0x2a   :  { %p4344_p4 = por %p4343_p3, %p4342_p2 }
  0x2c   :  { %p4345_p5 = pnand %p4344_p4, %p4338_p1 }
  0x2e   :  { %4348 = shalt.err (!%p4345_p5)
}
  0x2f   :  { %63 = dma.hbm_to_vmem [thread:$0]  %s5701_s4, 6144, %s58_s16, [#allocation6], %s4424_s25, %s4424_s25, %s4425_s26  }
  0x30   :  { %s4357_s1 = scalar_lea.vmem %s83_s5, 128  ;;  %p4362_p7 = scmp.lt.s32.totalorder %s83_s5, %s83_s5 }
  0x31   :  { %p4358_p6 = scmp.ne.s32.totalorder %s83_s5, %s4357_s1  ;;  %p4363_p8 = scmp.lt.s32.totalorder %s4357_s1, %s4357_s1 }
  0x33   :  { %p4364_p9 = por %p4363_p8, %p4362_p7 }
  0x35   :  { %p4365_p10 = pnand %p4364_p9, %p4358_p6 }
  0x37   :  { %4368 = shalt.err (!%p4365_p10)
}
  0x38   :  { %85 = dma.hbm_to_vmem [thread:$0]  %s5703_s6, 128, %s83_s5, [#allocation9]  }
  0x39   :  { %s4428_s23 = smov [#allocation11]  }
  0x3a   :  { %s96_s24 = sshll.u32 %s4428_s23, 4  ;;  %s97_s24 = int_to_ptr.vmem [resolvable:$true] %s96_s24 }
  0x3b   :  { %s4377_s27 = scalar_lea.vmem %s97_s24, 128  ;;  %p4382_p12 = scmp.lt.s32.totalorder %s97_s24, %s97_s24 }
  0x3c   :  { %p4378_p11 = scmp.ne.s32.totalorder %s97_s24, %s4377_s27  ;;  %p4383_p13 = scmp.lt.s32.totalorder %s4377_s27, %s4377_s27 }
  0x3e   :  { %p4384_p0 = por %p4383_p13, %p4382_p12 }
  0x40   :  { %p4385_p1 = pnand %p4384_p0, %p4378_p11 }
  0x42   :  { %4388 = shalt.err (!%p4385_p1)
}
  0x43   :  { %99 = dma.hbm_to_vmem [thread:$0]  %s5706_s9, 128, %s97_s24, [#allocation12]  }
  0x44   :  { %4409 = dma.done.wait [#allocation3], 512  }
  0x45   :  { %4410 = vsyncadd [#allocation3], 4294966784 }
  0x46   :  { %4411 = dma.done.wait [#allocation6], 18432  }
  0x47   :  { %4412 = vsyncadd [#allocation6], 4294948864 }
  0x48   :  { %4413 = dma.done.wait [#allocation9], 2176  }
  0x49   :  { %4414 = vsyncadd [#allocation9], 4294965120 }
  0x4a   :  { %4415 = dma.done.wait [#allocation12], 128  }
  0x4b   :  { %4416 = vsyncadd [#allocation12], 4294967168  ;;  %v4429_v0 = vmov 2   ;;  %v4539_v1 = vld [vmem:[%s5710_s13 + $0x10] sm:$0xff]  ;;  %v4544_v2 = vld [vmem:[%s5710_s13] sm:$0xff]  ;;  %v4430_v14 = vmov 3   ;;  %v144_v55 = vlaneseq }
  0x4c   :  { %4149 = vset.pattern.permute.xlu1 %v4429_v0  ;;  %4148 = vset.pattern.permute.xlu0 %v4429_v0  ;;  %v235_v3 = vld [vmem:[%s5699_s2 + $0xf8] sm:$0xff]  ;;  %v4562_v6 = vld [vmem:[%s5710_s13 + $0x8] sm:$0xff]  ;;  %v234_v7 = vld [vmem:[%s5699_s2 + $0xf0] sm:$0xff]  ;;  %vm4432_vm2 = vmmov 0   ;;  %vm428_vm3 = vcmask 261120   ;;  %vm738_vm4 = vcmask 64512  }
  0x4d   :  { %163 = vperm.xlu1 %4149, %v4539_v1   ;;  %153 = vperm.xlu0 %4148, %v4544_v2   ;;  %v219_v4 = vld [vmem:[%s5699_s2 + $0x78] sm:$0xff]  ;;  %v218_v8 = vld [vmem:[%s5699_s2 + $0x70] sm:$0xff]  ;;  %v233_v9 = vld [vmem:[%s5699_s2 + $0xe8] sm:$0xff]  ;;  %v4714_v56 = vshrl.u32 %v144_v55, 7  ;;  %vm896_vm5 = vcmask 15360   ;;  %vm905_vm6 = vcmask 1041408  }
  0x4e   :  { %v4557_v5 = vld [vmem:[%s5710_s13 + $0x18] sm:$0xff]  ;;  %3449 = vmatprep.subr.mxu0 %v235_v3  ;;  %v217_v10 = vld [vmem:[%s5699_s2 + $0x68] sm:$0xff]  ;;  %v250_v12 = vld [vmem:[%s5699_s2 + $0x170] sm:$0xff] }
  0x4f   :  { %3450 = vmatpush3.msra.mxu0 %v219_v4  ;;  %v251_v11 = vld [vmem:[%s5699_s2 + $0x178] sm:$0xff]  ;;  %v232_v13 = vld [vmem:[%s5699_s2 + $0xe0] sm:$0xff]  ;;  %v249_v16 = vld [vmem:[%s5699_s2 + $0x168] sm:$0xff]  ;;  %5725 = vst [vmem:[#allocation19_spill] sm:$0xff] %v4714_v56  ;;  %vm146_vm0 = vcmp.lt.s32.totalorder %v4714_v56, 1  ;;  %vm179_vm1 = vcmp.lt.s32.totalorder %v4714_v56, 7 }
  0x50   :  { %3451 = vmatprep.subr.mxu0 %v234_v7  ;;  %3783 = vmatprep.subr.mxu1 %v251_v11  ;;  %v216_v15 = vld [vmem:[%s5699_s2 + $0x60] sm:$0xff]  ;;  %v231_v17 = vld [vmem:[%s5699_s2 + $0xd8] sm:$0xff]  ;;  %v230_v20 = vld [vmem:[%s5699_s2 + $0xd0] sm:$0xff] }
  0x51   :  { %168 = vperm.xlu1 %4149, %v4557_v5   ;;  %158 = vperm.xlu0 %4148, %v4562_v6   ;;  %v215_v18 = vld [vmem:[%s5699_s2 + $0x58] sm:$0xff]  ;;  %v248_v19 = vld [vmem:[%s5699_s2 + $0x160] sm:$0xff]  ;;  %v214_v21 = vld [vmem:[%s5699_s2 + $0x50] sm:$0xff] }
  0x52   :  { %3452 = vmatpush3.msra.mxu0 %v218_v8  ;;  %3784 = vmatpush3.msra.mxu1 %v251_v11  ;;  %v247_v22 = vld [vmem:[%s5699_s2 + $0x158] sm:$0xff]  ;;  %v229_v23 = vld [vmem:[%s5699_s2 + $0xc8] sm:$0xff]  ;;  %v246_v25 = vld [vmem:[%s5699_s2 + $0x150] sm:$0xff] }
  0x53   :  { %3453 = vmatprep.subr.mxu0 %v233_v9  ;;  %3785 = vmatprep.subr.mxu1 %v250_v12  ;;  %v213_v24 = vld [vmem:[%s5699_s2 + $0x48] sm:$0xff]  ;;  %v228_v26 = vld [vmem:[%s5699_s2 + $0xc0] sm:$0xff]  ;;  %v227_v29 = vld [vmem:[%s5699_s2 + $0xb8] sm:$0xff] }
  0x54   :  { %3454 = vmatpush3.msra.mxu0 %v217_v10  ;;  %3786 = vmatpush3.msra.mxu1 %v250_v12  ;;  %v212_v27 = vld [vmem:[%s5699_s2 + $0x40] sm:$0xff]  ;;  %v245_v28 = vld [vmem:[%s5699_s2 + $0x148] sm:$0xff]  ;;  %v211_v30 = vld [vmem:[%s5699_s2 + $0x38] sm:$0xff] }
  0x55   :  { %4151 = vset.pattern.permute.xlu1 %v4430_v14  ;;  %4150 = vset.pattern.permute.xlu0 %v4430_v14  ;;  %v244_v31 = vld [vmem:[%s5699_s2 + $0x140] sm:$0xff]  ;;  %v226_v32 = vld [vmem:[%s5699_s2 + $0xb0] sm:$0xff]  ;;  %v243_v34 = vld [vmem:[%s5699_s2 + $0x138] sm:$0xff] }
  0x56   :  { %189 = vperm.xlu1 %4151, %v4562_v6   ;;  %185 = vperm.xlu0 %4150, %v4544_v2   ;;  %v210_v33 = vld [vmem:[%s5699_s2 + $0x30] sm:$0xff]  ;;  %v225_v35 = vld [vmem:[%s5699_s2 + $0xa8] sm:$0xff]  ;;  %v224_v38 = vld [vmem:[%s5699_s2 + $0xa0] sm:$0xff] }
  0x57   :  { %3455 = vmatprep.subr.mxu0 %v232_v13  ;;  %3787 = vmatprep.subr.mxu1 %v249_v16  ;;  %v209_v36 = vld [vmem:[%s5699_s2 + $0x28] sm:$0xff]  ;;  %v242_v37 = vld [vmem:[%s5699_s2 + $0x130] sm:$0xff]  ;;  %v208_v39 = vld [vmem:[%s5699_s2 + $0x20] sm:$0xff] }
  0x58   :  { %3456 = vmatpush3.msra.mxu0 %v216_v15  ;;  %3788 = vmatpush3.msra.mxu1 %v249_v16  ;;  %v241_v40 = vld [vmem:[%s5699_s2 + $0x128] sm:$0xff]  ;;  %v223_v41 = vld [vmem:[%s5699_s2 + $0x98] sm:$0xff]  ;;  %v222_v43 = vld [vmem:[%s5699_s2 + $0x90] sm:$0xff] }
  0x59   :  { %3457 = vmatprep.subr.mxu0 %v231_v17  ;;  %3789 = vmatprep.subr.mxu1 %v248_v19  ;;  %v207_v42 = vld [vmem:[%s5699_s2 + $0x18] sm:$0xff]  ;;  %v4681_v44 = vld [vmem:[%s5697_s0] sm:$0xff]  ;;  %v206_v46 = vld [vmem:[%s5699_s2 + $0x10] sm:$0xff] }
  0x5a   :  { %193 = vperm.xlu1 %4151, %v4539_v1   ;;  %197 = vperm.xlu0 %4150, %v4557_v5   ;;  %v240_v45 = vld [vmem:[%s5699_s2 + $0x120] sm:$0xff]  ;;  %v221_v47 = vld [vmem:[%s5699_s2 + $0x88] sm:$0xff]  ;;  %v239_v48 = vld [vmem:[%s5699_s2 + $0x118] sm:$0xff]  ;;  %v140_v58 = vrot.slane %v4681_v44, 7  ;;  %v175_v11 = vrot.slane %v4681_v44, 1 }
  0x5b   :  { %3458 = vmatpush3.msra.mxu0 %v215_v18  ;;  %3790 = vmatpush3.msra.mxu1 %v248_v19  ;;  %v205_v49 = vld [vmem:[%s5699_s2 + $0x8] sm:$0xff]  ;;  %v220_v50 = vld [vmem:[%s5699_s2 + $0x80] sm:$0xff]  ;;  %v238_v51 = vld [vmem:[%s5699_s2 + $0x110] sm:$0xff] }
  0x5c   :  { %3459 = vmatprep.subr.mxu0 %v230_v20  ;;  %3791 = vmatprep.subr.mxu1 %v247_v22  ;;  %v204_v52 = vld [vmem:[%s5699_s2] sm:$0xff]  ;;  %v237_v53 = vld [vmem:[%s5699_s2 + $0x108] sm:$0xff]  ;;  %v134_v57 = vld [vmem:[%s5697_s0 + $0x18] sm:$0xff] }
  0x5d   :  { %3460 = vmatpush3.msra.mxu0 %v214_v21  ;;  %3792 = vmatpush3.msra.mxu1 %v247_v22  ;;  %v236_v54 = vld [vmem:[%s5699_s2 + $0x100] sm:$0xff]  ;;  %v143_v59 = vrot.slane %v134_v57, 7  ;;  %v132_v60 = vld [vmem:[%s5697_s0 + $0x8] sm:$0xff]  ;;  %v133_v63 = vld [vmem:[%s5697_s0 + $0x10] sm:$0xff]  ;;  %v178_v18 = vrot.slane %v134_v57, 1 }
  0x5e   :  { %3461 = vmatprep.subr.mxu0 %v229_v23  ;;  %3793 = vmatprep.subr.mxu1 %v246_v25  ;;  %v141_v61 = vrot.slane %v132_v60, 7  ;;  %v142_v7 = vrot.slane %v133_v63, 7  ;;  %v176_v9 = vrot.slane %v132_v60, 1  ;;  %v177_v10 = vrot.slane %v133_v63, 1 }
  0x5f   :  { %3462 = vmatpush3.msra.mxu0 %v213_v24  ;;  %3794 = vmatpush3.msra.mxu1 %v246_v25  ;;  %v150_v62 = vsel %vm146_vm0, %v143_v59, %v140_v58 }
  0x60   :  { %3463 = vmatprep.subr.mxu0 %v228_v26  ;;  %3795 = vmatprep.subr.mxu1 %v245_v28  ;;  %v149_v8 = vsel %vm146_vm0, %v140_v58, %v141_v61  ;;  %v148_v15 = vsel %vm146_vm0, %v141_v61, %v142_v7  ;;  %v181_v16 = vsel %vm179_vm1, %v176_v9, %v177_v10 }
  0x61   :  { %3464 = vmatpush3.msra.mxu0 %v212_v27  ;;  %3796 = vmatpush3.msra.mxu1 %v245_v28  ;;  %v182_v17 = vsel %vm179_vm1, %v175_v11, %v176_v9  ;;  %v147_v22 = vsel %vm146_vm0, %v142_v7, %v143_v59  ;;  %v180_v25 = vsel %vm179_vm1, %v177_v10, %v178_v18 }
  0x62   :  { %3465 = vmatprep.subr.mxu0 %v227_v29  ;;  %3797 = vmatprep.subr.mxu1 %v244_v31  ;;  %v183_v26 = vsel %vm179_vm1, %v178_v18, %v175_v11  ;;  %v126_v18 = vld [vmem:[%s5709_s12] sm:$0x3] }
  0x63   :  { %3466 = vmatpush3.msra.mxu0 %v211_v30  ;;  %3798 = vmatpush3.msra.mxu1 %v244_v31 }
  0x64   :  { %3467 = vmatprep.subr.mxu0 %v226_v32  ;;  %3799 = vmatprep.subr.mxu1 %v243_v34  ;;  %v5712_v32 = vmov 0.0  }
  0x65   :  { %3468 = vmatpush3.msra.mxu0 %v210_v33  ;;  %3800 = vmatpush3.msra.mxu1 %v243_v34  ;;  %v4778_v33 = vld [vmem:[%s5705_s8 + $0x78] sm:$0xff]  ;;  %v4784_v34 = vld [vmem:[%s5705_s8 + $0x70] sm:$0xff] }
  0x66   :  { %3469 = vmatprep.subr.mxu0 %v225_v35  ;;  %3801 = vmatprep.subr.mxu1 %v242_v37  ;;  %v4791_v35 = vld [vmem:[%s5705_s8 + $0x68] sm:$0xff] }
  0x67   :  { %3470 = vmatpush3.msra.mxu0 %v209_v36  ;;  %3802 = vmatpush3.msra.mxu1 %v242_v37  ;;  %v4798_v36 = vld [vmem:[%s5705_s8 + $0x60] sm:$0xff]  ;;  %v4805_v37 = vld [vmem:[%s5705_s8 + $0x58] sm:$0xff] }
  0x68   :  { %3471 = vmatprep.subr.mxu0 %v224_v38  ;;  %3803 = vmatprep.subr.mxu1 %v241_v40  ;;  %v4812_v38 = vld [vmem:[%s5705_s8 + $0x50] sm:$0xff] }
  0x69   :  { %3472 = vmatpush3.msra.mxu0 %v208_v39  ;;  %320 = vmatprep.mubr.f32.mxu0 %v4681_v44  ;;  %v4819_v39 = vld [vmem:[%s5705_s8 + $0x48] sm:$0xff]  ;;  %v4854_v44 = vld [vmem:[%s5705_s8 + $0x20] sm:$0xff] }
  0x6a   :  { %3473 = vmatprep.subr.mxu0 %v223_v41  ;;  %3804 = vmatpush3.msra.mxu1 %v241_v40  ;;  %v4826_v40 = vld [vmem:[%s5705_s8 + $0x40] sm:$0xff]  ;;  %v4833_v41 = vld [vmem:[%s5705_s8 + $0x38] sm:$0xff] }
  0x6b   :  { %3474 = vmatpush3.msra.mxu0 %v207_v42  ;;  %3805 = vmatprep.subr.mxu1 %v240_v45  ;;  %v4840_v42 = vld [vmem:[%s5705_s8 + $0x30] sm:$0xff] }
  0x6c   :  { %3475 = vmatprep.subr.mxu0 %v222_v43  ;;  %3806 = vmatpush3.msra.mxu1 %v240_v45  ;;  %v4847_v43 = vld [vmem:[%s5705_s8 + $0x28] sm:$0xff]  ;;  %v4861_v45 = vld [vmem:[%s5705_s8 + $0x18] sm:$0xff] }
  0x6d   :  { %3476 = vmatpush3.msra.mxu0 %v206_v46  ;;  %3807 = vmatprep.subr.mxu1 %v239_v48  ;;  %v4868_v46 = vld [vmem:[%s5705_s8 + $0x10] sm:$0xff] }
  0x6e   :  { %3477 = vmatprep.subr.mxu0 %v221_v47  ;;  %3808 = vmatpush3.msra.mxu1 %v239_v48  ;;  %v4875_v47 = vld [vmem:[%s5705_s8 + $0x8] sm:$0xff] }
  0x6f   :  { %3478 = vmatpush3.msra.mxu0 %v205_v49  ;;  %3809 = vmatprep.subr.mxu1 %v238_v51 }
  0x70   :  { %3479 = vmatprep.subr.mxu0 %v220_v50  ;;  %3810 = vmatpush3.msra.mxu1 %v238_v51 }
  0x71   :  { %3480 = vmatpush3.msra.mxu0 %v204_v52  ;;  %3811 = vmatprep.subr.mxu1 %v237_v53 }
  0x72   :  { %3812 = vmatpush3.msra.mxu1 %v237_v53  ;;  %3878 = vmatprep.subr.mxu0 %v5712_v32 }
  0x73   :  { %3813 = vmatprep.subr.mxu1 %v236_v54 }
  0x74   :  { %3814 = vmatpush3.msra.mxu1 %v236_v54 }
  0x75   :  { %3821 = vmatprep.subr.mxu1 %v5712_v32 }
  0xc8   :  { %v4729_v0 = vpop.permute.xlu1 %163  ;;  %v4731_v3 = vpop.permute.xlu0 %153 }
  0xc9   :  { %5726 = vst [vmem:[#allocation20_spill] sm:$0xff] %v4729_v0  ;;  %5727 = vst [vmem:[#allocation21_spill] sm:$0xff] %v4731_v3  ;;  %v171_v4 = vmul.f32 %v4731_v3, %v150_v62  ;;  %v173_v19 = vmul.f32 %v4729_v0, %v148_v15 }
  0xcb   :  { %321 = vmatmul.mubr.f32.vlgmr.msra.gmra.mxu0 %v171_v4 }
  0xcc   :  { %v4737_v12 = vpop.permute.xlu1 %168  ;;  %v4739_v13 = vpop.permute.xlu0 %158  ;;  %325 = vmatprep.mubr.f32.mxu0 %v132_v60  ;;  %3879 = vmatpush3.msra.mxu0 %v4778_v33 }
  0xcd   :  { %5728 = vst [vmem:[#allocation22_spill] sm:$0xff] %v4737_v12  ;;  %5729 = vst [vmem:[#allocation23_spill] sm:$0xff] %v4739_v13  ;;  %v172_v14 = vmul.f32 %v4739_v13, %v149_v8  ;;  %v174_v27 = vmul.f32 %v4737_v12, %v147_v22  ;;  %3880 = vmatprep.subr.mxu0 %v5712_v32 }
  0xce   :  { %3881 = vmatpush3.msra.mxu0 %v4784_v34 }
  0xcf   :  { %326 = vmatmul.mubr.f32.gmra.mxu0 %v172_v14  ;;  %3882 = vmatprep.subr.mxu0 %v5712_v32 }
  0xd0   :  { %330 = vmatprep.mubr.f32.mxu0 %v133_v63  ;;  %3883 = vmatpush3.msra.mxu0 %v4791_v35  ;;  %v3376_v63 = vld [vmem:[#allocation10] ss:$0 sm:$0xff] }
  0xd1   :  { %v4750_v20 = vpop.permute.xlu1 %189  ;;  %v4752_v21 = vpop.permute.xlu0 %185  ;;  %3884 = vmatprep.subr.mxu0 %v5712_v32 }
  0xd2   :  { %5730 = vst [vmem:[#allocation24_spill] sm:$0xff] %v4750_v20  ;;  %5731 = vst [vmem:[#allocation25_spill] sm:$0xff] %v4752_v21  ;;  %v201_v23 = vmul.f32 %v4750_v20, %v181_v16  ;;  %v200_v24 = vmul.f32 %v4752_v21, %v182_v17  ;;  %3885 = vmatpush3.msra.mxu0 %v4798_v36 }
  0xd3   :  { %331 = vmatmul.mubr.f32.gmra.mxu0 %v173_v19  ;;  %3886 = vmatprep.subr.mxu0 %v5712_v32 }
  0xd4   :  { %3815 = vmatprep.mubr.f32.mxu1 %v200_v24  ;;  %335 = vmatprep.mubr.f32.mxu0 %v134_v57 }
  0xd5   :  { %v4763_v28 = vpop.permute.xlu1 %193  ;;  %3816 = vmatmul.mubr.f32.vlgmr.msra.gmra.mxu1 %v201_v23  ;;  %v4765_v29 = vpop.permute.xlu0 %197  ;;  %3887 = vmatpush3.msra.mxu0 %v4805_v37 }
  0xd6   :  { %5732 = vst [vmem:[#allocation26_spill] sm:$0xff] %v4763_v28  ;;  %5733 = vst [vmem:[#allocation27_spill] sm:$0xff] %v4765_v29  ;;  %v202_v30 = vmul.f32 %v4763_v28, %v180_v25  ;;  %v203_v31 = vmul.f32 %v4765_v29, %v183_v26  ;;  %3888 = vmatprep.subr.mxu0 %v5712_v32  ;;  %v576_v25 = vld [vmem:[%s5705_s8] sm:$0xff] }
  0xd7   :  { %336 = vmatmul.mubr.f32.gmra.mxu0 %v174_v27 }
  0xd8   :  { %3818 = vmatprep.mubr.f32.mxu1 %v202_v30  ;;  %3910 = vmatprep.mubr.msk.f32.mxu0 %vm4432_vm2, %v5712_v32 }
  0xd9   :  { %3819 = vmatmul.mubr.f32.gmra.mxu1 %v203_v31  ;;  %3889 = vmatpush3.msra.mxu0 %v4812_v38 }
  0xda   :  { %3829 = vmatprep.mubr.msk.f32.mxu1 %vm4432_vm2, %v5712_v32  ;;  %3890 = vmatprep.subr.mxu0 %v5712_v32 }
  0xdb   :  { %3891 = vmatpush3.msra.mxu0 %v4819_v39 }
  0xdc   :  { %3892 = vmatprep.subr.mxu0 %v5712_v32 }
  0xdd   :  { %3893 = vmatpush3.msra.mxu0 %v4826_v40 }
  0xde   :  { %3894 = vmatprep.subr.mxu0 %v5712_v32 }
  0xdf   :  { %3895 = vmatpush3.msra.mxu0 %v4833_v41 }
  0xe0   :  { %3896 = vmatprep.subr.mxu0 %v5712_v32 }
  0xe1   :  { %3897 = vmatpush3.msra.mxu0 %v4840_v42 }
  0xe2   :  { %3898 = vmatprep.subr.mxu0 %v5712_v32 }
  0xe3   :  { %3899 = vmatpush3.msra.mxu0 %v4847_v43 }
  0xe4   :  { %3900 = vmatprep.subr.mxu0 %v5712_v32 }
  0xe5   :  { %3901 = vmatpush3.msra.mxu0 %v4854_v44 }
  0xe6   :  { %3902 = vmatprep.subr.mxu0 %v5712_v32 }
  0xe7   :  { %3903 = vmatpush3.msra.mxu0 %v4861_v45 }
  0xe8   :  { %3904 = vmatprep.subr.mxu0 %v5712_v32 }
  0xe9   :  { %3905 = vmatpush3.msra.mxu0 %v4868_v46 }
  0xea   :  { %3906 = vmatprep.subr.mxu0 %v5712_v32 }
  0xeb   :  { %3907 = vmatpush3.msra.mxu0 %v4875_v47 }
  0xec   :  { %3908 = vmatprep.subr.mxu0 %v5712_v32 }
  0xed   :  { %3909 = vmatpush3.msra.mxu0 %v576_v25 }
 0x18b   :  { %v3481_v48 = vpop.f32.mrf.mxu0 }
 0x18d   :  { %v3482_v49 = vpop.f32.mrf.mxu0 }
 0x18e   :  { %v3483_v8 = vadd.f32 %v3482_v49, %v3481_v48  ;;  %v4968_v49 = vld [vmem:[#allocation2 + $0x10] sm:$0xff] }
 0x18f   :  { %v3484_v50 = vpop.f32.mrf.mxu0  ;;  %vm1180_vm9 = vcmp.gt.f32.partialorder %v4968_v49, 20.0 }
 0x190   :  { %v323_v16 = vadd.f32 %v3483_v8, %v3376_v63  ;;  %v1242_v8 = vld [vmem:[#allocation5 + $0xf8] sm:$0xff] }
 0x191   :  { %v3485_v51 = vpop.f32.mrf.mxu0 }
 0x192   :  { %v3486_v60 = vadd.f32 %v3485_v51, %v3484_v50  ;;  %v1140_v51 = vmin.f32 %v4968_v49, 20.0 }
 0x193   :  { %v3487_v52 = vpop.f32.mrf.mxu0 }
 0x194   :  { %v328_v9 = vadd.f32 %v3486_v60, %v3376_v63 }
 0x195   :  { %v3488_v53 = vpop.f32.mrf.mxu0  ;;  %v3817_v54 = vpop.f32.mrf.mxu1 }
 0x196   :  { %v3489_v61 = vadd.f32 %v3488_v53, %v3487_v52  ;;  %v4886_v15 = vadd.f32 %v3817_v54, %v328_v9  ;;  %v4971_v53 = vld [vmem:[#allocation2 + $0x18] sm:$0xff] }
 0x197   :  { %v3490_v55 = vpop.f32.mrf.mxu0  ;;  %v407_v57 = vpop.f32.mrf.mxu1  ;;  %v1141_v54 = vmin.f32 %v4971_v53, 20.0  ;;  %vm1181_vm10 = vcmp.gt.f32.partialorder %v4971_v53, 20.0 }
 0x198   :  { %v333_v11 = vadd.f32 %v3489_v61, %v3376_v63  ;;  %v4890_v17 = vadd.f32 %v407_v57, %v323_v16  ;;  %v503_v23 = vmul.f32 %v4886_v15, %v4886_v15  ;;  %v1241_v16 = vld [vmem:[#allocation5 + $0xf0] sm:$0xff] }
 0x199   :  { %v3491_v58 = vpop.f32.mrf.mxu0  ;;  %v3820_v59 = vpop.f32.mrf.mxu1 }
 0x19a   :  { %v3492_v62 = vadd.f32 %v3491_v58, %v3490_v55  ;;  %v502_v24 = vmul.f32 %v4890_v17, %v4890_v17  ;;  %v1148_v55 = vmul.f32 1.442695, %v1141_v54  ;;  %v3381_v58 = vld [vmem:[#allocation10 + $0x1] ss:$0 sm:$0xff]  ;;  %v1298_v54 = vld [vmem:[#allocation5 + $0x2b8] sm:$0xff] }
 0x19b   :  { %v417_v7 = vpop.f32.mrf.mxu1 }
 0x19c   :  { %v338_v4 = vadd.f32 %v3492_v62, %v3376_v63  ;;  %v4882_v14 = vadd.f32 %v417_v7, %v333_v11 }
 0x19e   :  { %v4880_v10 = vadd.f32 %v3820_v59, %v338_v4  ;;  %v504_v22 = vmul.f32 %v4882_v14, %v4882_v14  ;;  %v3382_v4 = vld [vmem:[#allocation10 + $0x2] ss:$0 sm:$0xff] }
 0x1a0   :  { %3822 = vmatpush3.msra.mxu1 %v4880_v10  ;;  %v505_v19 = vmul.f32 %v4880_v10, %v4880_v10 }
 0x1a1   :  { %3823 = vmatprep.subr.mxu1 %v5712_v32 }
 0x1a2   :  { %3824 = vmatpush3.msra.mxu1 %v4882_v14 }
 0x1a3   :  { %3825 = vmatprep.subr.mxu1 %v5712_v32 }
 0x1a4   :  { %3826 = vmatpush3.msra.mxu1 %v4886_v15 }
 0x1a5   :  { %3827 = vmatprep.subr.mxu1 %v5712_v32 }
 0x1a6   :  { %3828 = vmatpush3.msra.mxu1 %v4890_v17 }
 0x1a7   :  { %3830 = vmatmul.mubr.msk.f32.vlgmr.msra.gmra.mxu1 %vm428_vm3, %v126_v18  ;;  %3832 = vmatprep.subr.mxu1 %v5712_v32 }
 0x1a8   :  { %3833 = vmatpush3.msra.mxu1 %v505_v19  ;;  %3840 = vmatprep.mubr.msk.f32.mxu1 %vm4432_vm2, %v5712_v32 }
 0x1a9   :  { %3834 = vmatprep.subr.mxu1 %v5712_v32 }
 0x1aa   :  { %3835 = vmatpush3.msra.mxu1 %v504_v22 }
 0x1ab   :  { %3836 = vmatprep.subr.mxu1 %v5712_v32 }
 0x1ac   :  { %3837 = vmatpush3.msra.mxu1 %v503_v23  ;;  %v1239_v23 = vld [vmem:[#allocation5 + $0xe0] sm:$0xff] }
 0x1ad   :  { %3838 = vmatprep.subr.mxu1 %v5712_v32 }
 0x1ae   :  { %3839 = vmatpush3.msra.mxu1 %v502_v24 }
 0x1af   :  { %3841 = vmatmul.mubr.msk.f32.vlgmr.msra.gmra.mxu1 %vm428_vm3, %v126_v18  ;;  %3843 = vmatprep.subr.mxu1 %v5712_v32  ;;  %v1240_v18 = vld [vmem:[#allocation5 + $0xe8] sm:$0xff] }
 0x1b0   :  { %3844 = vmatpush3.msra.mxu1 %v4778_v33  ;;  %3875 = vmatprep.mubr.msk.f32.mxu1 %vm4432_vm2, %v5712_v32  ;;  %v737_v33 = vld [vmem:[#allocation11] sm:$0xff] }
 0x1b1   :  { %3845 = vmatprep.subr.mxu1 %v5712_v32 }
 0x1b2   :  { %3846 = vmatpush3.msra.mxu1 %v4784_v34 }
 0x1b3   :  { %3847 = vmatprep.subr.mxu1 %v5712_v32 }
 0x1b4   :  { %3848 = vmatpush3.msra.mxu1 %v4791_v35 }
 0x1b5   :  { %3849 = vmatprep.subr.mxu1 %v5712_v32 }
 0x1b6   :  { %3850 = vmatpush3.msra.mxu1 %v4798_v36 }
 0x1b7   :  { %3851 = vmatprep.subr.mxu1 %v5712_v32 }
 0x1b8   :  { %3852 = vmatpush3.msra.mxu1 %v4805_v37 }
 0x1b9   :  { %3853 = vmatprep.subr.mxu1 %v5712_v32 }
 0x1ba   :  { %3854 = vmatpush3.msra.mxu1 %v4812_v38 }
 0x1bb   :  { %3855 = vmatprep.subr.mxu1 %v5712_v32 }
 0x1bc   :  { %3856 = vmatpush3.msra.mxu1 %v4819_v39 }
 0x1bd   :  { %3857 = vmatprep.subr.mxu1 %v5712_v32 }
 0x1be   :  { %3858 = vmatpush3.msra.mxu1 %v4826_v40 }
 0x1bf   :  { %3859 = vmatprep.subr.mxu1 %v5712_v32 }
 0x1c0   :  { %3860 = vmatpush3.msra.mxu1 %v4833_v41 }
 0x1c1   :  { %3861 = vmatprep.subr.mxu1 %v5712_v32 }
 0x1c2   :  { %3862 = vmatpush3.msra.mxu1 %v4840_v42 }
 0x1c3   :  { %3863 = vmatprep.subr.mxu1 %v5712_v32 }
 0x1c4   :  { %3864 = vmatpush3.msra.mxu1 %v4847_v43 }
 0x1c5   :  { %3865 = vmatprep.subr.mxu1 %v5712_v32 }
 0x1c6   :  { %3866 = vmatpush3.msra.mxu1 %v4854_v44  ;;  %v4962_v44 = vld [vmem:[#allocation2 + $0x8] sm:$0xff] }
 0x1c7   :  { %3867 = vmatprep.subr.mxu1 %v5712_v32  ;;  %vm1179_vm7 = vcmp.gt.f32.partialorder %v4962_v44, 20.0 }
 0x1c8   :  { %3868 = vmatpush3.msra.mxu1 %v4861_v45 }
 0x1c9   :  { %3869 = vmatprep.subr.mxu1 %v5712_v32 }
 0x1ca   :  { %3870 = vmatpush3.msra.mxu1 %v4868_v46  ;;  %v4964_v46 = vld [vmem:[#allocation2] sm:$0xff] }
 0x1cb   :  { %3871 = vmatprep.subr.mxu1 %v5712_v32  ;;  %v1138_v48 = vmin.f32 %v4964_v46, 20.0  ;;  %vm1178_vm8 = vcmp.gt.f32.partialorder %v4964_v46, 20.0 }
 0x1cc   :  { %3872 = vmatpush3.msra.mxu1 %v4875_v47  ;;  %v1139_v47 = vmin.f32 %v4962_v44, 20.0 }
 0x1cd   :  { %3873 = vmatprep.subr.mxu1 %v5712_v32  ;;  %v1142_v52 = vmul.f32 1.442695, %v1138_v48 }
 0x1ce   :  { %3874 = vmatpush3.msra.mxu1 %v576_v25  ;;  %v1144_v50 = vmul.f32 1.442695, %v1139_v47 }
 0x1cf   :  { %3913 = vmatprep.subr.mxu1 %v5712_v32 }
 0x267   :  { %v498_v26 = vpop.f32.mrf.mxu1 }
 0x268   :  { %3876 = vmatmul.mubr.f32.vlgmr.msra.gmra.mxu1 %v498_v26 }
 0x269   :  { %v3831_v27 = vpop.f32.mrf.mxu1  ;;  %3915 = vmatprep.mubr.msk.f32.mxu1 %vm4432_vm2, %v5712_v32  ;;  %3914 = vmatpush3.msra.mxu1 %v737_v33 }
 0x26a   :  { %3918 = vmatprep.subr.mxu1 %v5712_v32  ;;  %v1238_v27 = vld [vmem:[#allocation5 + $0xd8] sm:$0xff] }
 0x26f   :  { %v572_v30 = vpop.f32.mrf.mxu1 }
 0x270   :  { %3911 = vmatmul.mubr.f32.vlgmr.msra.gmra.mxu0 %v572_v30  ;;  %v1306_v30 = vld [vmem:[#allocation5 + $0x2f8] sm:$0xff] }
 0x271   :  { %v3842_v31 = vpop.f32.mrf.mxu1  ;;  %3925 = vmatprep.mubr.msk.f32.mxu0 %vm896_vm5, %v4544_v2 }
 0x272   :  { %v1237_v31 = vld [vmem:[#allocation5 + $0xd0] sm:$0xff] }
 0x328   :  { %v658_v34 = vpop.f32.mrf.mxu1 }
 0x329   :  { %3916 = vmatmul.mubr.msk.f32.vlgmr.msra.gmra.mxu1 %vm738_vm4, %v658_v34  ;;  %v732_v36 = vmul.f32 %v658_v34, %v658_v34 }
 0x32a   :  { %v3877_v35 = vpop.f32.mrf.mxu1  ;;  %3919 = vmatpush3.msra.mxu1 %v737_v33  ;;  %3920 = vmatprep.mubr.msk.f32.mxu1 %vm4432_vm2, %v5712_v32  ;;  %v1305_v33 = vld [vmem:[#allocation5 + $0x2f0] sm:$0xff] }
 0x32b   :  { %v1236_v35 = vld [vmem:[#allocation5 + $0xc8] sm:$0xff] }
 0x330   :  { %v728_v37 = vpop.f32.mrf.mxu0 }
 0x331   :  { %v733_v38 = vsub.f32 %v728_v37, %v732_v36  ;;  %v1304_v36 = vld [vmem:[#allocation5 + $0x2e8] sm:$0xff] }
 0x332   :  { %v3912_v39 = vpop.f32.mrf.mxu0 }
 0x333   :  { %v734_v40 = vmax.f32 %v733_v38, 0.0 }
 0x335   :  { %v735_v41 = vadd.f32 1e-05, %v734_v40  ;;  %v1235_v40 = vld [vmem:[#allocation5 + $0xc0] sm:$0xff] }
 0x337   :  { %4152 = vrsqrt.f32 %v735_v41  ;;  %v1303_v41 = vld [vmem:[#allocation5 + $0x2e0] sm:$0xff] }
 0x338   :  { %4154 = vpow2.f32 %v1144_v50  ;;  %v1232_v50 = vld [vmem:[#allocation5 + $0xa8] sm:$0xff] }
 0x339   :  { %4156 = vpow2.f32 %v1142_v52  ;;  %v1231_v52 = vld [vmem:[#allocation5 + $0xa0] sm:$0xff] }
 0x344   :  { %v4153_v42 = vpop.eup %4152 }
 0x345   :  { %3921 = vmatmul.mubr.msk.f32.vlgmr.msra.gmra.mxu1 %vm738_vm4, %v4153_v42  ;;  %v4155_v57 = vpop.eup %4154  ;;  %v1234_v42 = vld [vmem:[#allocation5 + $0xb8] sm:$0xff] }
 0x346   :  { %3933 = vmatprep.mubr.msk.f32.mxu1 %vm896_vm5, %v4544_v2  ;;  %v1146_v2 = vmul.f32 1.442695, %v1140_v51  ;;  %v4157_v59 = vpop.eup %4156  ;;  %v1151_v61 = vadd.f32 1.0, %v4155_v57  ;;  %v1300_v51 = vld [vmem:[#allocation5 + $0x2c8] sm:$0xff]  ;;  %v1297_v57 = vld [vmem:[#allocation5 + $0x2b0] sm:$0xff] }
 0x347   :  { %v1150_v63 = vadd.f32 1.0, %v4157_v59  ;;  %v1228_v59 = vld [vmem:[#allocation5 + $0x88] sm:$0xff] }
 0x348   :  { %4158 = vpow2.f32 %v1146_v2  ;;  %v4976_v19 = vmul.f32 %v1151_v61, %v1151_v61  ;;  %v1299_v2 = vld [vmem:[#allocation5 + $0x2c0] sm:$0xff] }
 0x349   :  { %4160 = vpow2.f32 %v1148_v55  ;;  %v4980_v25 = vmul.f32 %v1150_v63, %v1150_v63  ;;  %v1229_v55 = vld [vmem:[#allocation5 + $0x90] sm:$0xff]  ;;  %v1295_v61 = vld [vmem:[#allocation5 + $0x2a0] sm:$0xff]  ;;  %v1294_v63 = vld [vmem:[#allocation5 + $0x298] sm:$0xff] }
 0x34a   :  { %v1167_v34 = vadd.f32 1.0, %v4976_v19 }
 0x34b   :  { %v1166_v39 = vadd.f32 1.0, %v4980_v25 }
 0x34c   :  { %4162 = vrcp.f32 %v1167_v34  ;;  %v1288_v34 = vld [vmem:[#allocation5 + $0x268] sm:$0xff] }
 0x34d   :  { %4164 = vrcp.f32 %v1166_v39  ;;  %v1218_v39 = vld [vmem:[#allocation5 + $0x38] sm:$0xff] }
 0x355   :  { %v4159_v9 = vpop.eup %4158 }
 0x356   :  { %v1152_v24 = vadd.f32 1.0, %v4159_v9  ;;  %v4161_v26 = vpop.eup %4160  ;;  %v3397_v9 = vadd.f32 -1.0, %v4980_v25 }
 0x357   :  { %v1153_v38 = vadd.f32 1.0, %v4161_v26  ;;  %v1221_v26 = vld [vmem:[#allocation5 + $0x50] sm:$0xff] }
 0x358   :  { %v4991_v37 = vmul.f32 %v1152_v24, %v1152_v24  ;;  %v1290_v24 = vld [vmem:[#allocation5 + $0x278] sm:$0xff] }
 0x359   :  { %v4997_v48 = vmul.f32 %v1153_v38, %v1153_v38  ;;  %v1287_v38 = vld [vmem:[#allocation5 + $0x260] sm:$0xff] }
 0x35a   :  { %v1168_v47 = vadd.f32 1.0, %v4991_v37  ;;  %v3399_v25 = vadd.f32 -1.0, %v4991_v37  ;;  %v1217_v37 = vld [vmem:[#allocation5 + $0x30] sm:$0xff] }
 0x35c   :  { %4166 = vrcp.f32 %v1168_v47  ;;  %v1216_v47 = vld [vmem:[#allocation5 + $0x28] sm:$0xff] }
 0x3e9   :  { %v808_v43 = vpop.f32.mrf.mxu1 }
 0x3eb   :  { %v3917_v45 = vpop.f32.mrf.mxu1 }
 0x3ec   :  { %v1301_v45 = vld [vmem:[#allocation5 + $0x2d0] sm:$0xff] }
 0x405   :  { %v881_v60 = vpop.f32.mrf.mxu1 }
 0x406   :  { %v889_v62 = vmul.f32 %v3381_v58, %v881_v60  ;;  %v1169_v58 = vadd.f32 1.0, %v4997_v48  ;;  %v1296_v60 = vld [vmem:[#allocation5 + $0x2a8] sm:$0xff] }
 0x407   :  { %v3922_v7 = vpop.f32.mrf.mxu1 }
 0x408   :  { %v890_v11 = vmul.f32 %v889_v62, %v808_v43  ;;  %3923 = vmatprep.subr.msk.mxu0 %vm905_vm6, %v889_v62  ;;  %v1302_v43 = vld [vmem:[#allocation5 + $0x2d8] sm:$0xff]  ;;  %v1293_v7 = vld [vmem:[#allocation5 + $0x290] sm:$0xff]  ;;  %4168 = vrcp.f32 %v1169_v58 }
 0x409   :  { %3924 = vmatpush3.msk.msra.mxu0 %vm905_vm6, %v889_v62  ;;  %v1226_v62 = vld [vmem:[#allocation5 + $0x78] sm:$0xff] }
 0x40a   :  { %v895_v22 = vsub.f32 %v3382_v4, %v890_v11  ;;  %3926 = vmatmul.mubr.msk.f32.vlgmr.msra.gmra.mxu0 %vm896_vm5, %v4562_v6  ;;  %1318 = vmatprep.subr.mxu0 %v1242_v8  ;;  %v1225_v4 = vld [vmem:[#allocation5 + $0x70] sm:$0xff]  ;;  %v3398_v8 = vadd.f32 -1.0, %v4976_v19  ;;  %v1224_v11 = vld [vmem:[#allocation5 + $0x68] sm:$0xff]  ;;  %v4163_v19 = vpop.eup %4162 }
 0x40b   :  { %1319 = vmatpush1.msra.mxu0 %v1241_v16  ;;  %3928 = vmatprep.mubr.msk.f32.mxu0 %vm896_vm5, %v4539_v1  ;;  %v1292_v16 = vld [vmem:[#allocation5 + $0x288] sm:$0xff] }
 0x40c   :  { %3931 = vmatprep.subr.msk.mxu1 %vm905_vm6, %v895_v22  ;;  %1320 = vmatprep.subr.mxu0 %v1240_v18  ;;  %v1223_v18 = vld [vmem:[#allocation5 + $0x60] sm:$0xff] }
 0x40d   :  { %3932 = vmatpush3.msk.msra.mxu1 %vm905_vm6, %v895_v22  ;;  %1321 = vmatpush1.msra.mxu0 %v1239_v23  ;;  %v1291_v22 = vld [vmem:[#allocation5 + $0x280] sm:$0xff]  ;;  %v1222_v23 = vld [vmem:[#allocation5 + $0x58] sm:$0xff] }
 0x40e   :  { %3929 = vmatmul.mubr.msk.f32.gmra.mxu0 %vm896_vm5, %v4557_v5  ;;  %3934 = vmatmul.mubr.msk.f32.vlgmr.msra.gmra.mxu1 %vm896_vm5, %v4562_v6  ;;  %v1233_v6 = vld [vmem:[#allocation5 + $0xb0] sm:$0xff] }
 0x40f   :  { %1322 = vmatprep.subr.mxu0 %v1238_v27  ;;  %1407 = vmatprep.subr.mxu1 %v1306_v30  ;;  %v1289_v27 = vld [vmem:[#allocation5 + $0x270] sm:$0xff]  ;;  %v1163_v30 = vmul.f32 %v3398_v8, %v4962_v44  ;;  %v1274_v8 = vld [vmem:[#allocation5 + $0x1f8] sm:$0xff] }
 0x410   :  { %1323 = vmatpush1.msra.mxu0 %v1237_v31  ;;  %1408 = vmatpush1.msra.mxu1 %v1305_v33  ;;  %v1162_v31 = vmul.f32 %v3397_v9, %v4964_v46  ;;  %v1220_v33 = vld [vmem:[#allocation5 + $0x48] sm:$0xff]  ;;  %v1273_v9 = vld [vmem:[#allocation5 + $0x1f0] sm:$0xff] }
 0x411   :  { %1324 = vmatprep.subr.mxu0 %v1236_v35  ;;  %1409 = vmatprep.subr.mxu1 %v1304_v36  ;;  %v4165_v35 = vpop.eup %4164  ;;  %v1219_v36 = vld [vmem:[#allocation5 + $0x40] sm:$0xff] }
 0x412   :  { %3936 = vmatprep.mubr.msk.f32.mxu1 %vm896_vm5, %v4539_v1  ;;  %1325 = vmatpush1.msra.mxu0 %v1235_v40  ;;  %v1230_v1 = vld [vmem:[#allocation5 + $0x98] sm:$0xff] }
 0x413   :  { %1410 = vmatpush1.msra.mxu1 %v1303_v41  ;;  %1326 = vmatprep.subr.mxu0 %v1234_v42  ;;  %v1286_v40 = vld [vmem:[#allocation5 + $0x258] sm:$0xff]  ;;  %v3400_v41 = vadd.f32 -1.0, %v4997_v48  ;;  %v1285_v42 = vld [vmem:[#allocation5 + $0x250] sm:$0xff]  ;;  %v1215_v48 = vld [vmem:[#allocation5 + $0x20] sm:$0xff] }
 0x414   :  { %3937 = vmatmul.mubr.msk.f32.gmra.mxu1 %vm896_vm5, %v4557_v5  ;;  %1411 = vmatprep.subr.mxu1 %v1302_v43  ;;  %v1227_v5 = vld [vmem:[#allocation5 + $0x80] sm:$0xff]  ;;  %v1164_v43 = vmul.f32 %v3399_v25, %v4968_v49  ;;  %v1269_v25 = vld [vmem:[#allocation5 + $0x1d0] sm:$0xff] }
 0x415   :  { %1327 = vmatpush1.msra.mxu0 %v1233_v6  ;;  %1412 = vmatpush1.msra.mxu1 %v1301_v45  ;;  %v1175_v6 = vmul.f32 %v4163_v19, %v1163_v30  ;;  %v1174_v45 = vmul.f32 %v4165_v35, %v1162_v31  ;;  %v1275_v19 = vld [vmem:[#allocation5 + $0x200] sm:$0xff] }
 0x416   :  { %1328 = vmatprep.subr.mxu0 %v1232_v50  ;;  %1413 = vmatprep.subr.mxu1 %v1300_v51  ;;  %v1284_v50 = vld [vmem:[#allocation5 + $0x248] sm:$0xff]  ;;  %v4167_v51 = vpop.eup %4166 }
 0x417   :  { %1329 = vmatpush1.msra.mxu0 %v1231_v52  ;;  %1414 = vmatpush1.msra.mxu1 %v1299_v2  ;;  %v1283_v52 = vld [vmem:[#allocation5 + $0x240] sm:$0xff]  ;;  %v1214_v2 = vld [vmem:[#allocation5 + $0x18] sm:$0xff]  ;;  %v1176_v58 = vmul.f32 %v4167_v51, %v1164_v43  ;;  %v1261_v43 = vld [vmem:[#allocation5 + $0x190] sm:$0xff] }
 0x418   :  { %1330 = vmatprep.subr.mxu0 %v1230_v1  ;;  %1415 = vmatprep.subr.mxu1 %v1298_v54  ;;  %v1282_v1 = vld [vmem:[#allocation5 + $0x238] sm:$0xff]  ;;  %v1165_v54 = vmul.f32 %v3400_v41, %v4971_v53 }
 0x419   :  { %1331 = vmatpush1.msra.mxu0 %v1229_v55  ;;  %1416 = vmatpush1.msra.mxu1 %v1297_v57  ;;  %v1213_v55 = vld [vmem:[#allocation5 + $0x10] sm:$0xff]  ;;  %v1258_v51 = vld [vmem:[#allocation5 + $0x178] sm:$0xff] }
 0x41a   :  { %1332 = vmatprep.subr.mxu0 %v1228_v59  ;;  %1417 = vmatprep.subr.mxu1 %v1296_v60  ;;  %v1281_v57 = vld [vmem:[#allocation5 + $0x230] sm:$0xff]  ;;  %v5015_v59 = vsel %vm1179_vm7, %v4962_v44, %v1175_v6  ;;  %v5020_v60 = vsel %vm1178_vm8, %v4964_v46, %v1174_v45  ;;  %v1211_v44 = vld [vmem:[#allocation5] sm:$0xff]  ;;  %v1278_v46 = vld [vmem:[#allocation5 + $0x218] sm:$0xff] }
 0x41b   :  { %1333 = vmatpush1.msra.mxu0 %v1227_v5  ;;  %1418 = vmatpush1.msra.mxu1 %v1295_v61  ;;  %v1212_v5 = vld [vmem:[#allocation5 + $0x8] sm:$0xff] }
 0x41c   :  { %1334 = vmatprep.subr.mxu0 %v1226_v62  ;;  %1419 = vmatprep.subr.mxu1 %v1294_v63  ;;  %v1280_v61 = vld [vmem:[#allocation5 + $0x228] sm:$0xff]  ;;  %v4169_v62 = vpop.eup %4168  ;;  %v1200_v63 = vrot.slane %v5015_v59, 1 }
 0x41d   :  { %1335 = vmatpush1.msra.mxu0 %v1225_v4  ;;  %1420 = vmatpush1.msra.mxu1 %v1293_v7  ;;  %v1199_v4 = vrot.slane %v5020_v60, 1  ;;  %v1279_v7 = vld [vmem:[#allocation5 + $0x220] sm:$0xff]  ;;  %v1260_v45 = vld [vmem:[#allocation5 + $0x188] sm:$0xff] }
 0x41e   :  { %1336 = vmatprep.subr.mxu0 %v1224_v11  ;;  %1421 = vmatprep.subr.mxu1 %v1292_v16  ;;  %v1277_v11 = vld [vmem:[#allocation5 + $0x210] sm:$0xff]  ;;  %v5026_v16 = vsel %vm1180_vm9, %v4968_v49, %v1176_v58  ;;  %v1270_v49 = vld [vmem:[#allocation5 + $0x1d8] sm:$0xff]  ;;  %v1251_v58 = vld [vmem:[#allocation5 + $0x140] sm:$0xff] }
 0x41f   :  { %1337 = vmatpush1.msra.mxu0 %v1223_v18  ;;  %1422 = vmatpush1.msra.mxu1 %v1291_v22  ;;  %v1177_v18 = vmul.f32 %v4169_v62, %v1165_v54  ;;  %v1272_v22 = vld [vmem:[#allocation5 + $0x1e8] sm:$0xff]  ;;  %v1254_v54 = vld [vmem:[#allocation5 + $0x158] sm:$0xff]  ;;  %v1187_v62 = vrot.slane %v5020_v60, 7 }
 0x420   :  { %1338 = vmatprep.subr.mxu0 %v1222_v23  ;;  %1423 = vmatprep.subr.mxu1 %v1290_v24  ;;  %v1276_v23 = vld [vmem:[#allocation5 + $0x208] sm:$0xff]  ;;  %v1201_v24 = vrot.slane %v5026_v16, 1 }
 0x421   :  { %1339 = vmatpush1.msra.mxu0 %v1221_v26  ;;  %1424 = vmatpush1.msra.mxu1 %v1289_v27  ;;  %v1205_v26 = vsel %vm179_vm1, %v1199_v4, %v1200_v63  ;;  %v1271_v27 = vld [vmem:[#allocation5 + $0x1e0] sm:$0xff]  ;;  %v5035_v30 = vsel %vm1181_vm10, %v4971_v53, %v1177_v18  ;;  %v1265_v53 = vld [vmem:[#allocation5 + $0x1b0] sm:$0xff] }
 0x422   :  { %1340 = vmatprep.subr.mxu0 %v1220_v33  ;;  %1425 = vmatprep.subr.mxu1 %v1288_v34  ;;  %v1207_v31 = vmul.f32 %v1205_v26, %v4752_v21  ;;  %v1268_v33 = vld [vmem:[#allocation5 + $0x1c8] sm:$0xff]  ;;  %v1204_v34 = vsel %vm179_vm1, %v1200_v63, %v1201_v24  ;;  %v1202_v35 = vrot.slane %v5035_v30, 1  ;;  %v1190_v63 = vrot.slane %v5035_v30, 7  ;;  %v1243_v18 = vld [vmem:[#allocation5 + $0x100] sm:$0xff] }
 0x423   :  { %1341 = vmatpush1.msra.mxu0 %v1219_v36  ;;  %1426 = vmatpush1.msra.mxu1 %v1287_v38  ;;  %v1267_v36 = vld [vmem:[#allocation5 + $0x1c0] sm:$0xff]  ;;  %v1266_v38 = vld [vmem:[#allocation5 + $0x1b8] sm:$0xff] }
 0x424   :  { %1342 = vmatprep.subr.mxu0 %v1218_v39  ;;  %1427 = vmatprep.subr.mxu1 %v1286_v40  ;;  %v1208_v39 = vmul.f32 %v1204_v34, %v4750_v20  ;;  %v1264_v40 = vld [vmem:[#allocation5 + $0x1a8] sm:$0xff]  ;;  %v1203_v41 = vsel %vm179_vm1, %v1201_v24, %v1202_v35  ;;  %v5113_v34 = vld [vmem:[%s5707_s10 + $0xe0] sm:$0xff] }
 0x425   :  { %1343 = vmatpush1.msra.mxu0 %v1217_v37  ;;  %1428 = vmatpush1.msra.mxu1 %v1285_v42  ;;  %v1263_v37 = vld [vmem:[#allocation5 + $0x1a0] sm:$0xff]  ;;  %v1262_v42 = vld [vmem:[#allocation5 + $0x198] sm:$0xff]  ;;  %v1209_v6 = vmul.f32 %v1203_v41, %v4763_v28  ;;  %v5155_v41 = vld [vmem:[%s5707_s10 + $0x48] sm:$0xff] }
 0x426   :  { %1344 = vmatprep.subr.mxu0 %v1216_v47  ;;  %1429 = vmatprep.subr.mxu1 %v1284_v50  ;;  %v1206_v47 = vsel %vm179_vm1, %v1202_v35, %v1199_v4  ;;  %v1259_v50 = vld [vmem:[#allocation5 + $0x180] sm:$0xff]  ;;  %v1248_v4 = vld [vmem:[#allocation5 + $0x128] sm:$0xff] }
 0x427   :  { %1345 = vmatpush1.msra.mxu0 %v1215_v48  ;;  %1430 = vmatpush1.msra.mxu1 %v1283_v52  ;;  %v1257_v48 = vld [vmem:[#allocation5 + $0x170] sm:$0xff]  ;;  %v1210_v52 = vmul.f32 %v1206_v47, %v4765_v29  ;;  %v5119_v35 = vld [vmem:[%s5707_s10 + $0x60] sm:$0xff] }
 0x428   :  { %1346 = vmatprep.subr.mxu0 %v1214_v2  ;;  %1431 = vmatprep.subr.mxu1 %v1282_v1  ;;  %v1256_v2 = vld [vmem:[#allocation5 + $0x168] sm:$0xff]  ;;  %v1255_v1 = vld [vmem:[#allocation5 + $0x160] sm:$0xff]  ;;  %v5191_v47 = vld [vmem:[%s5707_s10 + $0x30] sm:$0xff] }
 0x429   :  { %1347 = vmatpush1.msra.mxu0 %v1213_v55  ;;  %1432 = vmatpush1.msra.mxu1 %v1281_v57  ;;  %v1253_v55 = vld [vmem:[#allocation5 + $0x150] sm:$0xff]  ;;  %v1252_v57 = vld [vmem:[#allocation5 + $0x148] sm:$0xff] }
 0x42a   :  { %1348 = vmatprep.subr.mxu0 %v1212_v5  ;;  %1433 = vmatprep.subr.mxu1 %v1280_v61  ;;  %v1250_v5 = vld [vmem:[#allocation5 + $0x138] sm:$0xff]  ;;  %v1249_v61 = vld [vmem:[#allocation5 + $0x130] sm:$0xff] }
 0x42b   :  { %1349 = vmatpush1.msra.mxu0 %v1211_v44  ;;  %1434 = vmatpush1.msra.mxu1 %v1279_v7  ;;  %v1247_v44 = vld [vmem:[#allocation5 + $0x120] sm:$0xff]  ;;  %v1246_v7 = vld [vmem:[#allocation5 + $0x118] sm:$0xff] }
 0x42c   :  { %1350 = vmatprep.subr.mxu0 %v1274_v8  ;;  %1435 = vmatprep.subr.mxu1 %v1278_v46  ;;  %v1245_v8 = vld [vmem:[#allocation5 + $0x110] sm:$0xff]  ;;  %v1188_v46 = vrot.slane %v5015_v59, 7 }
 0x42d   :  { %1351 = vmatpush2.msra.mxu0 %v1273_v9  ;;  %1436 = vmatpush1.msra.mxu1 %v1277_v11  ;;  %v1194_v9 = vsel %vm146_vm0, %v1190_v63, %v1187_v62  ;;  %v1244_v11 = vld [vmem:[#allocation5 + $0x108] sm:$0xff] }
 0x42e   :  { %1352 = vmatprep.subr.mxu0 %v1272_v22  ;;  %1437 = vmatprep.subr.mxu1 %v1276_v23  ;;  %v1189_v22 = vrot.slane %v5026_v16, 7  ;;  %v1193_v23 = vsel %vm146_vm0, %v1187_v62, %v1188_v46 }
 0x42f   :  { %1353 = vmatpush2.msra.mxu0 %v1271_v27  ;;  %1438 = vmatpush1.msra.mxu1 %v1275_v19  ;;  %v1196_v24 = vmul.f32 %v1193_v23, %v4739_v13 }
 0x430   :  { %1471 = vmatprep.mubr.f32.mxu1 %v5712_v32  ;;  %1354 = vmatprep.subr.mxu0 %v1270_v49  ;;  %v1192_v26 = vsel %vm146_vm0, %v1188_v46, %v1189_v22  ;;  %v1191_v19 = vsel %vm146_vm0, %v1189_v22, %v1190_v63 }
 0x431   :  { %1472 = vmatmul.mubr.f32.vlgmr.msra.gmra.mxu1 %v1207_v31  ;;  %1355 = vmatpush2.msra.mxu0 %v1269_v25  ;;  %v1197_v27 = vmul.f32 %v1192_v26, %v4729_v0  ;;  %v1198_v49 = vmul.f32 %v1191_v19, %v4737_v12  ;;  %v5089_v25 = vld [vmem:[%s5707_s10 + $0xf0] sm:$0xff]  ;;  %v5101_v31 = vld [vmem:[%s5707_s10 + $0xe8] sm:$0xff] }
 0x432   :  { %1356 = vmatprep.subr.mxu0 %v1268_v33  ;;  %1477 = vmatprep.mubr.f32.mxu1 %v5712_v32  ;;  %v5107_v33 = vld [vmem:[%s5707_s10 + $0x68] sm:$0xff] }
 0x433   :  { %1357 = vmatpush2.msra.mxu0 %v1267_v36  ;;  %1382 = vmatprep.mubr.f32.mxu0 %v5020_v60  ;;  %v1195_v60 = vmul.f32 %v1194_v9, %v4731_v3  ;;  %v5125_v36 = vld [vmem:[%s5707_s10 + $0xd8] sm:$0xff] }
 0x434   :  { %1358 = vmatprep.subr.mxu0 %v1266_v38  ;;  %v5131_v38 = vld [vmem:[%s5707_s10 + $0x58] sm:$0xff] }
 0x435   :  { %1478 = vmatmul.mubr.f32.gmra.mxu1 %v1208_v39  ;;  %1359 = vmatpush2.msra.mxu0 %v1265_v53  ;;  %v5137_v53 = vld [vmem:[%s5707_s10 + $0xd0] sm:$0xff] }
 0x436   :  { %1360 = vmatprep.subr.mxu0 %v1264_v40  ;;  %1483 = vmatprep.mubr.f32.mxu1 %v5712_v32  ;;  %v5143_v39 = vld [vmem:[%s5707_s10 + $0x50] sm:$0xff]  ;;  %v5149_v40 = vld [vmem:[%s5707_s10 + $0xc8] sm:$0xff] }
 0x437   :  { %1361 = vmatpush2.msra.mxu0 %v1263_v37  ;;  %v5161_v37 = vld [vmem:[%s5707_s10 + $0xc0] sm:$0xff] }
 0x438   :  { %1362 = vmatprep.subr.mxu0 %v1262_v42  ;;  %v5167_v42 = vld [vmem:[%s5707_s10 + $0x40] sm:$0xff] }
 0x439   :  { %1484 = vmatmul.mubr.f32.gmra.mxu1 %v1209_v6  ;;  %1363 = vmatpush2.msra.mxu0 %v1261_v43  ;;  %v5173_v43 = vld [vmem:[%s5707_s10 + $0xb8] sm:$0xff] }
 0x43a   :  { %1364 = vmatprep.subr.mxu0 %v1260_v45  ;;  %1489 = vmatprep.mubr.f32.mxu1 %v5712_v32  ;;  %v5179_v6 = vld [vmem:[%s5707_s10 + $0x38] sm:$0xff]  ;;  %v5185_v45 = vld [vmem:[%s5707_s10 + $0xb0] sm:$0xff] }
 0x43b   :  { %1365 = vmatpush2.msra.mxu0 %v1259_v50  ;;  %v5197_v50 = vld [vmem:[%s5707_s10 + $0xa8] sm:$0xff] }
 0x43c   :  { %1366 = vmatprep.subr.mxu0 %v1258_v51  ;;  %v5203_v51 = vld [vmem:[%s5707_s10 + $0x28] sm:$0xff] }
 0x43d   :  { %1490 = vmatmul.mubr.f32.gmra.mxu1 %v1210_v52  ;;  %1367 = vmatpush2.msra.mxu0 %v1257_v48  ;;  %v5209_v48 = vld [vmem:[%s5707_s10 + $0xa0] sm:$0xff] }
 0x43e   :  { %1368 = vmatprep.subr.mxu0 %v1256_v2  ;;  %1564 = vmatprep.mubr.f32.mxu1 %v5712_v32  ;;  %v5215_v52 = vld [vmem:[%s5707_s10 + $0x20] sm:$0xff]  ;;  %v5221_v2 = vld [vmem:[%s5707_s10 + $0x98] sm:$0xff] }
 0x43f   :  { %1369 = vmatpush2.msra.mxu0 %v1255_v1  ;;  %v5227_v1 = vld [vmem:[%s5707_s10 + $0x18] sm:$0xff] }
 0x440   :  { %1370 = vmatprep.subr.mxu0 %v1254_v54  ;;  %v5233_v54 = vld [vmem:[%s5707_s10 + $0x90] sm:$0xff] }
 0x441   :  { %1371 = vmatpush2.msra.mxu0 %v1253_v55 }
 0x442   :  { %1372 = vmatprep.subr.mxu0 %v1252_v57  ;;  %v5239_v57 = vld [vmem:[%s5707_s10 + $0x10] sm:$0xff] }
 0x443   :  { %1373 = vmatpush2.msra.mxu0 %v1251_v58 }
 0x444   :  { %1374 = vmatprep.subr.mxu0 %v1250_v5 }
 0x445   :  { %1375 = vmatpush2.msra.mxu0 %v1249_v61 }
 0x446   :  { %1376 = vmatprep.subr.mxu0 %v1248_v4 }
 0x447   :  { %1377 = vmatpush2.msra.mxu0 %v1247_v44 }
 0x448   :  { %1378 = vmatprep.subr.mxu0 %v1246_v7 }
 0x449   :  { %1379 = vmatpush2.msra.mxu0 %v1245_v8 }
 0x44a   :  { %1380 = vmatprep.subr.mxu0 %v1244_v11 }
 0x44b   :  { %1381 = vmatpush2.msra.mxu0 %v1243_v18 }
 0x44c   :  { %1383 = vmatmul.mubr.f32.vlgmr.msra.gmra.mxu0 %v1195_v60 }
 0x44d   :  { %1388 = vmatprep.mubr.f32.mxu0 %v5015_v59  ;;  %v5078_v59 = vld [vmem:[%s5707_s10 + $0xf8] sm:$0xff] }
 0x44e   :  { %3606 = vmatprep.subr.mxu0 %v5078_v59 }
 0x450   :  { %1389 = vmatmul.mubr.f32.gmra.mxu0 %v1196_v24 }
 0x451   :  { %1394 = vmatprep.mubr.f32.mxu0 %v5026_v16  ;;  %v5083_v16 = vld [vmem:[%s5707_s10 + $0x78] sm:$0xff] }
 0x452   :  { %3607 = vmatpush3.msra.mxu0 %v5083_v16 }
 0x453   :  { %3608 = vmatprep.subr.mxu0 %v5089_v25 }
 0x454   :  { %1395 = vmatmul.mubr.f32.gmra.mxu0 %v1197_v27 }
 0x455   :  { %1400 = vmatprep.mubr.f32.mxu0 %v5035_v30  ;;  %v5095_v30 = vld [vmem:[%s5707_s10 + $0x70] sm:$0xff] }
 0x456   :  { %3609 = vmatpush3.msra.mxu0 %v5095_v30 }
 0x457   :  { %3610 = vmatprep.subr.mxu0 %v5101_v31 }
 0x458   :  { %1401 = vmatmul.mubr.f32.gmra.mxu0 %v1198_v49 }
 0x459   :  { %3611 = vmatpush3.msra.mxu0 %v5107_v33 }
 0x45a   :  { %3612 = vmatprep.subr.mxu0 %v5113_v34 }
 0x45b   :  { %3613 = vmatpush3.msra.mxu0 %v5119_v35 }
 0x45c   :  { %3614 = vmatprep.subr.mxu0 %v5125_v36 }
 0x45d   :  { %3615 = vmatpush3.msra.mxu0 %v5131_v38 }
 0x45e   :  { %3616 = vmatprep.subr.mxu0 %v5137_v53 }
 0x45f   :  { %3617 = vmatpush3.msra.mxu0 %v5143_v39 }
 0x460   :  { %3618 = vmatprep.subr.mxu0 %v5149_v40 }
 0x461   :  { %3619 = vmatpush3.msra.mxu0 %v5155_v41 }
 0x462   :  { %3620 = vmatprep.subr.mxu0 %v5161_v37 }
 0x463   :  { %3621 = vmatpush3.msra.mxu0 %v5167_v42 }
 0x464   :  { %3622 = vmatprep.subr.mxu0 %v5173_v43 }
 0x465   :  { %3623 = vmatpush3.msra.mxu0 %v5179_v6 }
 0x466   :  { %3624 = vmatprep.subr.mxu0 %v5185_v45 }
 0x467   :  { %3625 = vmatpush3.msra.mxu0 %v5191_v47 }
 0x468   :  { %3626 = vmatprep.subr.mxu0 %v5197_v50 }
 0x469   :  { %3627 = vmatpush3.msra.mxu0 %v5203_v51 }
 0x46a   :  { %3628 = vmatprep.subr.mxu0 %v5209_v48 }
 0x46b   :  { %3629 = vmatpush3.msra.mxu0 %v5215_v52 }
 0x46c   :  { %3630 = vmatprep.subr.mxu0 %v5221_v2 }
 0x46d   :  { %3631 = vmatpush3.msra.mxu0 %v5227_v1 }
 0x46e   :  { %3632 = vmatprep.subr.mxu0 %v5233_v54 }
 0x46f   :  { %3633 = vmatpush3.msra.mxu0 %v5239_v57 }
 0x4ca   :  { %v3927_v55 = vpop.f32.mrf.mxu0 }
 0x4cb   :  { %v1083_v5 = vmul.f32 %v3927_v55, %v4886_v15 }
 0x4cc   :  { %v975_v58 = vpop.f32.mrf.mxu0 }
 0x4cd   :  { %v1082_v63 = vmul.f32 %v975_v58, %v4890_v17 }
 0x4ce   :  { %v3930_v61 = vpop.f32.mrf.mxu0  ;;  %v3935_v62 = vpop.f32.mrf.mxu1 }
 0x4cf   :  { %v5245_v4 = vadd.f32 %v3935_v62, %v1083_v5  ;;  %v1085_v46 = vmul.f32 %v3930_v61, %v4880_v10  ;;  %v5256_v10 = vsub.s32 0, %v4714_v56  ;;  %v5262_v61 = vsub.s32 1, %v4714_v56 }
 0x4d0   :  { %v1063_v44 = vpop.f32.mrf.mxu1  ;;  %v985_v8 = vpop.f32.mrf.mxu0 }
 0x4d1   :  { %v5247_v7 = vadd.f32 %v1082_v63, %v1063_v44  ;;  %v1084_v11 = vmul.f32 %v985_v8, %v4882_v14  ;;  %v1186_v14 = vld [vmem:[%s5704_s7] ss:$8 sm:$0x3]  ;;  %vm1131_vm14 = vcmp.gt.f32.partialorder %v5245_v4, 20.0 }
 0x4d2   :  { %v1311_v44 = vrot.slane %v1186_v14, %v5256_v10 }
 0x4d3   :  { %vm1130_vm11 = vcmp.gt.f32.partialorder %v5247_v7, 20.0 }
 0x4d4   :  { %v3938_v9 = vpop.f32.mrf.mxu1 }
 0x4d5   :  { %v5251_v18 = vadd.f32 %v3938_v9, %v1085_v46  ;;  %v1315_v46 = vrot.slane %v1186_v14, %v5262_v61 }
 0x4d6   :  { %v1073_v60 = vpop.f32.mrf.mxu1 }
 0x4d7   :  { %5734 = vst [vmem:[#allocation28_spill] sm:$0xff] %v5251_v18  ;;  %v5253_v22 = vadd.f32 %v1084_v11, %v1073_v60 }
 0x4d9   :  { %vm1132_vm7 = vcmp.gt.f32.partialorder %v5253_v22, 20.0 }
 0x4f1   :  { %v1473_v15 = vpop.f32.mrf.mxu1 }
 0x4f3   :  { %v1475_v23 = vpop.f32.mrf.mxu1 }
 0x4f5   :  { %v1479_v24 = vpop.f32.mrf.mxu1 }
 0x4f7   :  { %v1481_v17 = vpop.f32.mrf.mxu1 }
 0x4f9   :  { %v1485_v19 = vpop.f32.mrf.mxu1 }
 0x4fb   :  { %v1487_v58 = vpop.f32.mrf.mxu1 }
 0x4fd   :  { %v1491_v63 = vpop.f32.mrf.mxu1 }
 0x4ff   :  { %v1493_v12 = vpop.f32.mrf.mxu1 }
 0x50c   :  { %v1384_v26 = vpop.f32.mrf.mxu0 }
 0x50d   :  { %v1385_v56 = vadd.f32 %v1384_v26, %v1311_v44 }
 0x50e   :  { %v1386_v27 = vpop.f32.mrf.mxu0 }
 0x50f   :  { %v1387_v20 = vadd.f32 %v1386_v27, %v1315_v46 }
 0x510   :  { %v1390_v49 = vpop.f32.mrf.mxu0 }
 0x511   :  { %v1391_v28 = vadd.f32 %v1390_v49, %v1311_v44 }
 0x512   :  { %v1392_v55 = vpop.f32.mrf.mxu0 }
 0x513   :  { %v1393_v13 = vadd.f32 %v1392_v55, %v1315_v46  ;;  %v5279_v55 = vadd.f32 %v1479_v24, %v1391_v28 }
 0x514   :  { %v1396_v5 = vpop.f32.mrf.mxu0 }
 0x515   :  { %v1397_v0 = vadd.f32 %v1396_v5, %v1311_v44  ;;  %v5276_v14 = vadd.f32 %v1481_v17, %v1393_v13  ;;  %v1573_v24 = vmul.f32 %v5279_v55, %v5279_v55 }
 0x516   :  { %v1398_v62 = vpop.f32.mrf.mxu0 }
 0x517   :  { %v1399_v60 = vadd.f32 %v1398_v62, %v1315_v46  ;;  %v5273_v18 = vadd.f32 %v1485_v19, %v1397_v0 }
 0x518   :  { %v1402_v8 = vpop.f32.mrf.mxu0 }
 0x519   :  { %v1403_v9 = vadd.f32 %v1402_v8, %v1311_v44  ;;  %v5270_v21 = vadd.f32 %v1487_v58, %v1399_v60  ;;  %v1575_v28 = vmul.f32 %v5273_v18, %v5273_v18  ;;  %v5379_v8 = vld [vmem:[%s5710_s13] sm:$0xff]  ;;  %v2386_v60 = vld [vmem:[#allocation7 + $0x170] sm:$0xff] }
 0x51a   :  { %v1404_v11 = vpop.f32.mrf.mxu0 }
 0x51b   :  { %v1405_v32 = vadd.f32 %v1404_v11, %v1315_v46  ;;  %v5268_v3 = vadd.f32 %v1491_v63, %v1403_v9  ;;  %v4242_v9 = vld [vmem:[%s5710_s13 + $0x18] sm:$0xff] }
 0x51c   :  { %v2387_v11 = vld [vmem:[#allocation7 + $0x178] sm:$0xff] }
 0x51d   :  { %v5266_v29 = vadd.f32 %v1493_v12, %v1405_v32  ;;  %v5282_v12 = vadd.f32 %v1475_v23, %v1387_v20  ;;  %v5285_v32 = vadd.f32 %v1473_v15, %v1385_v56  ;;  %v1577_v13 = vmul.f32 %v5268_v3, %v5268_v3  ;;  %v4238_v20 = vld [vmem:[%s5709_s12] sm:$0x3] }
 0x51e   :  { %v1576_v56 = vmul.f32 %v5270_v21, %v5270_v21  ;;  %v5735_v15 = vmov 0.0   ;;  %v1574_v23 = vmul.f32 %v5276_v14, %v5276_v14 }
 0x51f   :  { %1524 = vmatprep.subr.mxu1 %v5266_v29  ;;  %v1578_v0 = vmul.f32 %v5266_v29, %v5266_v29  ;;  %v1572_v17 = vmul.f32 %v5282_v12, %v5282_v12  ;;  %v1571_v26 = vmul.f32 %v5285_v32, %v5285_v32 }
 0x520   :  { %1525 = vmatpush1.msra.mxu1 %v5268_v3 }
 0x521   :  { %1526 = vmatprep.subr.mxu1 %v5270_v21 }
 0x522   :  { %1527 = vmatpush1.msra.mxu1 %v5273_v18 }
 0x523   :  { %1528 = vmatprep.subr.mxu1 %v5276_v14 }
 0x524   :  { %1529 = vmatpush1.msra.mxu1 %v5279_v55 }
 0x525   :  { %1530 = vmatprep.subr.mxu1 %v5282_v12 }
 0x526   :  { %1531 = vmatpush1.msra.mxu1 %v5285_v32 }
 0x527   :  { %3403 = vmatmul.mubr.msk.f32.vlgmr.msra.gmra.mxu1 %vm428_vm3, %v4238_v20  ;;  %1603 = vmatprep.subr.mxu1 %v1578_v0  ;;  %v2371_v0 = vld [vmem:[#allocation7 + $0xf8] sm:$0xff] }
 0x528   :  { %1604 = vmatpush1.msra.mxu1 %v1577_v13  ;;  %1643 = vmatprep.mubr.f32.mxu1 %v5735_v15  ;;  %v2385_v13 = vld [vmem:[#allocation7 + $0x168] sm:$0xff] }
 0x529   :  { %1605 = vmatprep.subr.mxu1 %v1576_v56  ;;  %v2370_v56 = vld [vmem:[#allocation7 + $0xf0] sm:$0xff] }
 0x52a   :  { %1606 = vmatpush1.msra.mxu1 %v1575_v28  ;;  %v2384_v28 = vld [vmem:[#allocation7 + $0x160] sm:$0xff] }
 0x52b   :  { %1607 = vmatprep.subr.mxu1 %v1574_v23  ;;  %v2354_v23 = vld [vmem:[#allocation7 + $0x70] sm:$0xff] }
 0x52c   :  { %1608 = vmatpush1.msra.mxu1 %v1573_v24  ;;  %v2369_v24 = vld [vmem:[#allocation7 + $0xe8] sm:$0xff] }
 0x52d   :  { %1609 = vmatprep.subr.mxu1 %v1572_v17  ;;  %v2383_v17 = vld [vmem:[#allocation7 + $0x158] sm:$0xff] }
 0x52e   :  { %1610 = vmatpush1.msra.mxu1 %v1571_v26  ;;  %v2353_v26 = vld [vmem:[#allocation7 + $0x68] sm:$0xff] }
 0x52f   :  { %3404 = vmatmul.mubr.msk.f32.vlgmr.msra.gmra.mxu1 %vm428_vm3, %v4238_v20  ;;  %3571 = vmatprep.subr.mxu1 %v5078_v59  ;;  %v1667_v59 = vld [vmem:[%s5707_s10 + $0x88] sm:$0xff]  ;;  %v2355_v20 = vld [vmem:[#allocation7 + $0x78] sm:$0xff] }
 0x530   :  { %3572 = vmatpush3.msra.mxu1 %v5083_v16  ;;  %v1651_v16 = vld [vmem:[%s5707_s10 + $0x8] sm:$0xff]  ;;  %3634 = vmatprep.subr.mxu0 %v1667_v59 }
 0x531   :  { %3573 = vmatprep.subr.mxu1 %v5089_v25  ;;  %v1666_v25 = vld [vmem:[%s5707_s10 + $0x80] sm:$0xff]  ;;  %3635 = vmatpush3.msra.mxu0 %v1651_v16 }
 0x532   :  { %3574 = vmatpush3.msra.mxu1 %v5095_v30  ;;  %v1650_v30 = vld [vmem:[%s5707_s10] sm:$0xff]  ;;  %3636 = vmatprep.subr.mxu0 %v1666_v25 }
 0x533   :  { %3575 = vmatprep.subr.mxu1 %v5101_v31  ;;  %3637 = vmatpush3.msra.mxu0 %v1650_v30 }
 0x534   :  { %3576 = vmatpush3.msra.mxu1 %v5107_v33 }
 0x535   :  { %3577 = vmatprep.subr.mxu1 %v5113_v34 }
 0x536   :  { %3578 = vmatpush3.msra.mxu1 %v5119_v35 }
 0x537   :  { %3579 = vmatprep.subr.mxu1 %v5125_v36  ;;  %v1828_v36 = vld [vmem:[%s5708_s11 + $0x8] sm:$0xff] }
 0x538   :  { %3580 = vmatpush3.msra.mxu1 %v5131_v38  ;;  %v1827_v38 = vld [vmem:[%s5708_s11] sm:$0xff] }
 0x539   :  { %3581 = vmatprep.subr.mxu1 %v5137_v53 }
 0x53a   :  { %3582 = vmatpush3.msra.mxu1 %v5143_v39 }
 0x53b   :  { %3583 = vmatprep.subr.mxu1 %v5149_v40 }
 0x53c   :  { %3584 = vmatpush3.msra.mxu1 %v5155_v41 }
 0x53d   :  { %3585 = vmatprep.subr.mxu1 %v5161_v37 }
 0x53e   :  { %3586 = vmatpush3.msra.mxu1 %v5167_v42 }
 0x53f   :  { %3587 = vmatprep.subr.mxu1 %v5173_v43 }
 0x540   :  { %3588 = vmatpush3.msra.mxu1 %v5179_v6 }
 0x541   :  { %3589 = vmatprep.subr.mxu1 %v5185_v45 }
 0x542   :  { %3590 = vmatpush3.msra.mxu1 %v5191_v47 }
 0x543   :  { %3591 = vmatprep.subr.mxu1 %v5197_v50 }
 0x544   :  { %3592 = vmatpush3.msra.mxu1 %v5203_v51 }
 0x545   :  { %3593 = vmatprep.subr.mxu1 %v5209_v48  ;;  %v3401_v48 = vld [vmem:[%s5704_s7 + $0x1] ss:$8 sm:$0x3] }
 0x546   :  { %3594 = vmatpush3.msra.mxu1 %v5215_v52  ;;  %v1981_v52 = vrot.slane %v3401_v48, %v5256_v10 }
 0x547   :  { %3595 = vmatprep.subr.mxu1 %v5221_v2 }
 0x548   :  { %3596 = vmatpush3.msra.mxu1 %v5227_v1  ;;  %v1985_v1 = vrot.slane %v3401_v48, %v5262_v61  ;;  %v2375_v48 = vld [vmem:[#allocation7 + $0x118] sm:$0xff] }
 0x549   :  { %3597 = vmatprep.subr.mxu1 %v5233_v54 }
 0x54a   :  { %3598 = vmatpush3.msra.mxu1 %v5239_v57  ;;  %v3402_v57 = vld [vmem:[%s5704_s7 + $0x2] ss:$8 sm:$0x3] }
 0x54b   :  { %3599 = vmatprep.subr.mxu1 %v1667_v59  ;;  %v2000_v58 = vrot.slane %v3402_v57, %v5262_v61  ;;  %v1996_v62 = vrot.slane %v3402_v57, %v5256_v10  ;;  %v4240_v10 = vld [vmem:[%s5710_s13 + $0x8] sm:$0xff]  ;;  %v4241_v61 = vld [vmem:[%s5710_s13 + $0x10] sm:$0xff]  ;;  %v2368_v59 = vld [vmem:[#allocation7 + $0xe0] sm:$0xff] }
 0x54c   :  { %3600 = vmatpush3.msra.mxu1 %v1651_v16  ;;  %v2382_v16 = vld [vmem:[#allocation7 + $0x150] sm:$0xff]  ;;  %v2359_v57 = vld [vmem:[#allocation7 + $0x98] sm:$0xff] }
 0x54d   :  { %3601 = vmatprep.subr.mxu1 %v1666_v25  ;;  %v2352_v25 = vld [vmem:[#allocation7 + $0x60] sm:$0xff] }
 0x54e   :  { %3602 = vmatpush3.msra.mxu1 %v1650_v30  ;;  %v2367_v30 = vld [vmem:[#allocation7 + $0xd8] sm:$0xff] }
 0x54f   :  { %1862 = vmatprep.subr.mxu1 %v1828_v36 }
 0x5e7   :  { %v1566_v31 = vpop.f32.mrf.mxu1 }
 0x5e9   :  { %v1568_v33 = vpop.f32.mrf.mxu1 }
 0x5ea   :  { %1746 = vmatprep.mubr.f32.mxu1 %v1568_v33  ;;  %v2351_v33 = vld [vmem:[#allocation7 + $0x58] sm:$0xff] }
 0x5eb   :  { %1747 = vmatmul.mubr.f32.vlgmr.msra.gmra.mxu1 %v1566_v31  ;;  %v2381_v31 = vld [vmem:[#allocation7 + $0x148] sm:$0xff] }
 0x5ec   :  { %1896 = vmatprep.mubr.f32.mxu1 %v5735_v15  ;;  %1863 = vmatpush1.msra.mxu1 %v1827_v38 }
 0x5ed   :  { %1936 = vmatprep.subr.mxu1 %v1828_v36  ;;  %v2350_v36 = vld [vmem:[#allocation7 + $0x50] sm:$0xff] }
 0x5ef   :  { %v1645_v34 = vpop.f32.mrf.mxu1 }
 0x5f1   :  { %v1647_v35 = vpop.f32.mrf.mxu1 }
 0x5f2   :  { %1816 = vmatprep.mubr.f32.mxu0 %v1647_v35  ;;  %v2380_v35 = vld [vmem:[#allocation7 + $0x140] sm:$0xff] }
 0x5f3   :  { %1817 = vmatmul.mubr.f32.vlgmr.msra.gmra.mxu0 %v1645_v34  ;;  %v2366_v34 = vld [vmem:[#allocation7 + $0xd0] sm:$0xff] }
 0x5f4   :  { %2075 = vmatprep.mubr.f32.mxu0 %v5735_v15 }
 0x6ab   :  { %v3603_v53 = vpop.f32.mrf.mxu1 }
 0x6ad   :  { %v3604_v39 = vpop.f32.mrf.mxu1 }
 0x6ae   :  { %v3605_v40 = vadd.f32 %v3604_v39, %v3603_v53  ;;  %v2379_v53 = vld [vmem:[#allocation7 + $0x138] sm:$0xff]  ;;  %v2349_v39 = vld [vmem:[#allocation7 + $0x48] sm:$0xff] }
 0x6b0   :  { %3405 = vmatmul.mubr.msk.f32.vlgmr.msra.gmra.mxu1 %vm738_vm4, %v3605_v40  ;;  %v1822_v42 = vmul.f32 %v3605_v40, %v3605_v40  ;;  %v2364_v40 = vld [vmem:[#allocation7 + $0xc0] sm:$0xff] }
 0x6b1   :  { %1937 = vmatpush1.msra.mxu1 %v1827_v38  ;;  %1970 = vmatprep.mubr.f32.mxu1 %v5735_v15  ;;  %v2365_v38 = vld [vmem:[#allocation7 + $0xc8] sm:$0xff] }
 0x6b3   :  { %v3638_v41 = vpop.f32.mrf.mxu0 }
 0x6b5   :  { %v3639_v37 = vpop.f32.mrf.mxu0 }
 0x6b6   :  { %v3640_v43 = vadd.f32 %v3639_v37, %v3638_v41  ;;  %v2378_v41 = vld [vmem:[#allocation7 + $0x130] sm:$0xff]  ;;  %v2348_v37 = vld [vmem:[#allocation7 + $0x40] sm:$0xff] }
 0x6b8   :  { %v1823_v6 = vsub.f32 %v3640_v43, %v1822_v42  ;;  %v2363_v42 = vld [vmem:[#allocation7 + $0xb8] sm:$0xff]  ;;  %v2377_v43 = vld [vmem:[#allocation7 + $0x128] sm:$0xff] }
 0x6ba   :  { %v1824_v45 = vmax.f32 %v1823_v6, 0.0  ;;  %v2347_v6 = vld [vmem:[#allocation7 + $0x38] sm:$0xff] }
 0x6bc   :  { %v1825_v47 = vadd.f32 1e-05, %v1824_v45  ;;  %v2362_v45 = vld [vmem:[#allocation7 + $0xb0] sm:$0xff] }
 0x6be   :  { %4170 = vrsqrt.f32 %v1825_v47  ;;  %v2376_v47 = vld [vmem:[#allocation7 + $0x120] sm:$0xff] }
 0x6cb   :  { %v4171_v50 = vpop.eup %4170 }
 0x6cc   :  { %3406 = vmatmul.mubr.msk.f32.vlgmr.msra.gmra.mxu1 %vm738_vm4, %v4171_v50  ;;  %v2346_v50 = vld [vmem:[#allocation7 + $0x30] sm:$0xff] }
 0x6cd   :  { %2170 = vmatprep.mubr.f32.mxu1 %v5735_v15 }
 0x770   :  { %v1898_v51 = vpop.f32.mrf.mxu1 }
 0x772   :  { %v1900_v2 = vpop.f32.mrf.mxu1 }
 0x78c   :  { %v1972_v54 = vpop.f32.mrf.mxu1 }
 0x78d   :  { %v1988_v27 = vmul.f32 %v1981_v52, %v1972_v54  ;;  %v2345_v52 = vld [vmem:[#allocation7 + $0x28] sm:$0xff]  ;;  %v2344_v54 = vld [vmem:[#allocation7 + $0x20] sm:$0xff] }
 0x78e   :  { %v1974_v19 = vpop.f32.mrf.mxu1 }
 0x78f   :  { %v1989_v49 = vmul.f32 %v1985_v1, %v1974_v19  ;;  %v1990_v5 = vmul.f32 %v1988_v27, %v1898_v51  ;;  %v2361_v51 = vld [vmem:[#allocation7 + $0xa8] sm:$0xff]  ;;  %v2374_v1 = vld [vmem:[#allocation7 + $0x110] sm:$0xff]  ;;  %v2343_v19 = vld [vmem:[#allocation7 + $0x18] sm:$0xff] }
 0x791   :  { %v1991_v63 = vmul.f32 %v1989_v49, %v1900_v2  ;;  %3407 = vmatprep.subr.msk.mxu0 %vm905_vm6, %v1989_v49  ;;  %v2003_v46 = vsub.f32 %v1996_v62, %v1990_v5  ;;  %v2360_v2 = vld [vmem:[#allocation7 + $0xa0] sm:$0xff]  ;;  %v2358_v49 = vld [vmem:[#allocation7 + $0x90] sm:$0xff]  ;;  %v2357_v62 = vld [vmem:[#allocation7 + $0x88] sm:$0xff] }
 0x792   :  { %3408 = vmatpush1.msk.msra.mxu0 %vm905_vm6, %v1988_v27  ;;  %v2373_v27 = vld [vmem:[#allocation7 + $0x108] sm:$0xff]  ;;  %v2342_v5 = vld [vmem:[#allocation7 + $0x10] sm:$0xff] }
 0x793   :  { %v2004_v44 = vsub.f32 %v2000_v58, %v1991_v63  ;;  %3409 = vmatmul.mubr.msk.f32.vlgmr.msra.gmra.mxu0 %vm896_vm5, %v5379_v8  ;;  %3641 = vmatprep.subr.mxu0 %v2371_v0  ;;  %v2372_v58 = vld [vmem:[#allocation7 + $0x100] sm:$0xff]  ;;  %v2341_v63 = vld [vmem:[#allocation7 + $0x8] sm:$0xff] }
 0x794   :  { %2081 = vmatprep.mubr.f32.mxu0 %v5735_v15  ;;  %3642 = vmatpush3.msra.mxu0 %v2355_v20 }
 0x795   :  { %3413 = vmatprep.subr.msk.mxu1 %vm905_vm6, %v2004_v44  ;;  %3643 = vmatprep.subr.mxu0 %v2370_v56  ;;  %v2356_v44 = vld [vmem:[#allocation7 + $0x80] sm:$0xff] }
 0x796   :  { %3414 = vmatpush1.msk.msra.mxu1 %vm905_vm6, %v2003_v46  ;;  %3644 = vmatpush3.msra.mxu0 %v2354_v23  ;;  %v2340_v46 = vld [vmem:[#allocation7] sm:$0xff] }
 0x797   :  { %3410 = vmatmul.mubr.msk.f32.gmra.mxu0 %vm896_vm5, %v4240_v10  ;;  %3415 = vmatmul.mubr.msk.f32.vlgmr.msra.gmra.mxu1 %vm896_vm5, %v5379_v8 }
 0x798   :  { %2087 = vmatprep.mubr.f32.mxu0 %v5735_v15  ;;  %2176 = vmatprep.mubr.f32.mxu1 %v5735_v15 }
 0x799   :  { %3939 = vmatprep.subr.mxu1 %v2387_v11  ;;  %3645 = vmatprep.subr.mxu0 %v2369_v24 }
 0x79a   :  { %3940 = vmatpush3.msra.mxu1 %v2387_v11  ;;  %3646 = vmatpush3.msra.mxu0 %v2353_v26  ;;  %v1092_v11 = vmin.f32 %v5253_v22, 20.0 }
 0x79b   :  { %3411 = vmatmul.mubr.msk.f32.gmra.mxu0 %vm896_vm5, %v4241_v61  ;;  %3416 = vmatmul.mubr.msk.f32.gmra.mxu1 %vm896_vm5, %v4240_v10  ;;  %v1090_v10 = vmin.f32 %v5247_v7, 20.0 }
 0x79c   :  { %2093 = vmatprep.mubr.f32.mxu0 %v5735_v15  ;;  %2182 = vmatprep.mubr.f32.mxu1 %v5735_v15 }
 0x79d   :  { %3941 = vmatprep.subr.mxu1 %v2386_v60  ;;  %3647 = vmatprep.subr.mxu0 %v2368_v59 }
 0x79e   :  { %3942 = vmatpush3.msra.mxu1 %v2386_v60  ;;  %3648 = vmatpush3.msra.mxu0 %v2352_v25 }
 0x79f   :  { %3412 = vmatmul.mubr.msk.f32.gmra.mxu0 %vm896_vm5, %v4242_v9  ;;  %3417 = vmatmul.mubr.msk.f32.gmra.mxu1 %vm896_vm5, %v4241_v61  ;;  %v1094_v61 = vmul.f32 1.442695, %v1090_v10 }
 0x7a0   :  { %2188 = vmatprep.mubr.f32.mxu1 %v5735_v15  ;;  %3943 = vmatprep.subr.mxu1 %v2385_v13 }
 0x7a1   :  { %3944 = vmatpush3.msra.mxu1 %v2385_v13  ;;  %3649 = vmatprep.subr.mxu0 %v2367_v30  ;;  %4172 = vpow2.f32 %v1094_v61  ;;  %v5736_v13 = vld [vmem:[#allocation28_spill] sm:$0xff] }
 0x7a2   :  { %3945 = vmatprep.subr.mxu1 %v2384_v28  ;;  %3650 = vmatpush3.msra.mxu0 %v2351_v33  ;;  %v1093_v20 = vmin.f32 %v5736_v13, 20.0  ;;  %vm1133_vm10 = vcmp.gt.f32.partialorder %v5736_v13, 20.0 }
 0x7a3   :  { %3418 = vmatmul.mubr.msk.f32.gmra.mxu1 %vm896_vm5, %v4242_v9  ;;  %3651 = vmatprep.subr.mxu0 %v2366_v34  ;;  %v1091_v9 = vmin.f32 %v5245_v4, 20.0 }
 0x7a4   :  { %3946 = vmatpush3.msra.mxu1 %v2384_v28  ;;  %3652 = vmatpush3.msra.mxu0 %v2350_v36  ;;  %v1098_v28 = vmul.f32 1.442695, %v1092_v11  ;;  %v1100_v26 = vmul.f32 1.442695, %v1093_v20 }
 0x7a5   :  { %3947 = vmatprep.subr.mxu1 %v2383_v17  ;;  %3653 = vmatprep.subr.mxu0 %v2365_v38  ;;  %v1096_v60 = vmul.f32 1.442695, %v1091_v9 }
 0x7a6   :  { %3948 = vmatpush3.msra.mxu1 %v2383_v17  ;;  %3654 = vmatpush3.msra.mxu0 %v2349_v39 }
 0x7a7   :  { %3949 = vmatprep.subr.mxu1 %v2382_v16  ;;  %3655 = vmatprep.subr.mxu0 %v2364_v40  ;;  %4174 = vpow2.f32 %v1096_v60 }
 0x7a8   :  { %3950 = vmatpush3.msra.mxu1 %v2382_v16  ;;  %3656 = vmatpush3.msra.mxu0 %v2348_v37  ;;  %4176 = vpow2.f32 %v1098_v28 }
 0x7a9   :  { %3951 = vmatprep.subr.mxu1 %v2381_v31  ;;  %3657 = vmatprep.subr.mxu0 %v2363_v42  ;;  %4178 = vpow2.f32 %v1100_v26 }
 0x7aa   :  { %3952 = vmatpush3.msra.mxu1 %v2381_v31  ;;  %3658 = vmatpush3.msra.mxu0 %v2347_v6 }
 0x7ab   :  { %3953 = vmatprep.subr.mxu1 %v2380_v35  ;;  %3659 = vmatprep.subr.mxu0 %v2362_v45 }
 0x7ac   :  { %3954 = vmatpush3.msra.mxu1 %v2380_v35  ;;  %3660 = vmatpush3.msra.mxu0 %v2346_v50 }
 0x7ad   :  { %3955 = vmatprep.subr.mxu1 %v2379_v53  ;;  %3661 = vmatprep.subr.mxu0 %v2361_v51 }
 0x7ae   :  { %3956 = vmatpush3.msra.mxu1 %v2379_v53  ;;  %3662 = vmatpush3.msra.mxu0 %v2345_v52  ;;  %v4173_v42 = vpop.eup %4172 }
 0x7af   :  { %3957 = vmatprep.subr.mxu1 %v2378_v41  ;;  %3663 = vmatprep.subr.mxu0 %v2360_v2  ;;  %v1102_v2 = vadd.f32 1.0, %v4173_v42 }
 0x7b0   :  { %3958 = vmatpush3.msra.mxu1 %v2378_v41  ;;  %3664 = vmatpush3.msra.mxu0 %v2344_v54 }
 0x7b1   :  { %3959 = vmatprep.subr.mxu1 %v2377_v43  ;;  %3665 = vmatprep.subr.mxu0 %v2359_v57 }
 0x7b2   :  { %3960 = vmatpush3.msra.mxu1 %v2377_v43  ;;  %3666 = vmatpush3.msra.mxu0 %v2343_v19 }
 0x7b3   :  { %3961 = vmatprep.subr.mxu1 %v2376_v47  ;;  %3667 = vmatprep.subr.mxu0 %v2358_v49 }
 0x7b4   :  { %3962 = vmatpush3.msra.mxu1 %v2376_v47  ;;  %3668 = vmatpush3.msra.mxu0 %v2342_v5  ;;  %v4175_v19 = vpop.eup %4174 }
 0x7b5   :  { %3963 = vmatprep.subr.mxu1 %v2375_v48  ;;  %3669 = vmatprep.subr.mxu0 %v2357_v62  ;;  %v1103_v10 = vadd.f32 1.0, %v4175_v19 }
 0x7b6   :  { %3964 = vmatpush3.msra.mxu1 %v2375_v48  ;;  %3670 = vmatpush3.msra.mxu0 %v2341_v63  ;;  %v1106_v63 = vmul.f32 %v1102_v2, %v1102_v2 }
 0x7b7   :  { %3965 = vmatprep.subr.mxu1 %v2374_v1  ;;  %3671 = vmatprep.subr.mxu0 %v2356_v44  ;;  %v1107_v28 = vmul.f32 %v1103_v10, %v1103_v10 }
 0x7b8   :  { %3966 = vmatpush3.msra.mxu1 %v2374_v1  ;;  %3672 = vmatpush3.msra.mxu0 %v2340_v46  ;;  %v4177_v46 = vpop.eup %4176 }
 0x7b9   :  { %3967 = vmatprep.subr.mxu1 %v2373_v27  ;;  %3988 = vmatprep.subr.mxu0 %v5735_v15  ;;  %v4179_v60 = vpop.eup %4178 }
 0x7ba   :  { %3968 = vmatpush3.msra.mxu1 %v2373_v27 }
 0x7bb   :  { %3969 = vmatprep.subr.mxu1 %v2372_v58 }
 0x7bc   :  { %3970 = vmatpush3.msra.mxu1 %v2372_v58 }
 0x7bd   :  { %3977 = vmatprep.subr.mxu1 %v5735_v15 }
 0x853   :  { %v2077_v0 = vpop.f32.mrf.mxu0 }
 0x854   :  { %v2195_v23 = vmul.f32 %v2077_v0, %v5285_v32  ;;  %v1104_v0 = vadd.f32 1.0, %v4177_v46 }
 0x855   :  { %v2079_v56 = vpop.f32.mrf.mxu0 }
 0x856   :  { %v2196_v59 = vmul.f32 %v2079_v56, %v5282_v12  ;;  %v1108_v26 = vmul.f32 %v1104_v0, %v1104_v0 }
 0x857   :  { %v2083_v24 = vpop.f32.mrf.mxu0  ;;  %v2172_v17 = vpop.f32.mrf.mxu1 }
 0x858   :  { %v5416_v16 = vadd.f32 %v2195_v23, %v2172_v17  ;;  %v2197_v31 = vmul.f32 %v2083_v24, %v5279_v55  ;;  %v1105_v23 = vadd.f32 1.0, %v4179_v60 }
 0x859   :  { %v2085_v25 = vpop.f32.mrf.mxu0  ;;  %v2174_v30 = vpop.f32.mrf.mxu1 }
 0x85a   :  { %v2211_v33 = vmin.f32 %v5416_v16, 20.0  ;;  %v5420_v34 = vadd.f32 %v2196_v59, %v2174_v30  ;;  %v2198_v12 = vmul.f32 %v2085_v25, %v5276_v14  ;;  %vm2291_vm12 = vcmp.gt.f32.partialorder %v5416_v16, 20.0 }
 0x85b   :  { %v2089_v35 = vpop.f32.mrf.mxu0  ;;  %v2178_v36 = vpop.f32.mrf.mxu1 }
 0x85c   :  { %v2219_v32 = vmul.f32 1.442695, %v2211_v33  ;;  %v2212_v38 = vmin.f32 %v5420_v34, 20.0  ;;  %v5423_v53 = vadd.f32 %v2197_v31, %v2178_v36  ;;  %v2199_v55 = vmul.f32 %v2089_v35, %v5273_v18 }
 0x85d   :  { %v2091_v39 = vpop.f32.mrf.mxu0  ;;  %v2180_v40 = vpop.f32.mrf.mxu1  ;;  %v1119_v31 = vadd.f32 1.0, %v1107_v28  ;;  %v1109_v33 = vmul.f32 %v1105_v23, %v1105_v23  ;;  %vm2292_vm13 = vcmp.gt.f32.partialorder %v5420_v34, 20.0 }
 0x85e   :  { %4180 = vpow2.f32 %v2219_v32  ;;  %v2221_v41 = vmul.f32 1.442695, %v2212_v38  ;;  %v2213_v37 = vmin.f32 %v5423_v53, 20.0  ;;  %v5428_v43 = vadd.f32 %v2198_v12, %v2180_v40 }
 0x85f   :  { %v2095_v6 = vpop.f32.mrf.mxu0  ;;  %v2184_v45 = vpop.f32.mrf.mxu1  ;;  %v2200_v51 = vmul.f32 %v2091_v39, %v5270_v21  ;;  %v1120_v12 = vadd.f32 1.0, %v1108_v26  ;;  %vm2293_vm15 = vcmp.gt.f32.partialorder %v5423_v53, 20.0 }
 0x860   :  { %4182 = vpow2.f32 %v2221_v41  ;;  %v2223_v47 = vmul.f32 1.442695, %v2213_v37  ;;  %v5430_v50 = vadd.f32 %v2199_v55, %v2184_v45  ;;  %v2214_v14 = vmin.f32 %v5428_v43, 20.0 }
 0x861   :  { %v2097_v48 = vpop.f32.mrf.mxu0  ;;  %v2186_v52 = vpop.f32.mrf.mxu1  ;;  %v2201_v18 = vmul.f32 %v2095_v6, %v5268_v3  ;;  %v1121_v37 = vadd.f32 1.0, %v1109_v33  ;;  %vm2294_vm8 = vcmp.gt.f32.partialorder %v5428_v43, 20.0 }
 0x862   :  { %4184 = vpow2.f32 %v2223_v47  ;;  %v2215_v1 = vmin.f32 %v5430_v50, 20.0  ;;  %v2225_v54 = vmul.f32 1.442695, %v2214_v14  ;;  %v5436_v57 = vadd.f32 %v2200_v51, %v2186_v52 }
 0x863   :  { %v2190_v27 = vpop.f32.mrf.mxu1  ;;  %v2202_v58 = vmul.f32 %v2097_v48, %v5266_v29  ;;  %v1118_v29 = vadd.f32 1.0, %v1106_v63  ;;  %v3393_v48 = vadd.f32 -1.0, %v1106_v63  ;;  %vm2295_vm9 = vcmp.gt.f32.partialorder %v5430_v50, 20.0 }
 0x864   :  { %v2227_v49 = vmul.f32 1.442695, %v2215_v1  ;;  %v5439_v5 = vadd.f32 %v2201_v18, %v2190_v27  ;;  %4186 = vpow2.f32 %v2225_v54  ;;  %v2216_v21 = vmin.f32 %v5436_v57, 20.0 }
 0x865   :  { %v2192_v62 = vpop.f32.mrf.mxu1 }
 0x866   :  { %4188 = vpow2.f32 %v2227_v49  ;;  %v2217_v3 = vmin.f32 %v5439_v5, 20.0  ;;  %v5443_v44 = vadd.f32 %v2202_v58, %v2192_v62  ;;  %v2229_v61 = vmul.f32 1.442695, %v2216_v21 }
 0x867   :  { %v3394_v21 = vadd.f32 -1.0, %v1107_v28  ;;  %v3395_v28 = vadd.f32 -1.0, %v1108_v26 }
 0x868   :  { %v2231_v9 = vmul.f32 1.442695, %v2217_v3  ;;  %v2218_v11 = vmin.f32 %v5443_v44, 20.0  ;;  %4190 = vpow2.f32 %v2229_v61  ;;  %v1114_v3 = vmul.f32 %v3393_v48, %v5247_v7 }
 0x86a   :  { %4192 = vpow2.f32 %v2231_v9  ;;  %v2233_v20 = vmul.f32 1.442695, %v2218_v11 }
 0x86b   :  { %v4181_v56 = vpop.eup %4180 }
 0x86c   :  { %v2235_v24 = vadd.f32 1.0, %v4181_v56  ;;  %4194 = vpow2.f32 %v2233_v20  ;;  %v1115_v56 = vmul.f32 %v3394_v21, %v5245_v4 }
 0x86d   :  { %v4183_v17 = vpop.eup %4182  ;;  %4196 = vrcp.f32 %v1118_v29 }
 0x86e   :  { %v2243_v59 = vmul.f32 %v2235_v24, %v2235_v24  ;;  %v2236_v25 = vadd.f32 1.0, %v4183_v17 }
 0x86f   :  { %v4185_v30 = vpop.eup %4184 }
 0x870   :  { %v2267_v35 = vadd.f32 1.0, %v2243_v59  ;;  %v2244_v36 = vmul.f32 %v2236_v25, %v2236_v25  ;;  %v2237_v32 = vadd.f32 1.0, %v4185_v30  ;;  %v3419_v27 = vadd.f32 -1.0, %v2243_v59 }
 0x871   :  { %v4187_v38 = vpop.eup %4186  ;;  %v3396_v59 = vadd.f32 -1.0, %v1109_v33  ;;  %v1116_v33 = vmul.f32 %v3395_v28, %v5253_v22 }
 0x872   :  { %4198 = vrcp.f32 %v2267_v35  ;;  %v2268_v39 = vadd.f32 1.0, %v2244_v36  ;;  %v2245_v41 = vmul.f32 %v2237_v32, %v2237_v32  ;;  %v2238_v55 = vadd.f32 1.0, %v4187_v38 }
 0x873   :  { %v4189_v40 = vpop.eup %4188  ;;  %4200 = vrcp.f32 %v1119_v31  ;;  %v3420_v46 = vadd.f32 -1.0, %v2244_v36  ;;  %v2259_v11 = vmul.f32 %v3419_v27, %v5416_v16 }
 0x874   :  { %4202 = vrcp.f32 %v2268_v39  ;;  %v2239_v42 = vadd.f32 1.0, %v4189_v40  ;;  %v2269_v6 = vadd.f32 1.0, %v2245_v41  ;;  %v2246_v45 = vmul.f32 %v2238_v55, %v2238_v55 }
 0x875   :  { %v4191_v47 = vpop.eup %4190  ;;  %4204 = vrcp.f32 %v1120_v12  ;;  %v3421_v29 = vadd.f32 -1.0, %v2245_v41  ;;  %v2260_v24 = vmul.f32 %v3420_v46, %v5420_v34 }
 0x876   :  { %v2247_v51 = vmul.f32 %v2239_v42, %v2239_v42  ;;  %4206 = vrcp.f32 %v2269_v6  ;;  %v2270_v52 = vadd.f32 1.0, %v2246_v45  ;;  %v2240_v18 = vadd.f32 1.0, %v4191_v47 }
 0x877   :  { %v4193_v14 = vpop.eup %4192  ;;  %4208 = vrcp.f32 %v1121_v37  ;;  %v3422_v25 = vadd.f32 -1.0, %v2246_v45  ;;  %v2261_v12 = vmul.f32 %v3421_v29, %v5423_v53 }
 0x878   :  { %v2271_v2 = vadd.f32 1.0, %v2247_v51  ;;  %v2241_v1 = vadd.f32 1.0, %v4193_v14  ;;  %4210 = vrcp.f32 %v2270_v52  ;;  %v2248_v19 = vmul.f32 %v2240_v18, %v2240_v18 }
 0x879   :  { %v4195_v54 = vpop.eup %4194  ;;  %v3423_v30 = vadd.f32 -1.0, %v2247_v51 }
 0x87a   :  { %4212 = vrcp.f32 %v2271_v2  ;;  %v2249_v49 = vmul.f32 %v2241_v1, %v2241_v1  ;;  %v4197_v58 = vpop.eup %4196  ;;  %v2242_v62 = vadd.f32 1.0, %v4195_v54  ;;  %v2272_v10 = vadd.f32 1.0, %v2248_v19 }
 0x87b   :  { %v1126_v9 = vmul.f32 %v4197_v58, %v1114_v3  ;;  %v2263_v45 = vmul.f32 %v3423_v30, %v5430_v50  ;;  %v3424_v47 = vadd.f32 -1.0, %v2248_v19 }
 0x87c   :  { %v2273_v63 = vadd.f32 1.0, %v2249_v49  ;;  %v2250_v61 = vmul.f32 %v2242_v62, %v2242_v62  ;;  %4214 = vrcp.f32 %v2272_v10  ;;  %v3425_v52 = vadd.f32 -1.0, %v2249_v49 }
 0x87d   :  { %v1134_v31 = vsel %vm1130_vm11, %v5247_v7, %v1126_v9  ;;  %v1117_v7 = vmul.f32 %v3396_v59, %v5736_v13  ;;  %v2264_v49 = vmul.f32 %v3424_v47, %v5436_v57  ;;  %vm2296_vm11 = vcmp.gt.f32.partialorder %v5436_v57, 20.0  ;;  %v5745_v47 = vld [vmem:[#allocation22_spill] sm:$0xff] }
 0x87e   :  { %4216 = vrcp.f32 %v2273_v63  ;;  %v2274_v0 = vadd.f32 1.0, %v2250_v61  ;;  %v3426_v27 = vadd.f32 -1.0, %v2250_v61  ;;  %v2265_v62 = vmul.f32 %v3425_v52, %v5439_v5 }
 0x87f   :  { %v4199_v60 = vpop.eup %4198 }
 0x880   :  { %v4201_v20 = vpop.eup %4200  ;;  %v2283_v23 = vmul.f32 %v4199_v60, %v2259_v11  ;;  %4218 = vrcp.f32 %v2274_v0  ;;  %v2266_v9 = vmul.f32 %v3426_v27, %v5443_v44 }
 0x881   :  { %v4203_v17 = vpop.eup %4202  ;;  %v1127_v38 = vmul.f32 %v4201_v20, %v1115_v56 }
 0x882   :  { %v2284_v35 = vmul.f32 %v4203_v17, %v2260_v24  ;;  %v2299_v36 = vsel %vm2291_vm12, %v5416_v16, %v2283_v23  ;;  %v4205_v32 = vpop.eup %4204  ;;  %v2262_v16 = vmul.f32 %v3422_v25, %v5428_v43  ;;  %vm2297_vm12 = vcmp.gt.f32.partialorder %v5439_v5, 20.0  ;;  %v5738_v23 = vld [vmem:[#allocation25_spill] sm:$0xff] }
 0x883   :  { %v2307_v26 = vmul.f32 %v2299_v36, %v1134_v31  ;;  %v4207_v39 = vpop.eup %4206  ;;  %v1128_v6 = vmul.f32 %v4205_v32, %v1116_v33  ;;  %v1135_v14 = vsel %vm1131_vm14, %v5245_v4, %v1127_v38  ;;  %v5740_v33 = vld [vmem:[#allocation21_spill] sm:$0xff] }
 0x884   :  { %v2300_v40 = vsel %vm2292_vm13, %v5420_v34, %v2284_v35  ;;  %v4209_v41 = vpop.eup %4208  ;;  %v2285_v55 = vmul.f32 %v4207_v39, %v2261_v12  ;;  %vm2298_vm13 = vcmp.gt.f32.partialorder %v5443_v44, 20.0 }
 0x885   :  { %v5461_v37 = vadd.f32 %v2307_v26, %v2300_v40  ;;  %v4211_v42 = vpop.eup %4210  ;;  %v1129_v1 = vmul.f32 %v4209_v41, %v1117_v7  ;;  %v1136_v4 = vsel %vm1132_vm7, %v5253_v22, %v1128_v6  ;;  %v5741_v41 = vld [vmem:[#allocation26_spill] sm:$0xff]  ;;  %v5744_v6 = vld [vmem:[#allocation20_spill] sm:$0xff] }
 0x886   :  { %v2301_v34 = vsel %vm2293_vm15, %v5423_v53, %v2285_v55  ;;  %v2286_v48 = vmul.f32 %v4211_v42, %v2262_v16  ;;  %v5742_v55 = vld [vmem:[#allocation27_spill] sm:$0xff] }
 0x887   :  { %v4213_v51 = vpop.eup %4212  ;;  %2456 = vmatprep.mubr.f32.mxu0 %v5461_v37  ;;  %v2308_v2 = vmul.f32 %v2301_v34, %v1135_v14  ;;  %v2316_v3 = vrot.slane %v5461_v37, 7  ;;  %v2328_v10 = vrot.slane %v5461_v37, 1  ;;  %v1137_v22 = vsel %vm1133_vm10, %v5736_v13, %v1129_v1  ;;  %v5743_v37 = vld [vmem:[#allocation23_spill] sm:$0xff] }
 0x888   :  { %v2287_v18 = vmul.f32 %v4213_v51, %v2263_v45  ;;  %v2302_v54 = vsel %vm2294_vm8, %v5428_v43, %v2286_v48 }
 0x889   :  { %v2312_v19 = vadd.f32 %v2308_v2, %v2302_v54  ;;  %v4215_v58 = vpop.eup %4214 }
 0x88a   :  { %v2303_v53 = vsel %vm2295_vm9, %v5430_v50, %v2287_v18  ;;  %v2288_v43 = vmul.f32 %v4215_v58, %v2264_v49  ;;  %v3427_v49 = vld [vmem:[#allocation10 + $0x3] ss:$0 sm:$0xff] }
 0x88b   :  { %v2309_v21 = vmul.f32 %v2303_v53, %v1136_v4  ;;  %v4217_v46 = vpop.eup %4216  ;;  %v2329_v63 = vrot.slane %v2312_v19, 1  ;;  %v2317_v61 = vrot.slane %v2312_v19, 7 }
 0x88c   :  { %v2289_v50 = vmul.f32 %v4217_v46, %v2265_v62  ;;  %v2304_v60 = vsel %vm2296_vm11, %v5436_v57, %v2288_v43 }
 0x88d   :  { %v4219_v11 = vpop.eup %4218  ;;  %v2334_v0 = vsel %vm179_vm1, %v2328_v10, %v2329_v63  ;;  %v2322_v20 = vsel %vm146_vm0, %v2316_v3, %v2317_v61  ;;  %v2313_v56 = vadd.f32 %v2309_v21, %v2304_v60 }
 0x88e   :  { %v2305_v28 = vsel %vm2297_vm12, %v5439_v5, %v2289_v50  ;;  %v2290_v13 = vmul.f32 %v4219_v11, %v2266_v9  ;;  %v2336_v24 = vmul.f32 %v2334_v0, %v5738_v23  ;;  %v5739_v5 = vld [vmem:[#allocation24_spill] sm:$0xff]  ;;  %v2325_v42 = vmul.f32 %v2322_v20, %v5743_v37  ;;  %v4243_v20 = vld [vmem:[%s5709_s12] sm:$0x3] }
 0x88f   :  { %v2310_v17 = vmul.f32 %v2305_v28, %v1137_v22  ;;  %v2330_v59 = vrot.slane %v2313_v56, 1  ;;  %v2318_v25 = vrot.slane %v2313_v56, 7  ;;  %v4245_v28 = vld [vmem:[%s5705_s8 + $0x70] sm:$0xff]  ;;  %v4247_v23 = vld [vmem:[%s5705_s8 + $0x60] sm:$0xff] }
 0x890   :  { %v2306_v57 = vsel %vm2298_vm13, %v5443_v44, %v2290_v13  ;;  %3971 = vmatprep.mubr.f32.mxu1 %v2336_v24  ;;  %v4246_v13 = vld [vmem:[%s5705_s8 + $0x68] sm:$0xff]  ;;  %v4248_v24 = vld [vmem:[%s5705_s8 + $0x58] sm:$0xff] }
 0x891   :  { %v2314_v30 = vadd.f32 %v2310_v17, %v2306_v57  ;;  %v2333_v31 = vsel %vm179_vm1, %v2329_v63, %v2330_v59  ;;  %v2321_v35 = vsel %vm146_vm0, %v2317_v61, %v2318_v25  ;;  %v4249_v17 = vld [vmem:[%s5705_s8 + $0x50] sm:$0xff]  ;;  %v4251_v57 = vld [vmem:[%s5705_s8 + $0x40] sm:$0xff] }
 0x892   :  { %v2337_v32 = vmul.f32 %v2333_v31, %v5739_v5  ;;  %v2326_v45 = vmul.f32 %v2321_v35, %v5744_v6  ;;  %v4254_v31 = vld [vmem:[%s5705_s8 + $0x28] sm:$0xff]  ;;  %v4255_v35 = vld [vmem:[%s5705_s8 + $0x20] sm:$0xff]  ;;  %v4257_v5 = vld [vmem:[%s5705_s8 + $0x10] sm:$0xff] }
 0x893   :  { %v2319_v36 = vrot.slane %v2314_v30, 7  ;;  %v2331_v38 = vrot.slane %v2314_v30, 1 }
 0x894   :  { %3972 = vmatmul.mubr.f32.vlgmr.msra.gmra.mxu1 %v2337_v32  ;;  %v4258_v32 = vld [vmem:[%s5705_s8 + $0x8] sm:$0xff] }
 0x895   :  { %v2323_v12 = vsel %vm146_vm0, %v2319_v36, %v2316_v3  ;;  %v2332_v44 = vsel %vm179_vm1, %v2330_v59, %v2331_v38  ;;  %v2335_v26 = vsel %vm179_vm1, %v2331_v38, %v2328_v10  ;;  %v2320_v39 = vsel %vm146_vm0, %v2318_v25, %v2319_v36  ;;  %v4250_v59 = vld [vmem:[%s5705_s8 + $0x48] sm:$0xff]  ;;  %v4252_v25 = vld [vmem:[%s5705_s8 + $0x38] sm:$0xff]  ;;  %v4259_v38 = vld [vmem:[%s5705_s8] sm:$0xff] }
 0x896   :  { %v2324_v40 = vmul.f32 %v2323_v12, %v5740_v33  ;;  %v2338_v7 = vmul.f32 %v2332_v44, %v5741_v41  ;;  %v2339_v16 = vmul.f32 %v2335_v26, %v5742_v55  ;;  %v2327_v51 = vmul.f32 %v2320_v39, %v5745_v47  ;;  %v4256_v36 = vld [vmem:[%s5705_s8 + $0x18] sm:$0xff]  ;;  %v4260_v39 = vld [vmem:[#allocation11] sm:$0xff] }
 0x898   :  { %2457 = vmatmul.mubr.f32.vlgmr.msra.gmra.mxu0 %v2324_v40  ;;  %3974 = vmatprep.mubr.f32.mxu1 %v2338_v7 }
 0x899   :  { %2461 = vmatprep.mubr.f32.mxu0 %v2312_v19  ;;  %3975 = vmatmul.mubr.f32.gmra.mxu1 %v2339_v16 }
 0x89a   :  { %3985 = vmatprep.mubr.msk.f32.mxu1 %vm4432_vm2, %v5735_v15 }
 0x89c   :  { %2462 = vmatmul.mubr.f32.gmra.mxu0 %v2325_v42 }
 0x89d   :  { %2466 = vmatprep.mubr.f32.mxu0 %v2313_v56  ;;  %v4244_v56 = vld [vmem:[%s5705_s8 + $0x78] sm:$0xff] }
 0x8a0   :  { %2467 = vmatmul.mubr.f32.gmra.mxu0 %v2326_v45 }
 0x8a1   :  { %2471 = vmatprep.mubr.f32.mxu0 %v2314_v30  ;;  %v4253_v30 = vld [vmem:[%s5705_s8 + $0x30] sm:$0xff] }
 0x8a4   :  { %2472 = vmatmul.mubr.f32.gmra.mxu0 %v2327_v51 }
 0x8a5   :  { %3996 = vmatprep.mubr.msk.f32.mxu0 %vm4432_vm2, %v5735_v15 }
 0x954   :  { %v3973_v52 = vpop.f32.mrf.mxu1 }
 0x956   :  { %v2543_v1 = vpop.f32.mrf.mxu1 }
 0x958   :  { %v3673_v14 = vpop.f32.mrf.mxu0 }
 0x959   :  { %v3976_v53 = vpop.f32.mrf.mxu1 }
 0x95a   :  { %v3674_v34 = vpop.f32.mrf.mxu0 }
 0x95b   :  { %v3675_v21 = vadd.f32 %v3674_v34, %v3673_v14  ;;  %v2553_v10 = vpop.f32.mrf.mxu1  ;;  %v3432_v14 = vld [vmem:[#allocation10 + $0x4] ss:$0 sm:$0xff] }
 0x95c   :  { %v3676_v48 = vpop.f32.mrf.mxu0 }
 0x95d   :  { %v2459_v63 = vadd.f32 %v3675_v21, %v3427_v49  ;;  %v4265_v21 = vld [vmem:[%s5697_s0] sm:$0xff] }
 0x95e   :  { %v3677_v2 = vpop.f32.mrf.mxu0 }
 0x95f   :  { %v3678_v19 = vadd.f32 %v3677_v2, %v3676_v48  ;;  %v5525_v11 = vadd.f32 %v2543_v1, %v2459_v63  ;;  %v3257_v2 = vld [vmem:[#allocation8 + $0x78] sm:$0xff]  ;;  %v3256_v1 = vld [vmem:[#allocation8 + $0x70] sm:$0xff]  ;;  %v3247_v63 = vld [vmem:[#allocation8 + $0x28] sm:$0xff] }
 0x960   :  { %v3679_v18 = vpop.f32.mrf.mxu0 }
 0x961   :  { %v2464_v46 = vadd.f32 %v3678_v19, %v3427_v49  ;;  %v2634_v0 = vmul.f32 %v5525_v11, %v5525_v11  ;;  %v3255_v19 = vld [vmem:[#allocation8 + $0x68] sm:$0xff] }
 0x962   :  { %v3680_v54 = vpop.f32.mrf.mxu0 }
 0x963   :  { %v3681_v27 = vadd.f32 %v3680_v54, %v3679_v18  ;;  %v5519_v50 = vadd.f32 %v3973_v52, %v2464_v46  ;;  %v3250_v46 = vld [vmem:[#allocation8 + $0x40] sm:$0xff] }
 0x964   :  { %v3682_v4 = vpop.f32.mrf.mxu0 }
 0x965   :  { %v2469_v62 = vadd.f32 %v3681_v27, %v3427_v49  ;;  %v2635_v29 = vmul.f32 %v5519_v50, %v5519_v50  ;;  %v4262_v27 = vld [vmem:[%s5710_s13 + $0x8] sm:$0xff] }
 0x966   :  { %v3683_v58 = vpop.f32.mrf.mxu0 }
 0x967   :  { %v3684_v3 = vadd.f32 %v3683_v58, %v3682_v4  ;;  %v5515_v61 = vadd.f32 %v2553_v10, %v2469_v62  ;;  %v4263_v4 = vld [vmem:[%s5710_s13 + $0x10] sm:$0xff]  ;;  %v3253_v58 = vld [vmem:[#allocation8 + $0x58] sm:$0xff] }
 0x968   :  { %v3252_v62 = vld [vmem:[#allocation8 + $0x50] sm:$0xff] }
 0x969   :  { %v2474_v43 = vadd.f32 %v3684_v3, %v3427_v49  ;;  %v2636_v60 = vmul.f32 %v5515_v61, %v5515_v61  ;;  %v3254_v49 = vld [vmem:[#allocation8 + $0x60] sm:$0xff]  ;;  %v3251_v3 = vld [vmem:[#allocation8 + $0x48] sm:$0xff]  ;;  %v3248_v10 = vld [vmem:[#allocation8 + $0x30] sm:$0xff] }
 0x96b   :  { %v5517_v22 = vadd.f32 %v3976_v53, %v2474_v43  ;;  %v4264_v53 = vld [vmem:[%s5710_s13 + $0x18] sm:$0xff] }
 0x96c   :  { %v3249_v43 = vld [vmem:[#allocation8 + $0x38] sm:$0xff] }
 0x96d   :  { %3978 = vmatpush3.msra.mxu1 %v5517_v22  ;;  %v2637_v9 = vmul.f32 %v5517_v22, %v5517_v22 }
 0x96e   :  { %3979 = vmatprep.subr.mxu1 %v5735_v15 }
 0x96f   :  { %3980 = vmatpush3.msra.mxu1 %v5515_v61  ;;  %3989 = vmatpush3.msra.mxu0 %v2637_v9  ;;  %v3246_v9 = vld [vmem:[#allocation8 + $0x20] sm:$0xff] }
 0x970   :  { %3981 = vmatprep.subr.mxu1 %v5735_v15  ;;  %3990 = vmatprep.subr.mxu0 %v5735_v15 }
 0x971   :  { %3982 = vmatpush3.msra.mxu1 %v5519_v50  ;;  %3991 = vmatpush3.msra.mxu0 %v2636_v60  ;;  %v3245_v60 = vld [vmem:[#allocation8 + $0x18] sm:$0xff] }
 0x972   :  { %3983 = vmatprep.subr.mxu1 %v5735_v15  ;;  %3992 = vmatprep.subr.mxu0 %v5735_v15 }
 0x973   :  { %3984 = vmatpush3.msra.mxu1 %v5525_v11  ;;  %3993 = vmatpush3.msra.mxu0 %v2635_v29  ;;  %v3244_v29 = vld [vmem:[#allocation8 + $0x10] sm:$0xff] }
 0x974   :  { %3986 = vmatmul.mubr.msk.f32.vlgmr.msra.gmra.mxu1 %vm428_vm3, %v4243_v20  ;;  %3994 = vmatprep.subr.mxu0 %v5735_v15 }
 0x975   :  { %3995 = vmatpush3.msra.mxu0 %v2634_v0  ;;  %3999 = vmatprep.subr.mxu1 %v5735_v15  ;;  %v3243_v0 = vld [vmem:[#allocation8 + $0x8] sm:$0xff] }
 0x976   :  { %3997 = vmatmul.mubr.msk.f32.vlgmr.msra.gmra.mxu0 %vm428_vm3, %v4243_v20  ;;  %4000 = vmatpush3.msra.mxu1 %v4244_v56  ;;  %v3242_v20 = vld [vmem:[#allocation8] sm:$0xff] }
 0x977   :  { %4001 = vmatprep.subr.mxu1 %v5735_v15  ;;  %4034 = vmatprep.subr.mxu0 %v5735_v15 }
 0x978   :  { %4002 = vmatpush3.msra.mxu1 %v4245_v28  ;;  %4035 = vmatpush3.msra.mxu0 %v4244_v56  ;;  %v4266_v56 = vld [vmem:[%s5697_s0 + $0x8] sm:$0xff] }
 0x979   :  { %4003 = vmatprep.subr.mxu1 %v5735_v15  ;;  %4036 = vmatprep.subr.mxu0 %v5735_v15 }
 0x97a   :  { %4004 = vmatpush3.msra.mxu1 %v4246_v13  ;;  %4037 = vmatpush3.msra.mxu0 %v4245_v28  ;;  %v4267_v28 = vld [vmem:[%s5697_s0 + $0x10] sm:$0xff] }
 0x97b   :  { %4005 = vmatprep.subr.mxu1 %v5735_v15  ;;  %4038 = vmatprep.subr.mxu0 %v5735_v15 }
 0x97c   :  { %4006 = vmatpush3.msra.mxu1 %v4247_v23  ;;  %4039 = vmatpush3.msra.mxu0 %v4246_v13  ;;  %v4268_v13 = vld [vmem:[%s5697_s0 + $0x18] sm:$0xff]  ;;  %s4433_s0 = smov [#allocation13]  }
 0x97d   :  { %4007 = vmatprep.subr.mxu1 %v5735_v15  ;;  %4040 = vmatprep.subr.mxu0 %v5735_v15  ;;  %s3361_s28 = sshll.u32 %s4433_s0, 4  ;;  %s3362_s28 = int_to_ptr.vmem [resolvable:$true] %s3361_s28 }
 0x97e   :  { %4008 = vmatpush3.msra.mxu1 %v4248_v24  ;;  %4041 = vmatpush3.msra.mxu0 %v4247_v23  ;;  %s4389_s6 = scalar_lea.vmem %s3362_s28, 512  ;;  %p4394_p3 = scmp.lt.s32.totalorder %s3362_s28, %s3362_s28 }
 0x97f   :  { %4009 = vmatprep.subr.mxu1 %v5735_v15  ;;  %4042 = vmatprep.subr.mxu0 %v5735_v15  ;;  %p4390_p2 = scmp.ne.s32.totalorder %s3362_s28, %s4389_s6  ;;  %p4395_p4 = scmp.lt.s32.totalorder %s4389_s6, %s4389_s6 }
 0x980   :  { %4010 = vmatpush3.msra.mxu1 %v4249_v17  ;;  %4043 = vmatpush3.msra.mxu0 %v4248_v24 }
 0x981   :  { %4011 = vmatprep.subr.mxu1 %v5735_v15  ;;  %4044 = vmatprep.subr.mxu0 %v5735_v15  ;;  %p4396_p5 = por %p4395_p4, %p4394_p3 }
 0x982   :  { %4012 = vmatpush3.msra.mxu1 %v4250_v59  ;;  %4045 = vmatpush3.msra.mxu0 %v4249_v17 }
 0x983   :  { %4013 = vmatprep.subr.mxu1 %v5735_v15  ;;  %4046 = vmatprep.subr.mxu0 %v5735_v15  ;;  %p4397_p6 = pnand %p4396_p5, %p4390_p2 }
 0x984   :  { %4014 = vmatpush3.msra.mxu1 %v4251_v57  ;;  %4047 = vmatpush3.msra.mxu0 %v4250_v59 }
 0x985   :  { %4015 = vmatprep.subr.mxu1 %v5735_v15  ;;  %4048 = vmatprep.subr.mxu0 %v5735_v15 }
 0x986   :  { %4016 = vmatpush3.msra.mxu1 %v4252_v25  ;;  %4049 = vmatpush3.msra.mxu0 %v4251_v57 }
 0x987   :  { %4017 = vmatprep.subr.mxu1 %v5735_v15  ;;  %4050 = vmatprep.subr.mxu0 %v5735_v15 }
 0x988   :  { %4018 = vmatpush3.msra.mxu1 %v4253_v30  ;;  %4051 = vmatpush3.msra.mxu0 %v4252_v25 }
 0x989   :  { %4019 = vmatprep.subr.mxu1 %v5735_v15  ;;  %4052 = vmatprep.subr.mxu0 %v5735_v15 }
 0x98a   :  { %4020 = vmatpush3.msra.mxu1 %v4254_v31  ;;  %4053 = vmatpush3.msra.mxu0 %v4253_v30 }
 0x98b   :  { %4021 = vmatprep.subr.mxu1 %v5735_v15  ;;  %4054 = vmatprep.subr.mxu0 %v5735_v15 }
 0x98c   :  { %4022 = vmatpush3.msra.mxu1 %v4255_v35  ;;  %4055 = vmatpush3.msra.mxu0 %v4254_v31 }
 0x98d   :  { %4023 = vmatprep.subr.mxu1 %v5735_v15  ;;  %4056 = vmatprep.subr.mxu0 %v5735_v15 }
 0x98e   :  { %4024 = vmatpush3.msra.mxu1 %v4256_v36  ;;  %4057 = vmatpush3.msra.mxu0 %v4255_v35 }
 0x98f   :  { %4025 = vmatprep.subr.mxu1 %v5735_v15  ;;  %4058 = vmatprep.subr.mxu0 %v5735_v15 }
 0x990   :  { %4026 = vmatpush3.msra.mxu1 %v4257_v5  ;;  %4059 = vmatpush3.msra.mxu0 %v4256_v36 }
 0x991   :  { %4027 = vmatprep.subr.mxu1 %v5735_v15  ;;  %4060 = vmatprep.subr.mxu0 %v5735_v15 }
 0x992   :  { %4028 = vmatpush3.msra.mxu1 %v4258_v32  ;;  %4061 = vmatpush3.msra.mxu0 %v4257_v5 }
 0x993   :  { %4029 = vmatprep.subr.mxu1 %v5735_v15  ;;  %4062 = vmatprep.subr.mxu0 %v5735_v15 }
 0x994   :  { %4030 = vmatpush3.msra.mxu1 %v4259_v38  ;;  %4031 = vmatprep.mubr.msk.f32.mxu1 %vm4432_vm2, %v5735_v15 }
 0x995   :  { %4063 = vmatpush3.msra.mxu0 %v4258_v32  ;;  %4066 = vmatprep.mubr.msk.f32.mxu0 %vm4432_vm2, %v5735_v15 }
 0x996   :  { %4064 = vmatprep.subr.mxu0 %v5735_v15  ;;  %4069 = vmatprep.subr.mxu1 %v5735_v15 }
 0x997   :  { %4065 = vmatpush3.msra.mxu0 %v4259_v38 }
 0xa34   :  { %v2630_v12 = vpop.f32.mrf.mxu1 }
 0xa35   :  { %4032 = vmatmul.mubr.f32.vlgmr.msra.gmra.mxu1 %v2630_v12 }
 0xa36   :  { %v2704_v44 = vpop.f32.mrf.mxu0  ;;  %v3987_v26 = vpop.f32.mrf.mxu1  ;;  %4070 = vmatpush3.msra.mxu1 %v4260_v39  ;;  %4071 = vmatprep.mubr.msk.f32.mxu1 %vm4432_vm2, %v5735_v15 }
 0xa37   :  { %4067 = vmatmul.mubr.f32.vlgmr.msra.gmra.mxu0 %v2704_v44  ;;  %4074 = vmatprep.subr.mxu1 %v5735_v15 }
 0xa38   :  { %v3998_v33 = vpop.f32.mrf.mxu0  ;;  %4081 = vmatprep.mubr.msk.f32.mxu0 %vm896_vm5, %v5379_v8  ;;  %v4261_v8 = vld [vmem:[%s5710_s13] sm:$0xff] }
 0xaf5   :  { %v2774_v40 = vpop.f32.mrf.mxu1 }
 0xaf6   :  { %v2848_v41 = vmul.f32 %v2774_v40, %v2774_v40  ;;  %4072 = vmatmul.mubr.msk.f32.vlgmr.msra.gmra.mxu1 %vm738_vm4, %v2774_v40 }
 0xaf7   :  { %v2844_v7 = vpop.f32.mrf.mxu0  ;;  %v4033_v55 = vpop.f32.mrf.mxu1  ;;  %4075 = vmatpush3.msra.mxu1 %v4260_v39  ;;  %4076 = vmatprep.mubr.msk.f32.mxu1 %vm4432_vm2, %v5735_v15  ;;  %v3433_v15 = vld [vmem:[#allocation10 + $0x5] ss:$0 sm:$0xff] }
 0xaf8   :  { %v2849_v16 = vsub.f32 %v2844_v7, %v2848_v41 }
 0xaf9   :  { %v4068_v37 = vpop.f32.mrf.mxu0 }
 0xafa   :  { %v2850_v42 = vmax.f32 %v2849_v16, 0.0 }
 0xafc   :  { %v2851_v6 = vadd.f32 1e-05, %v2850_v42 }
 0xafe   :  { %4220 = vrsqrt.f32 %v2851_v6 }
 0xb0b   :  { %v4221_v45 = vpop.eup %4220 }
 0xb0c   :  { %4077 = vmatmul.mubr.msk.f32.vlgmr.msra.gmra.mxu1 %vm738_vm4, %v4221_v45 }
 0xb0d   :  { %4089 = vmatprep.mubr.msk.f32.mxu1 %vm896_vm5, %v4261_v8 }
 0xbb6   :  { %v2922_v47 = vpop.f32.mrf.mxu1 }
 0xbb8   :  { %v4073_v51 = vpop.f32.mrf.mxu1 }
 0xbcc   :  { %v2995_v34 = vpop.f32.mrf.mxu1 }
 0xbcd   :  { %v3003_v48 = vmul.f32 %v3432_v14, %v2995_v34 }
 0xbce   :  { %v4078_v52 = vpop.f32.mrf.mxu1 }
 0xbcf   :  { %v3004_v18 = vmul.f32 %v3003_v48, %v2922_v47  ;;  %4079 = vmatprep.subr.msk.mxu0 %vm905_vm6, %v3003_v48 }
 0xbd0   :  { %4080 = vmatpush3.msk.msra.mxu0 %vm905_vm6, %v3003_v48 }
 0xbd1   :  { %v3009_v54 = vsub.f32 %v3433_v15, %v3004_v18  ;;  %4082 = vmatmul.mubr.msk.f32.vlgmr.msra.gmra.mxu0 %vm896_vm5, %v4262_v27  ;;  %4095 = vmatprep.subr.mxu0 %v3257_v2 }
 0xbd2   :  { %4084 = vmatprep.mubr.msk.f32.mxu0 %vm896_vm5, %v4263_v4  ;;  %4096 = vmatpush3.msra.mxu0 %v3257_v2 }
 0xbd3   :  { %4087 = vmatprep.subr.msk.mxu1 %vm905_vm6, %v3009_v54  ;;  %4097 = vmatprep.subr.mxu0 %v3256_v1 }
 0xbd4   :  { %4088 = vmatpush3.msk.msra.mxu1 %vm905_vm6, %v3009_v54  ;;  %4098 = vmatpush3.msra.mxu0 %v3256_v1 }
 0xbd5   :  { %4085 = vmatmul.mubr.msk.f32.gmra.mxu0 %vm896_vm5, %v4264_v53  ;;  %4090 = vmatmul.mubr.msk.f32.vlgmr.msra.gmra.mxu1 %vm896_vm5, %v4262_v27  ;;  %v3448_v27 = vld [vmem:[#allocation10 + $0x6] ss:$0 sm:$0xff] }
 0xbd6   :  { %4092 = vmatprep.mubr.msk.f32.mxu1 %vm896_vm5, %v4263_v4  ;;  %4099 = vmatprep.subr.mxu0 %v3255_v19 }
 0xbd7   :  { %4100 = vmatpush3.msra.mxu0 %v3255_v19  ;;  %4127 = vmatprep.mubr.f32.mxu0 %v4265_v21 }
 0xbd8   :  { %4101 = vmatprep.subr.mxu0 %v3254_v49 }
 0xbd9   :  { %4093 = vmatmul.mubr.msk.f32.gmra.mxu1 %vm896_vm5, %v4264_v53  ;;  %4102 = vmatpush3.msra.mxu0 %v3254_v49 }
 0xbda   :  { %4103 = vmatprep.subr.mxu0 %v3253_v58 }
 0xbdb   :  { %4104 = vmatpush3.msra.mxu0 %v3253_v58 }
 0xbdc   :  { %4105 = vmatprep.subr.mxu0 %v3252_v62 }
 0xbdd   :  { %4106 = vmatpush3.msra.mxu0 %v3252_v62 }
 0xbde   :  { %4107 = vmatprep.subr.mxu0 %v3251_v3 }
 0xbdf   :  { %4108 = vmatpush3.msra.mxu0 %v3251_v3 }
 0xbe0   :  { %4109 = vmatprep.subr.mxu0 %v3250_v46 }
 0xbe1   :  { %4110 = vmatpush3.msra.mxu0 %v3250_v46 }
 0xbe2   :  { %4111 = vmatprep.subr.mxu0 %v3249_v43 }
 0xbe3   :  { %4112 = vmatpush3.msra.mxu0 %v3249_v43 }
 0xbe4   :  { %4113 = vmatprep.subr.mxu0 %v3248_v10 }
 0xbe5   :  { %4114 = vmatpush3.msra.mxu0 %v3248_v10 }
 0xbe6   :  { %4115 = vmatprep.subr.mxu0 %v3247_v63 }
 0xbe7   :  { %4116 = vmatpush3.msra.mxu0 %v3247_v63 }
 0xbe8   :  { %4117 = vmatprep.subr.mxu0 %v3246_v9 }
 0xbe9   :  { %4118 = vmatpush3.msra.mxu0 %v3246_v9 }
 0xbea   :  { %4119 = vmatprep.subr.mxu0 %v3245_v60 }
 0xbeb   :  { %4120 = vmatpush3.msra.mxu0 %v3245_v60 }
 0xbec   :  { %4121 = vmatprep.subr.mxu0 %v3244_v29 }
 0xbed   :  { %4122 = vmatpush3.msra.mxu0 %v3244_v29 }
 0xbee   :  { %4123 = vmatprep.subr.mxu0 %v3243_v0 }
 0xbef   :  { %4124 = vmatpush3.msra.mxu0 %v3243_v0 }
 0xbf0   :  { %4125 = vmatprep.subr.mxu0 %v3242_v20 }
 0xbf1   :  { %4126 = vmatpush3.msra.mxu0 %v3242_v20 }
 0xbf2   :  { %4128 = vmatmul.mubr.f32.vlgmr.msra.gmra.mxu0 %v4266_v56 }
 0xbf3   :  { %4130 = vmatprep.mubr.f32.mxu0 %v4267_v28 }
 0xbf6   :  { %4131 = vmatmul.mubr.f32.gmra.mxu0 %v4268_v13 }
 0xc91   :  { %v4083_v23 = vpop.f32.mrf.mxu0 }
 0xc92   :  { %v3187_v17 = vmul.f32 %v4083_v23, %v5519_v50 }
 0xc93   :  { %v3079_v24 = vpop.f32.mrf.mxu0 }
 0xc94   :  { %v3186_v25 = vmul.f32 %v3079_v24, %v5525_v11 }
 0xc95   :  { %v4086_v59 = vpop.f32.mrf.mxu0  ;;  %v4091_v57 = vpop.f32.mrf.mxu1 }
 0xc96   :  { %v3191_v30 = vadd.f32 %v4091_v57, %v3187_v17  ;;  %v3189_v36 = vmul.f32 %v4086_v59, %v5517_v22 }
 0xc97   :  { %v3089_v31 = vpop.f32.mrf.mxu0  ;;  %v3167_v35 = vpop.f32.mrf.mxu1 }
 0xc98   :  { %v3195_v5 = vmin.f32 %v3191_v30, 20.0  ;;  %v3190_v32 = vadd.f32 %v3186_v25, %v3167_v35  ;;  %v3188_v44 = vmul.f32 %v3089_v31, %v5515_v61  ;;  %vm3235_vm0 = vcmp.gt.f32.partialorder %v3191_v30, 20.0 }
 0xc99   :  { %v4094_v38 = vpop.f32.mrf.mxu1 }
 0xc9a   :  { %v3200_v12 = vmul.f32 1.442695, %v3195_v5  ;;  %v3194_v26 = vmin.f32 %v3190_v32, 20.0  ;;  %v5679_v39 = vadd.f32 %v4094_v38, %v3189_v36  ;;  %vm3234_vm1 = vcmp.gt.f32.partialorder %v3190_v32, 20.0 }
 0xc9b   :  { %v3177_v33 = vpop.f32.mrf.mxu1 }
 0xc9c   :  { %4222 = vpow2.f32 %v3200_v12  ;;  %v3198_v50 = vmul.f32 1.442695, %v3194_v26  ;;  %v3197_v40 = vmin.f32 %v5679_v39, 20.0  ;;  %v5682_v11 = vadd.f32 %v3188_v44, %v3177_v33 }
 0xc9d   :  { %vm3237_vm2 = vcmp.gt.f32.partialorder %v5679_v39, 20.0 }
 0xc9e   :  { %4224 = vpow2.f32 %v3198_v50  ;;  %v3204_v41 = vmul.f32 1.442695, %v3197_v40  ;;  %v3196_v22 = vmin.f32 %v5682_v11, 20.0  ;;  %vm3236_vm3 = vcmp.gt.f32.partialorder %v5682_v11, 20.0 }
 0xca0   :  { %4226 = vpow2.f32 %v3204_v41  ;;  %v3202_v7 = vmul.f32 1.442695, %v3196_v22 }
 0xca2   :  { %4228 = vpow2.f32 %v3202_v7 }
 0xca9   :  { %v4223_v55 = vpop.eup %4222 }
 0xcaa   :  { %v3207_v16 = vadd.f32 1.0, %v4223_v55 }
 0xcab   :  { %v4225_v61 = vpop.eup %4224 }
 0xcac   :  { %v3211_v37 = vmul.f32 %v3207_v16, %v3207_v16  ;;  %v3206_v42 = vadd.f32 1.0, %v4225_v61 }
 0xcad   :  { %v4227_v6 = vpop.eup %4226 }
 0xcae   :  { %v3223_v45 = vadd.f32 1.0, %v3211_v37  ;;  %v3210_v8 = vmul.f32 %v3206_v42, %v3206_v42  ;;  %v3209_v47 = vadd.f32 1.0, %v4227_v6  ;;  %v3445_v1 = vadd.f32 -1.0, %v3211_v37 }
 0xcaf   :  { %v4229_v51 = vpop.eup %4228 }
 0xcb0   :  { %4230 = vrcp.f32 %v3223_v45  ;;  %v3222_v14 = vadd.f32 1.0, %v3210_v8  ;;  %v3213_v34 = vmul.f32 %v3209_v47, %v3209_v47  ;;  %v3208_v48 = vadd.f32 1.0, %v4229_v51 }
 0xcb1   :  { %v3444_v54 = vadd.f32 -1.0, %v3210_v8  ;;  %v3219_v19 = vmul.f32 %v3445_v1, %v3191_v30 }
 0xcb2   :  { %4232 = vrcp.f32 %v3222_v14  ;;  %v3225_v15 = vadd.f32 1.0, %v3213_v34  ;;  %v3212_v52 = vmul.f32 %v3208_v48, %v3208_v48  ;;  %v4129_v18 = vpop.f32.mrf.mxu0  ;;  %v3447_v49 = vadd.f32 -1.0, %v3213_v34 }
 0xcb3   :  { %v3335_v58 = vadd.f32 %v4129_v18, %v3448_v27  ;;  %v3218_v21 = vmul.f32 %v3444_v54, %v3190_v32 }
 0xcb4   :  { %4234 = vrcp.f32 %v3225_v15  ;;  %v3224_v2 = vadd.f32 1.0, %v3212_v52  ;;  %v3329_v4 = vpop.f32.mrf.mxu0  ;;  %v3446_v46 = vadd.f32 -1.0, %v3212_v52  ;;  %v3221_v9 = vmul.f32 %v3447_v49, %v5679_v39 }
 0xcb5   :  { %v3330_v29 = vadd.f32 %v3448_v27, %v3329_v4 }
 0xcb6   :  { %4236 = vrcp.f32 %v3224_v2  ;;  %v4132_v43 = vpop.f32.mrf.mxu0  ;;  %v3220_v28 = vmul.f32 %v3446_v46, %v5682_v11 }
 0xcb7   :  { %v3345_v56 = vadd.f32 %v4132_v43, %v3448_v27 }
 0xcb8   :  { %v3339_v24 = vpop.f32.mrf.mxu0 }
 0xcbd   :  { %v4231_v53 = vpop.eup %4230 }
 0xcbe   :  { %v3231_v62 = vmul.f32 %v4231_v53, %v3219_v19 }
 0xcbf   :  { %v4233_v3 = vpop.eup %4232 }
 0xcc0   :  { %v3239_v10 = vsel %vm3235_vm0, %v3191_v30, %v3231_v62  ;;  %v3230_v63 = vmul.f32 %v4233_v3, %v3218_v21  ;;  %v3340_v30 = vadd.f32 %v3448_v27, %v3339_v24 }
 0xcc1   :  { %v3349_v60 = vadd.f32 %v3335_v58, %v3239_v10  ;;  %v4235_v0 = vpop.eup %4234 }
 0xcc2   :  { %v3238_v20 = vsel %vm3234_vm1, %v3190_v32, %v3230_v63  ;;  %v3233_v23 = vmul.f32 %v4235_v0, %v3221_v9 }
 0xcc3   :  { %3353 = vst [vmem:[#allocation13 + $0x8] sm:$0xff] %v3349_v60  ;;  %v3348_v13 = vadd.f32 %v3330_v29, %v3238_v20  ;;  %v4237_v17 = vpop.eup %4236 }
 0xcc4   :  { %v3241_v59 = vsel %vm3237_vm2, %v5679_v39, %v3233_v23  ;;  %v3232_v57 = vmul.f32 %v4237_v17, %v3220_v28 }
 0xcc5   :  { %3352 = vst [vmem:[#allocation13] sm:$0xff] %v3348_v13  ;;  %v3351_v25 = vadd.f32 %v3345_v56, %v3241_v59 }
 0xcc6   :  { %v3240_v31 = vsel %vm3236_vm3, %v5682_v11, %v3232_v57 }
 0xcc7   :  { %3355 = vst [vmem:[#allocation13 + $0x18] sm:$0xff] %v3351_v25  ;;  %v3350_v35 = vadd.f32 %v3340_v30, %v3240_v31 }
 0xcc9   :  { %3354 = vst [vmem:[#allocation13 + $0x10] sm:$0xff] %v3350_v35 }
 0xcca   :  { %4400 = shalt.err (!%p4397_p6)
}
 0xccb   :  { %3367 = dma.vmem_to_hbm [thread:$0]  %s3362_s28, 512, %s5711_s14, [#allocation4], %s4424_s25, %s4424_s25, %s4425_s26  }
 0xccc   :  { %4417 = dma.done.wait [#allocation4], 512  }
 0xccd   :  { %4418 = vsyncadd [#allocation4], 4294966784 }
 0xcce   :  { %3371 = vsyncpa [#allocation3], 1 }
 0xccf   :  { %3372 = vsyncpa [#allocation6], 1 }
 0xcd0   :  { %3373 = vsyncpa [#allocation9], 1 }
 0xcd1   :  { %3374 = vsyncpa [#allocation12], 1 }
 0xcd2   :  { %3375 = vsyncpa [#allocation4], 1 }

</bundles_post_ra>
